<compile_context>
chip_gen: v7x
topology: tpu7x:2x2x1
jax: 0.10.0
libtpu: 0.0.40
codegen_flags: <defaults>
</compile_context>

<pallas_src>
import functools

import jax
import jax.numpy as jnp
from jax.experimental import pallas as pl
from jax.experimental.pallas import tpu as pltpu


# ----------------------------- tiling helpers -------------------------------

def _vmem_limit_bytes():
    """Generation-aware scoped-VMEM limit (v7x: 64MiB physical; v5e/v6e: 128MiB)."""
    try:
        cap = int(pltpu.get_tpu_info().vmem_capacity_bytes)
    except Exception:                      # info query unavailable -> be safe
        cap = 64 * 1024 * 1024
    return max(16 * 1024 * 1024, min((cap * 5) // 8, 96 * 1024 * 1024))


def _pick_tile_m(m, cap):
    """Largest tile <= cap dividing M (prefer mult-of-16/8); else cap (ragged)."""
    if m <= cap:
        return m
    for step in (16, 8):
        start = cap - cap % step
        for t in range(start, step - 1, -step):
            if m % t == 0:
                return t
    return cap  # ragged edge block; Pallas masks the partial output tile


def _split_for_megacore(m, tm, n_blocks_other):
    """Ensure >=2 grid blocks along the parallel M axis (v7x has 2 TensorCores)."""
    if n_blocks_other >= 2 or m < 128 or pl.cdiv(m, tm) >= 2:
        return tm
    half = -(-((tm + 1) // 2) // 8) * 8          # ceil-half rounded up to x8
    return max(8, half)


# ----------------------------- Pallas kernels -------------------------------

def _matmul_bias_act_kernel(x_ref, w_ref, b_ref, o_ref, *, apply_relu):
    """One (tm, tn) output tile: o = act(x @ w + b), single K block."""
    y = jnp.dot(x_ref[...], w_ref[...], preferred_element_type=jnp.float32)
    y = y + b_ref[...].astype(jnp.float32)
    if apply_relu:
        y = jnp.maximum(y, 0.0)
    o_ref[...] = y.astype(o_ref.dtype)


def fused_matmul(x, w, b, *, apply_relu, out_dtype, x_block_bytes=2 << 20):
    """y = act(x @ w + b).  x:(M,K) bf16, w:(K,N) bf16, b:(1,N) f32."""
    M, K = x.shape
    Kw, N = w.shape
    assert K == Kw, (K, Kw)
    # K is kept as ONE VMEM block; guard against silently blowing the budget.
    assert K <= 4096, "K no longer fits a single VMEM block; add K tiling"

    tn = min(128, N)
    n_blocks = pl.cdiv(N, tn)
    cap = max(128, min(2048,
                       (x_block_bytes // (K * x.dtype.itemsize)) // 128 * 128))
    tm = _pick_tile_m(M, cap)
    tm = _split_for_megacore(M, tm, n_blocks)
    grid = (pl.cdiv(M, tm), n_blocks)

    kernel = functools.partial(_matmul_bias_act_kernel, apply_relu=apply_relu)
    return pl.pallas_call(
        kernel,
        out_shape=jax.ShapeDtypeStruct((M, N), out_dtype),
        grid_spec=pltpu.PrefetchScalarGridSpec(
            num_scalar_prefetch=0,
            grid=grid,
            in_specs=[
                pl.BlockSpec((tm, K), lambda i, j: (i, 0)),
                pl.BlockSpec((K, tn), lambda i, j: (0, j)),
                pl.BlockSpec((1, tn), lambda i, j: (0, j)),
            ],
            out_specs=pl.BlockSpec((tm, tn), lambda i, j: (i, j)),
        ),
        compiler_params=pltpu.CompilerParams(
            dimension_semantics=("parallel", "parallel"),
            vmem_limit_bytes=_vmem_limit_bytes(),
        ),
    )(x, w, b)


def _head_kernel(x_ref, w1_ref, b1_ref, w2_ref, b2_ref, o_ref):
    """value_tile = relu(x @ w1 + b1) @ w2 + b2  (fc1+fc2 fused)."""
    h = jnp.dot(x_ref[...], w1_ref[...], preferred_element_type=jnp.float32)
    h = jnp.maximum(h + b1_ref[...].astype(jnp.float32), 0.0)
    y = jnp.dot(h.astype(w2_ref.dtype), w2_ref[...],
                preferred_element_type=jnp.float32)
    o_ref[...] = y + b2_ref[...].astype(jnp.float32)


def fused_head(x, w1, b1, w2, b2):
    """One pallas_call for fc1 (ReLU) + fc2; weights stay VMEM-resident."""
    M, K = x.shape
    K1, N1 = w1.shape
    K2, N2 = w2.shape
    assert K == K1 and N1 == K2, (K, K1, N1, K2)

    tm = _pick_tile_m(M, 256)
    tm = _split_for_megacore(M, tm, 1)
    grid = (pl.cdiv(M, tm),)

    return pl.pallas_call(
        _head_kernel,
        out_shape=jax.ShapeDtypeStruct((M, N2), jnp.float32),
        grid_spec=pltpu.PrefetchScalarGridSpec(
            num_scalar_prefetch=0,
            grid=grid,
            in_specs=[
                pl.BlockSpec((tm, K), lambda i: (i, 0)),
                pl.BlockSpec((K1, N1), lambda i: (0, 0)),   # resident fc1 W
                pl.BlockSpec((1, N1), lambda i: (0, 0)),
                pl.BlockSpec((K2, N2), lambda i: (0, 0)),   # resident fc2 W
                pl.BlockSpec((1, N2), lambda i: (0, 0)),
            ],
            out_specs=pl.BlockSpec((tm, N2), lambda i: (i, 0)),
        ),
        compiler_params=pltpu.CompilerParams(
            dimension_semantics=("parallel",),
            vmem_limit_bytes=_vmem_limit_bytes(),
        ),
    )(x, w1, b1, w2, b2)


# ------------------------- conv via s2d + im2col (NHWC) ----------------------

def conv2d_relu(x, w_mat, b_row, kh, kw, stride, s2d, real_c):
    """Valid conv + ReLU on NHWC input.

    Only the first `real_c` channels of x are real (conv outputs are lane
    padded to 128); the channel slice is fused into the s2d / im2col slices so
    no standalone activation copy is made.  w_mat is the pre-reordered
    (K, 128) bf16 weight matrix built at init; b_row is (1, 128) f32.
    Returns (B, OH, OW, 128) bf16.
    """
    B, H, W, _ = x.shape
    C = real_c
    if s2d > 1:
        f = s2d
        # fused space-to-depth + channel slice: new channel order (di, dj, c)
        parts = [x[:, di::f, dj::f, :C] for di in range(f) for dj in range(f)]
        x = jnp.concatenate(parts, axis=-1)
        kh, kw, stride = kh // f, kw // f, stride // f
        B, H, W, C = x.shape
    oh = (H - kh) // stride + 1
    ow = (W - kw) // stride + 1
    # im2col: feature index = i*(kw*C) + j*C + c (pure slice + concat).
    # TODO(synk): im2col is still materialized by XLA (4-9x activation
    # duplication); moving it into the Pallas kernel via halo'd row tiles is
    # the remaining bandwidth lever on v5e/v6e.
    cols = [x[:, i:i + stride * oh:stride, j:j + stride * ow:stride, :C]
            for i in range(kh) for j in range(kw)]
    patches = jnp.concatenate(cols, axis=-1).reshape(B * oh * ow, kh * kw * C)
    y = fused_matmul(patches, w_mat, b_row, apply_relu=True,
                     out_dtype=jnp.bfloat16)
    return y.reshape(B, oh, ow, w_mat.shape[1])


# --------------------------- parameter preparation ---------------------------

def _prep_conv(w, b, stride, use_s2d, *, pad_to=128, scale=1.0):
    """PyTorch (Cout,Cin,KH,KW) -> (K, pad_to) matrix matching conv2d_relu."""
    cout, cin, kh, kw = w.shape
    w = w.astype(jnp.float32) * scale
    if use_s2d:
        f = stride
        rh, rw = kh // f, kw // f
        # i = bi*f + di, j = bj*f + dj ; target order (bi, bj, di, dj, c)
        w = w.reshape(cout, cin, rh, f, rw, f)
        w = w.transpose(2, 4, 3, 5, 1, 0).reshape(rh * rw * f * f * cin, cout)
    else:
        w = w.transpose(2, 3, 1, 0).reshape(kh * kw * cin, cout)
    k = w.shape[0]
    w_p = jnp.zeros((k, pad_to), jnp.float32).at[:, :cout].set(w)
    b_p = jnp.zeros((1, pad_to), jnp.float32).at[0, :cout].set(
        b.astype(jnp.float32))
    return w_p.astype(jnp.bfloat16), b_p


def init_raw_params(key):
    """Deterministic PyTorch-style (kaiming-uniform-ish) init, PyTorch layouts."""
    def uniform(k, shape, fan_in):
        bound = 1.0 / float(fan_in) ** 0.5
        return jax.random.uniform(k, shape, jnp.float32, -bound, bound)

    ks = jax.random.split(key, 10)
    return {
        "conv1_w": uniform(ks[0], (32, 3, 8, 8), 3 * 8 * 8),
        "conv1_b": uniform(ks[1], (32,), 3 * 8 * 8),
        "conv2_w": uniform(ks[2], (64, 32, 4, 4), 32 * 4 * 4),
        "conv2_b": uniform(ks[3], (64,), 32 * 4 * 4),
        "conv3_w": uniform(ks[4], (64, 64, 3, 3), 64 * 3 * 3),
        "conv3_b": uniform(ks[5], (64,), 64 * 3 * 3),
        "fc1_w": uniform(ks[6], (512, 3136), 3136),          # out_dim = 64*7*7
        "fc1_b": uniform(ks[7], (512,), 3136),
        "fc2_w": uniform(ks[8], (1, 512), 512),
        "fc2_b": uniform(ks[9], (1,), 512),
    }


def prepare_params(raw):
    """All per-call preprocessing hoisted here (runs once)."""
    p = {}
    # 1/255 normalization folded into the first conv's weights.
    p["conv1_w"], p["conv1_b"] = _prep_conv(raw["conv1_w"], raw["conv1_b"],
                                            stride=4, use_s2d=True,
                                            scale=1.0 / 255.0)
    p["conv2_w"], p["conv2_b"] = _prep_conv(raw["conv2_w"], raw["conv2_b"],
                                            stride=2, use_s2d=True)
    p["conv3_w"], p["conv3_b"] = _prep_conv(raw["conv3_w"], raw["conv3_b"],
                                            stride=1, use_s2d=False)
    # fc1: permute once from PyTorch NCHW-flatten order to our NHWC-flatten
    # order, pre-transpose to (K, N), cast to bf16.
    w1 = raw["fc1_w"].reshape(512, 64, 7, 7).transpose(0, 2, 3, 1)
    p["fc1_w"] = w1.reshape(512, 3136).T.astype(jnp.bfloat16)
    p["fc1_b"] = raw["fc1_b"].reshape(1, 512).astype(jnp.float32)
    # fc2: pad N from 1 to 128 lanes once at init (zero columns / zero bias).
    w2 = jnp.zeros((512, 128), jnp.float32).at[:, 0].set(raw["fc2_w"][0])
    p["fc2_w"] = w2.astype(jnp.bfloat16)
    p["fc2_b"] = jnp.zeros((1, 128), jnp.float32).at[0, 0].set(raw["fc2_b"][0])
    return p


# --------------------------------- forward -----------------------------------

def cnn_value_forward(params, x):
    """x: (B, 3, 84, 84) float32 pixels in [0, 255]. Returns (B,) float32."""
    B = x.shape[0]
    # NCHW -> NHWC and conv1's space-to-depth fused into ONE transpose:
    # (B,3,84,84) -> (B,21,21,48) with channel order (di, dj, c).
    h = x.astype(jnp.bfloat16).reshape(B, 3, 21, 4, 21, 4)
    h = h.transpose(0, 2, 4, 3, 5, 1).reshape(B, 21, 21, 48)
    # conv stack: spatial 84 -> 20 -> 9 -> 7, channels 3 -> 32 -> 64 -> 64
    # (kernel outputs are lane-padded to 128 channels).
    h = conv2d_relu(h, params["conv1_w"], params["conv1_b"],
                    kh=2, kw=2, stride=1, s2d=1, real_c=48)   # 8x8/s4 post-s2d
    h = conv2d_relu(h, params["conv2_w"], params["conv2_b"],
                    kh=4, kw=4, stride=2, s2d=2, real_c=32)
    h = conv2d_relu(h, params["conv3_w"], params["conv3_b"],
                    kh=3, kw=3, stride=1, s2d=1, real_c=64)
    h = h[..., :64].reshape(B, 7 * 7 * 64)                    # NHWC flatten
    y = fused_head(h, params["fc1_w"], params["fc1_b"],
                   params["fc2_w"], params["fc2_b"])          # fc1+fc2 fused
    return y[:, 0]                                            # squeeze(-1)


# ---------------------------- pure-JAX reference ------------------------------

def reference_forward(raw, x):
    h = x.astype(jnp.float32) / 255.0

    def conv(h, w, b, stride):
        y = jax.lax.conv_general_dilated(
            h, w, window_strides=(stride, stride), padding="VALID",
            dimension_numbers=("NCHW", "OIHW", "NCHW"),
            precision=jax.lax.Precision.HIGHEST)
        return jax.nn.relu(y + b[None, :, None, None])

    h = conv(h, raw["conv1_w"], raw["conv1_b"], 4)
    h = conv(h, raw["conv2_w"], raw["conv2_b"], 2)
    h = conv(h, raw["conv3_w"], raw["conv3_b"], 1)
    h = h.reshape(h.shape[0], -1)
    h = jax.nn.relu(jnp.dot(h, raw["fc1_w"].T,
                            precision=jax.lax.Precision.HIGHEST) + raw["fc1_b"])
    y = jnp.dot(h, raw["fc2_w"].T,
                precision=jax.lax.Precision.HIGHEST) + raw["fc2_b"]
    return y[:, 0]


# ----------------------------------- main -------------------------------------

if __name__ == "__main__":
    key = jax.random.PRNGKey(0)
    k_params, k_x = jax.random.split(key)
    raw = init_raw_params(k_params)
    params = prepare_params(raw)

    # Input spatial/channel shape is fixed by the module (84x84x3 frames).
    x = jax.random.uniform(k_x, (2, 3, 84, 84), jnp.float32, 0.0, 255.0)

    fwd = jax.jit(cnn_value_forward)
    out = jax.block_until_ready(fwd(params, x))
    ref = jax.block_until_ready(reference_forward(raw, x))

    assert out.shape == (2,), out.shape
    # bf16 operands (f32 accumulation) vs f32 HIGHEST reference.
    assert jnp.allclose(out, ref, rtol=2e-2, atol=2e-2), (out, ref)
    print("KERNEL_OK")
</pallas_src>

<mosaic_0001>
module attributes {stable_mosaic.version = 11 : i64} {
  func.func @_matmul_bias_act_kernel(%arg0: i32, %arg1: i32, %arg2: memref<400x192xbf16, #tpu.memory_space<vmem>>, %arg3: memref<192x128xbf16, #tpu.memory_space<vmem>>, %arg4: memref<1x128xf32, #tpu.memory_space<vmem>>, %arg5: memref<400x128xbf16, #tpu.memory_space<vmem>>) attributes {dimension_semantics = [#tpu.dimension_semantics<parallel>, #tpu.dimension_semantics<parallel>], iteration_bounds = array<i64: 2, 1>, scalar_prefetch = 0 : i64, scratch_operands = 0 : i64, tpu.core_type = #tpu.core_type<tc>, window_params = [{transform_indices = @transform_0, window_bounds = array<i64: 400, 192>}, {transform_indices = @transform_1, window_bounds = array<i64: 192, 128>}, {transform_indices = @transform_2, window_bounds = array<i64: 1, 128>}, {transform_indices = @transform_3, window_bounds = array<i64: 400, 128>}]} {
    %c0 = arith.constant 0 : index
    %c0_0 = arith.constant 0 : index
    %0 = vector.load %arg2[%c0, %c0_0] : memref<400x192xbf16, #tpu.memory_space<vmem>>, vector<400x192xbf16>
    %c0_1 = arith.constant 0 : index
    %c0_2 = arith.constant 0 : index
    %1 = vector.load %arg3[%c0_1, %c0_2] : memref<192x128xbf16, #tpu.memory_space<vmem>>, vector<192x128xbf16>
    %cst = arith.constant dense<0.000000e+00> : vector<400x128xf32>
    %2 = tpu.matmul %0, %1, %cst {dimension_numbers = #tpu.dot_dimension_numbers<[1], [0], [0], [1], [0, 0, 1, 1], [], []>} : vector<400x192xbf16>, vector<192x128xbf16>, vector<400x128xf32> -> vector<400x128xf32>
    %c0_3 = arith.constant 0 : index
    %c0_4 = arith.constant 0 : index
    %3 = vector.load %arg4[%c0_3, %c0_4] : memref<1x128xf32, #tpu.memory_space<vmem>>, vector<1x128xf32>
    %4 = vector.broadcast %3 : vector<1x128xf32> to vector<400x128xf32>
    %5 = arith.addf %2, %4 : vector<400x128xf32>
    %cst_5 = arith.constant 0.000000e+00 : f32
    %6 = vector.broadcast %cst_5 : f32 to vector<400x128xf32>
    %7 = arith.maximumf %5, %6 : vector<400x128xf32>
    %8 = arith.truncf %7 : vector<400x128xf32> to vector<400x128xbf16>
    %c0_6 = arith.constant 0 : index
    %c0_7 = arith.constant 0 : index
    %9 = vector.load %arg5[%c0_6, %c0_7] : memref<400x128xbf16, #tpu.memory_space<vmem>>, vector<400x128xbf16>
    tpu.vector_store %arg5[%c0_6, %c0_7], %8 {strides = array<i32>} : memref<400x128xbf16, #tpu.memory_space<vmem>>, vector<400x128xbf16>,
    return
  }
  func.func @transform_0(%arg0: i32, %arg1: i32) -> (i32, i32) {
    %c0_i32 = arith.constant 0 : i32
    %c0_i32_0 = arith.constant 0 : i32
    return %arg0, %c0_i32 : i32, i32
  }
  func.func @transform_1(%arg0: i32, %arg1: i32) -> (i32, i32) {
    %c0_i32 = arith.constant 0 : i32
    %c0_i32_0 = arith.constant 0 : i32
    return %c0_i32, %arg1 : i32, i32
  }
  func.func @transform_2(%arg0: i32, %arg1: i32) -> (i32, i32) {
    %c0_i32 = arith.constant 0 : i32
    %c0_i32_0 = arith.constant 0 : i32
    return %c0_i32, %arg1 : i32, i32
  }
  func.func @transform_3(%arg0: i32, %arg1: i32) -> (i32, i32) {
    %c0_i32 = arith.constant 0 : i32
    return %arg0, %arg1 : i32, i32
  }
}

module attributes {stable_mosaic.version = 11 : i64} {
  func.func @_matmul_bias_act_kernel(%arg0: i32, %arg1: i32, %arg2: memref<88x512xbf16, #tpu.memory_space<vmem>>, %arg3: memref<512x128xbf16, #tpu.memory_space<vmem>>, %arg4: memref<1x128xf32, #tpu.memory_space<vmem>>, %arg5: memref<88x128xbf16, #tpu.memory_space<vmem>>) attributes {dimension_semantics = [#tpu.dimension_semantics<parallel>, #tpu.dimension_semantics<parallel>], iteration_bounds = array<i64: 2, 1>, scalar_prefetch = 0 : i64, scratch_operands = 0 : i64, tpu.core_type = #tpu.core_type<tc>, window_params = [{transform_indices = @transform_0, window_bounds = array<i64: 88, 512>}, {transform_indices = @transform_1, window_bounds = array<i64: 512, 128>}, {transform_indices = @transform_2, window_bounds = array<i64: 1, 128>}, {transform_indices = @transform_3, window_bounds = array<i64: 88, 128>}]} {
    %c0 = arith.constant 0 : index
    %c0_0 = arith.constant 0 : index
    %0 = vector.load %arg2[%c0, %c0_0] : memref<88x512xbf16, #tpu.memory_space<vmem>>, vector<88x512xbf16>
    %c0_1 = arith.constant 0 : index
    %c0_2 = arith.constant 0 : index
    %1 = vector.load %arg3[%c0_1, %c0_2] : memref<512x128xbf16, #tpu.memory_space<vmem>>, vector<512x128xbf16>
    %cst = arith.constant dense<0.000000e+00> : vector<88x128xf32>
    %2 = tpu.matmul %0, %1, %cst {dimension_numbers = #tpu.dot_dimension_numbers<[1], [0], [0], [1], [0, 0, 1, 1], [], []>} : vector<88x512xbf16>, vector<512x128xbf16>, vector<88x128xf32> -> vector<88x128xf32>
    %c0_3 = arith.constant 0 : index
    %c0_4 = arith.constant 0 : index
    %3 = vector.load %arg4[%c0_3, %c0_4] : memref<1x128xf32, #tpu.memory_space<vmem>>, vector<1x128xf32>
    %4 = vector.broadcast %3 : vector<1x128xf32> to vector<88x128xf32>
    %5 = arith.addf %2, %4 : vector<88x128xf32>
    %cst_5 = arith.constant 0.000000e+00 : f32
    %6 = vector.broadcast %cst_5 : f32 to vector<88x128xf32>
    %7 = arith.maximumf %5, %6 : vector<88x128xf32>
    %8 = arith.truncf %7 : vector<88x128xf32> to vector<88x128xbf16>
    %c0_6 = arith.constant 0 : index
    %c0_7 = arith.constant 0 : index
    %9 = vector.load %arg5[%c0_6, %c0_7] : memref<88x128xbf16, #tpu.memory_space<vmem>>, vector<88x128xbf16>
    tpu.vector_store %arg5[%c0_6, %c0_7], %8 {strides = array<i32>} : memref<88x128xbf16, #tpu.memory_space<vmem>>, vector<88x128xbf16>,
    return
  }
  func.func @transform_0(%arg0: i32, %arg1: i32) -> (i32, i32) {
    %c0_i32 = arith.constant 0 : i32
    %c0_i32_0 = arith.constant 0 : i32
    return %arg0, %c0_i32 : i32, i32
  }
  func.func @transform_1(%arg0: i32, %arg1: i32) -> (i32, i32) {
    %c0_i32 = arith.constant 0 : i32
    %c0_i32_0 = arith.constant 0 : i32
    return %c0_i32, %arg1 : i32, i32
  }
  func.func @transform_2(%arg0: i32, %arg1: i32) -> (i32, i32) {
    %c0_i32 = arith.constant 0 : i32
    %c0_i32_0 = arith.constant 0 : i32
    return %c0_i32, %arg1 : i32, i32
  }
  func.func @transform_3(%arg0: i32, %arg1: i32) -> (i32, i32) {
    %c0_i32 = arith.constant 0 : i32
    return %arg0, %arg1 : i32, i32
  }
}

module attributes {stable_mosaic.version = 11 : i64} {
  func.func @_matmul_bias_act_kernel(%arg0: i32, %arg1: i32, %arg2: memref<98x576xbf16, #tpu.memory_space<vmem>>, %arg3: memref<576x128xbf16, #tpu.memory_space<vmem>>, %arg4: memref<1x128xf32, #tpu.memory_space<vmem>>, %arg5: memref<98x128xbf16, #tpu.memory_space<vmem>>) attributes {dimension_semantics = [#tpu.dimension_semantics<parallel>, #tpu.dimension_semantics<parallel>], iteration_bounds = array<i64: 1, 1>, scalar_prefetch = 0 : i64, scratch_operands = 0 : i64, tpu.core_type = #tpu.core_type<tc>, window_params = [{transform_indices = @transform_0, window_bounds = array<i64: 98, 576>}, {transform_indices = @transform_1, window_bounds = array<i64: 576, 128>}, {transform_indices = @transform_2, window_bounds = array<i64: 1, 128>}, {transform_indices = @transform_3, window_bounds = array<i64: 98, 128>}]} {
    %c0 = arith.constant 0 : index
    %c0_0 = arith.constant 0 : index
    %0 = vector.load %arg2[%c0, %c0_0] : memref<98x576xbf16, #tpu.memory_space<vmem>>, vector<98x576xbf16>
    %c0_1 = arith.constant 0 : index
    %c0_2 = arith.constant 0 : index
    %1 = vector.load %arg3[%c0_1, %c0_2] : memref<576x128xbf16, #tpu.memory_space<vmem>>, vector<576x128xbf16>
    %cst = arith.constant dense<0.000000e+00> : vector<98x128xf32>
    %2 = tpu.matmul %0, %1, %cst {dimension_numbers = #tpu.dot_dimension_numbers<[1], [0], [0], [1], [0, 0, 1, 1], [], []>} : vector<98x576xbf16>, vector<576x128xbf16>, vector<98x128xf32> -> vector<98x128xf32>
    %c0_3 = arith.constant 0 : index
    %c0_4 = arith.constant 0 : index
    %3 = vector.load %arg4[%c0_3, %c0_4] : memref<1x128xf32, #tpu.memory_space<vmem>>, vector<1x128xf32>
    %4 = vector.broadcast %3 : vector<1x128xf32> to vector<98x128xf32>
    %5 = arith.addf %2, %4 : vector<98x128xf32>
    %cst_5 = arith.constant 0.000000e+00 : f32
    %6 = vector.broadcast %cst_5 : f32 to vector<98x128xf32>
    %7 = arith.maximumf %5, %6 : vector<98x128xf32>
    %8 = arith.truncf %7 : vector<98x128xf32> to vector<98x128xbf16>
    %c0_6 = arith.constant 0 : index
    %c0_7 = arith.constant 0 : index
    %9 = vector.load %arg5[%c0_6, %c0_7] : memref<98x128xbf16, #tpu.memory_space<vmem>>, vector<98x128xbf16>
    tpu.vector_store %arg5[%c0_6, %c0_7], %8 {strides = array<i32>} : memref<98x128xbf16, #tpu.memory_space<vmem>>, vector<98x128xbf16>,
    return
  }
  func.func @transform_0(%arg0: i32, %arg1: i32) -> (i32, i32) {
    %c0_i32 = arith.constant 0 : i32
    %c0_i32_0 = arith.constant 0 : i32
    return %arg0, %c0_i32 : i32, i32
  }
  func.func @transform_1(%arg0: i32, %arg1: i32) -> (i32, i32) {
    %c0_i32 = arith.constant 0 : i32
    %c0_i32_0 = arith.constant 0 : i32
    return %c0_i32, %arg1 : i32, i32
  }
  func.func @transform_2(%arg0: i32, %arg1: i32) -> (i32, i32) {
    %c0_i32 = arith.constant 0 : i32
    %c0_i32_0 = arith.constant 0 : i32
    return %c0_i32, %arg1 : i32, i32
  }
  func.func @transform_3(%arg0: i32, %arg1: i32) -> (i32, i32) {
    %c0_i32 = arith.constant 0 : i32
    return %arg0, %arg1 : i32, i32
  }
}

module attributes {stable_mosaic.version = 11 : i64} {
  func.func @_head_kernel(%arg0: i32, %arg1: memref<2x3136xbf16, #tpu.memory_space<vmem>>, %arg2: memref<3136x512xbf16, #tpu.memory_space<vmem>>, %arg3: memref<1x512xf32, #tpu.memory_space<vmem>>, %arg4: memref<512x128xbf16, #tpu.memory_space<vmem>>, %arg5: memref<1x128xf32, #tpu.memory_space<vmem>>, %arg6: memref<2x128xf32, #tpu.memory_space<vmem>>) attributes {dimension_semantics = [#tpu.dimension_semantics<parallel>], iteration_bounds = array<i64: 1>, scalar_prefetch = 0 : i64, scratch_operands = 0 : i64, tpu.core_type = #tpu.core_type<tc>, window_params = [{transform_indices = @transform_0, window_bounds = array<i64: 2, 3136>}, {pipeline_mode = #tpu.pipeline_mode<synchronous>, transform_indices = @transform_1, window_bounds = array<i64: 3136, 512>}, {pipeline_mode = #tpu.pipeline_mode<synchronous>, transform_indices = @transform_2, window_bounds = array<i64: 1, 512>}, {pipeline_mode = #tpu.pipeline_mode<synchronous>, transform_indices = @transform_3, window_bounds = array<i64: 512, 128>}, {pipeline_mode = #tpu.pipeline_mode<synchronous>, transform_indices = @transform_4, window_bounds = array<i64: 1, 128>}, {transform_indices = @transform_5, window_bounds = array<i64: 2, 128>}]} {
    %c0 = arith.constant 0 : index
    %c0_0 = arith.constant 0 : index
    %0 = vector.load %arg1[%c0, %c0_0] : memref<2x3136xbf16, #tpu.memory_space<vmem>>, vector<2x3136xbf16>
    %c0_1 = arith.constant 0 : index
    %c0_2 = arith.constant 0 : index
    %1 = vector.load %arg2[%c0_1, %c0_2] : memref<3136x512xbf16, #tpu.memory_space<vmem>>, vector<3136x512xbf16>
    %cst = arith.constant dense<0.000000e+00> : vector<2x512xf32>
    %2 = tpu.matmul %0, %1, %cst {dimension_numbers = #tpu.dot_dimension_numbers<[1], [0], [0], [1], [0, 0, 1, 1], [], []>} : vector<2x3136xbf16>, vector<3136x512xbf16>, vector<2x512xf32> -> vector<2x512xf32>
    %c0_3 = arith.constant 0 : index
    %c0_4 = arith.constant 0 : index
    %3 = vector.load %arg3[%c0_3, %c0_4] : memref<1x512xf32, #tpu.memory_space<vmem>>, vector<1x512xf32>
    %4 = vector.broadcast %3 : vector<1x512xf32> to vector<2x512xf32>
    %5 = arith.addf %2, %4 : vector<2x512xf32>
    %cst_5 = arith.constant 0.000000e+00 : f32
    %6 = vector.broadcast %cst_5 : f32 to vector<2x512xf32>
    %7 = arith.maximumf %5, %6 : vector<2x512xf32>
    %8 = arith.truncf %7 : vector<2x512xf32> to vector<2x512xbf16>
    %c0_6 = arith.constant 0 : index
    %c0_7 = arith.constant 0 : index
    %9 = vector.load %arg4[%c0_6, %c0_7] : memref<512x128xbf16, #tpu.memory_space<vmem>>, vector<512x128xbf16>
    %cst_8 = arith.constant dense<0.000000e+00> : vector<2x128xf32>
    %10 = tpu.matmul %8, %9, %cst_8 {dimension_numbers = #tpu.dot_dimension_numbers<[1], [0], [0], [1], [0, 0, 1, 1], [], []>} : vector<2x512xbf16>, vector<512x128xbf16>, vector<2x128xf32> -> vector<2x128xf32>
    %c0_9 = arith.constant 0 : index
    %c0_10 = arith.constant 0 : index
    %11 = vector.load %arg5[%c0_9, %c0_10] : memref<1x128xf32, #tpu.memory_space<vmem>>, vector<1x128xf32>
    %12 = vector.broadcast %11 : vector<1x128xf32> to vector<2x128xf32>
    %13 = arith.addf %10, %12 : vector<2x128xf32>
    %c0_11 = arith.constant 0 : index
    %c0_12 = arith.constant 0 : index
    %14 = vector.load %arg6[%c0_11, %c0_12] : memref<2x128xf32, #tpu.memory_space<vmem>>, vector<2x128xf32>
    tpu.vector_store %arg6[%c0_11, %c0_12], %13 {strides = array<i32>} : memref<2x128xf32, #tpu.memory_space<vmem>>, vector<2x128xf32>,
    return
  }
  func.func @transform_0(%arg0: i32) -> (i32, i32) {
    %c0_i32 = arith.constant 0 : i32
    %c0_i32_0 = arith.constant 0 : i32
    return %arg0, %c0_i32 : i32, i32
  }
  func.func @transform_1(%arg0: i32) -> (i32, i32) {
    %c0_i32 = arith.constant 0 : i32
    %c0_i32_0 = arith.constant 0 : i32
    %c0_i32_1 = arith.constant 0 : i32
    return %c0_i32, %c0_i32_0 : i32, i32
  }
  func.func @transform_2(%arg0: i32) -> (i32, i32) {
    %c0_i32 = arith.constant 0 : i32
    %c0_i32_0 = arith.constant 0 : i32
    %c0_i32_1 = arith.constant 0 : i32
    return %c0_i32, %c0_i32_0 : i32, i32
  }
  func.func @transform_3(%arg0: i32) -> (i32, i32) {
    %c0_i32 = arith.constant 0 : i32
    %c0_i32_0 = arith.constant 0 : i32
    %c0_i32_1 = arith.constant 0 : i32
    return %c0_i32, %c0_i32_0 : i32, i32
  }
  func.func @transform_4(%arg0: i32) -> (i32, i32) {
    %c0_i32 = arith.constant 0 : i32
    %c0_i32_0 = arith.constant 0 : i32
    %c0_i32_1 = arith.constant 0 : i32
    return %c0_i32, %c0_i32_0 : i32, i32
  }
  func.func @transform_5(%arg0: i32) -> (i32, i32) {
    %c0_i32 = arith.constant 0 : i32
    %c0_i32_0 = arith.constant 0 : i32
    return %arg0, %c0_i32 : i32, i32
  }
}

</mosaic_0001>

<bundles_post_ra>
// kernel: cnn_value_forward.4
= control target key start
LH: loop header
LB: loop body
LE: loop exit
PB: predicated region body
PF: predicated region fallthrough
CT: control target
= control target key end

     0   :  { %s1849_s12 = smov 0   ;;  %s1851_s13 = smov 0   ;;  %s2105_s0 = inlined_call_operand.vmem [shape: bf16[800,192], index: 0, kind: input, shape index: {}]   ;;  %s2106_s1 = inlined_call_operand.vmem [shape: bf16[192,128], index: 1, kind: input, shape index: {}]   ;;  %s2107_s2 = inlined_call_operand.vmem [shape: f32[1,128], index: 2, kind: input, shape index: {}]   ;;  %s2108_s3 = inlined_call_operand.vmem [shape: bf16[800,128], index: 3, kind: output, shape index: {}]  }
   0x1   :  { %s1853_s14 = smov 0  }
   0x2 LB: > { %s25_s15 = sadd.s32 1, %s1822_s13  ;;  %p1324_p0 = scmp.ge.s32.totalorder %s1826_s14, 1  ;;  %s1826_s14 = sphi %s1853_s14, %s13_s14   ;;  %s1822_s13 = sphi %s1851_s13, %s2110_s13   ;;  %s1818_s12 = sphi %s1849_s12, %s2109_s12  }
   0x3   : > { %p27_p1 = scmp.ge.s32.totalorder %s25_s15, 2  ;;  %p170_p2 = scmp.lt.s32.totalorder %s1826_s14, 3 }
   0x5   : > { %s2112_s15 = smov (%p27_p1, %s25_s15), 0  ;;  %p171_p3 = pnand %p1324_p0, %p170_p2 }
   0x6   : > { %v1717_v0 = vld [vmem:[%s2106_s1] sm:$0xff] (!%p171_p3)   ;;  %v1828_v1 = vmov (!%p171_p3), 0   ;;  %s205_s18 = smul.u32 (!%p171_p3), 50, %s1818_s12  ;;  %v1718_v2 = vld [vmem:[%s2106_s1 + $0x8] sm:$0xff] (!%p171_p3)   ;;  %v1719_v3 = vld [vmem:[%s2106_s1 + $0x10] sm:$0xff] (!%p171_p3)   ;;  %vm607_vm0 = vcmask (!%p171_p3), 523264  }
   0x7   : > { %174 = sbr.rel (%p171_p3) target bundleno = 372 (0x174), region = 32  ;;  %683 = vmatprep.subr.bf16.mxu0 (!%p171_p3), %v1828_v1  ;;  %1668 = vmatprep.subr.bf16.mxu1 (!%p171_p3), %v1828_v1  ;;  %v1720_v4 = vld [vmem:[%s2106_s1 + $0x18] sm:$0xff] (!%p171_p3)   ;;  %v1721_v6 = vld [vmem:[%s2106_s1 + $0x20] sm:$0xff] (!%p171_p3)   ;;  %v1722_v8 = vld [vmem:[%s2106_s1 + $0x28] sm:$0xff] (!%p171_p3)  }
   0x8   : > { %684 = vmatpush1.bf16.msra.mxu0 (!%p171_p3), %v1717_v0  ;;  %1680 = vmatpush1.bf16.msra.mxu1 (!%p171_p3), %v1717_v0  ;;  %p206_p4 = scmp.lt.s32.totalorder (!%p171_p3), %s205_s18, 99  ;;  %v1723_v9 = vld [vmem:[%s2106_s1 + $0x30] sm:$0xff] (!%p171_p3)   ;;  %v1724_v10 = vld [vmem:[%s2106_s1 + $0x38] sm:$0xff] (!%p171_p3)   ;;  %v1725_v11 = vld [vmem:[%s2106_s1 + $0x40] sm:$0xff] (!%p171_p3)  }
   0x9   : > { %685 = vmatprep.subr.bf16.mxu0 (!%p171_p3), %v1828_v1  ;;  %1669 = vmatprep.subr.bf16.mxu1 (!%p171_p3), %v1828_v1  ;;  %v1726_v12 = vld [vmem:[%s2106_s1 + $0x48] sm:$0xff] (!%p171_p3)   ;;  %v1727_v13 = vld [vmem:[%s2106_s1 + $0x50] sm:$0xff] (!%p171_p3)   ;;  %v1728_v14 = vld [vmem:[%s2106_s1 + $0x58] sm:$0xff] (!%p171_p3)  }
   0xa   : > { %v2013_v63 = vld [vmem:[%s2107_s2] ss:$0 sm:$0xff] (!%p171_p3) }
   0xc   : > { %686 = vmatpush1.bf16.msra.mxu0 (!%p171_p3), %v1718_v2  ;;  %1681 = vmatpush1.bf16.msra.mxu1 (!%p171_p3), %v1718_v2 }
   0xd   : > { %687 = vmatprep.subr.bf16.mxu0 (!%p171_p3), %v1828_v1  ;;  %1670 = vmatprep.subr.bf16.mxu1 (!%p171_p3), %v1828_v1 }
   0xe   : > { %s2114_s18 = smov (!%p206_p4, %s205_s18), 99 }
   0xf   : > { %s1468_s23 = sshll.u32 %s2114_s18, 3  ;;  %s1327_s24 = sshll.u32 %s2114_s18, 2 }
  0x10   : > { %688 = vmatpush1.bf16.msra.mxu0 %v1719_v3  ;;  %1682 = vmatpush1.bf16.msra.mxu1 %v1719_v3  ;;  %s1891_s28 = scalar_lea.vmem %s2105_s0, %s1468_s23  ;;  %s2023_s27 = scalar_lea.vmem %s2108_s3, %s1327_s24 }
  0x11   : > { %689 = vmatprep.subr.bf16.mxu0 %v1828_v1  ;;  %1671 = vmatprep.subr.bf16.mxu1 %v1828_v1  ;;  %v1731_v5 = vld [vmem:[%s1891_s28 + $0x4] ss:$8 sps:$4 sm:$0xff]   ;;  %v1734_v7 = vld [vmem:[%s1891_s28 + $0xd4] ss:$8 sps:$4 sm:$0xff]   ;;  %v1729_v15 = vld [vmem:[%s1891_s28] ss:$8 sps:$4 sm:$0xff]  }
  0x12   : > { %1391 = vmatprep.mubr.msk.bf16.mxu0 %vm607_vm0, %v1731_v5  ;;  %1404 = vmatprep.mubr.msk.bf16.mxu1 %vm607_vm0, %v1734_v7  ;;  %v1732_v16 = vld [vmem:[%s1891_s28 + $0xd0] ss:$8 sps:$4 sm:$0xff]   ;;  %v1735_v17 = vld [vmem:[%s1891_s28 + $0x14] ss:$8 sps:$4 sm:$0xff]   ;;  %v1738_v18 = vld [vmem:[%s1891_s28 + $0xe4] ss:$8 sps:$4 sm:$0xff]  }
  0x13   : > { %v1737_v19 = vld [vmem:[%s1891_s28 + $0x10] ss:$8 sps:$4 sm:$0xff]   ;;  %v1740_v20 = vld [vmem:[%s1891_s28 + $0xe0] ss:$8 sps:$4 sm:$0xff]   ;;  %v1741_v21 = vld [vmem:[%s1891_s28 + $0x24] ss:$8 sps:$4 sm:$0xff]  }
  0x14   : > { %690 = vmatpush1.bf16.msra.mxu0 %v1720_v4  ;;  %1683 = vmatpush1.bf16.msra.mxu1 %v1720_v4  ;;  %v1744_v22 = vld [vmem:[%s1891_s28 + $0xf4] ss:$8 sps:$4 sm:$0xff]   ;;  %v1743_v23 = vld [vmem:[%s1891_s28 + $0x20] ss:$8 sps:$4 sm:$0xff]   ;;  %v1746_v24 = vld [vmem:[%s1891_s28 + $0xf0] ss:$8 sps:$4 sm:$0xff]  }
  0x15   : > { %691 = vmatprep.subr.bf16.mxu0 %v1828_v1  ;;  %1672 = vmatprep.subr.bf16.mxu1 %v1828_v1  ;;  %v1747_v25 = vld [vmem:[%s1891_s28 + $0x34] ss:$8 sps:$4 sm:$0xff]   ;;  %v1750_v26 = vld [vmem:[%s1891_s28 + $0x104] ss:$8 sps:$4 sm:$0xff]   ;;  %v1749_v27 = vld [vmem:[%s1891_s28 + $0x30] ss:$8 sps:$4 sm:$0xff]  }
  0x16   : > { %v1752_v28 = vld [vmem:[%s1891_s28 + $0x100] ss:$8 sps:$4 sm:$0xff]   ;;  %v1753_v29 = vld [vmem:[%s1891_s28 + $0x44] ss:$8 sps:$4 sm:$0xff]   ;;  %v1756_v30 = vld [vmem:[%s1891_s28 + $0x114] ss:$8 sps:$4 sm:$0xff]  }
  0x17   : > { %v1755_v31 = vld [vmem:[%s1891_s28 + $0x40] ss:$8 sps:$4 sm:$0xff]   ;;  %v1758_v32 = vld [vmem:[%s1891_s28 + $0x110] ss:$8 sps:$4 sm:$0xff]   ;;  %v1759_v33 = vld [vmem:[%s1891_s28 + $0x54] ss:$8 sps:$4 sm:$0xff]  }
  0x18   : > { %692 = vmatpush1.bf16.msra.mxu0 %v1721_v6  ;;  %1684 = vmatpush1.bf16.msra.mxu1 %v1721_v6  ;;  %v1762_v34 = vld [vmem:[%s1891_s28 + $0x124] ss:$8 sps:$4 sm:$0xff]   ;;  %v1761_v35 = vld [vmem:[%s1891_s28 + $0x50] ss:$8 sps:$4 sm:$0xff]   ;;  %v1764_v36 = vld [vmem:[%s1891_s28 + $0x120] ss:$8 sps:$4 sm:$0xff]  }
  0x19   : > { %693 = vmatprep.subr.bf16.mxu0 %v1828_v1  ;;  %1673 = vmatprep.subr.bf16.mxu1 %v1828_v1  ;;  %v1765_v37 = vld [vmem:[%s1891_s28 + $0x64] ss:$8 sps:$4 sm:$0xff]   ;;  %v1768_v38 = vld [vmem:[%s1891_s28 + $0x134] ss:$8 sps:$4 sm:$0xff]   ;;  %v1767_v39 = vld [vmem:[%s1891_s28 + $0x60] ss:$8 sps:$4 sm:$0xff]  }
  0x1a   : > { %v1770_v40 = vld [vmem:[%s1891_s28 + $0x130] ss:$8 sps:$4 sm:$0xff]   ;;  %v1771_v41 = vld [vmem:[%s1891_s28 + $0x74] ss:$8 sps:$4 sm:$0xff]   ;;  %v1774_v42 = vld [vmem:[%s1891_s28 + $0x144] ss:$8 sps:$4 sm:$0xff]  }
  0x1b   : > { %v1773_v43 = vld [vmem:[%s1891_s28 + $0x70] ss:$8 sps:$4 sm:$0xff]   ;;  %v1776_v44 = vld [vmem:[%s1891_s28 + $0x140] ss:$8 sps:$4 sm:$0xff]   ;;  %v1777_v45 = vld [vmem:[%s1891_s28 + $0x84] ss:$8 sps:$4 sm:$0xff]  }
  0x1c   : > { %694 = vmatpush1.bf16.msra.mxu0 %v1722_v8  ;;  %1685 = vmatpush1.bf16.msra.mxu1 %v1722_v8  ;;  %v1780_v46 = vld [vmem:[%s1891_s28 + $0x154] ss:$8 sps:$4 sm:$0xff]   ;;  %v1779_v47 = vld [vmem:[%s1891_s28 + $0x80] ss:$8 sps:$4 sm:$0xff]   ;;  %v1782_v48 = vld [vmem:[%s1891_s28 + $0x150] ss:$8 sps:$4 sm:$0xff]  }
  0x1d   : > { %695 = vmatprep.subr.bf16.mxu0 %v1828_v1  ;;  %1674 = vmatprep.subr.bf16.mxu1 %v1828_v1  ;;  %v1783_v49 = vld [vmem:[%s1891_s28 + $0x94] ss:$8 sps:$4 sm:$0xff]   ;;  %v1786_v50 = vld [vmem:[%s1891_s28 + $0x164] ss:$8 sps:$4 sm:$0xff]   ;;  %v1785_v51 = vld [vmem:[%s1891_s28 + $0x90] ss:$8 sps:$4 sm:$0xff]  }
  0x1e   : > { %v1788_v52 = vld [vmem:[%s1891_s28 + $0x160] ss:$8 sps:$4 sm:$0xff]   ;;  %v1789_v53 = vld [vmem:[%s1891_s28 + $0xa4] ss:$8 sps:$4 sm:$0xff]   ;;  %v1792_v54 = vld [vmem:[%s1891_s28 + $0x174] ss:$8 sps:$4 sm:$0xff]  }
  0x1f   : > { %v1791_v55 = vld [vmem:[%s1891_s28 + $0xa0] ss:$8 sps:$4 sm:$0xff]   ;;  %v1794_v56 = vld [vmem:[%s1891_s28 + $0x170] ss:$8 sps:$4 sm:$0xff]   ;;  %v1795_v57 = vld [vmem:[%s1891_s28 + $0xb4] ss:$8 sps:$4 sm:$0xff]  }
  0x20   : > { %696 = vmatpush1.bf16.msra.mxu0 %v1723_v9  ;;  %1686 = vmatpush1.bf16.msra.mxu1 %v1723_v9  ;;  %v1798_v58 = vld [vmem:[%s1891_s28 + $0x184] ss:$8 sps:$4 sm:$0xff]   ;;  %v1797_v59 = vld [vmem:[%s1891_s28 + $0xb0] ss:$8 sps:$4 sm:$0xff]   ;;  %v1800_v60 = vld [vmem:[%s1891_s28 + $0x180] ss:$8 sps:$4 sm:$0xff]  }
  0x21   : > { %697 = vmatprep.subr.bf16.mxu0 %v1828_v1  ;;  %1675 = vmatprep.subr.bf16.mxu1 %v1828_v1  ;;  %v1801_v61 = vld [vmem:[%s1891_s28 + $0xc4] ss:$8 sps:$4 sm:$0xff]   ;;  %v1803_v62 = vld [vmem:[%s1891_s28 + $0xc0] ss:$8 sps:$4 sm:$0xff]  }
  0x24   : > { %698 = vmatpush1.bf16.msra.mxu0 %v1724_v10  ;;  %1687 = vmatpush1.bf16.msra.mxu1 %v1724_v10 }
  0x25   : > { %699 = vmatprep.subr.bf16.mxu0 %v1828_v1  ;;  %1676 = vmatprep.subr.bf16.mxu1 %v1828_v1 }
  0x28   : > { %700 = vmatpush1.bf16.msra.mxu0 %v1725_v11  ;;  %1688 = vmatpush1.bf16.msra.mxu1 %v1725_v11 }
  0x29   : > { %701 = vmatprep.subr.bf16.mxu0 %v1828_v1  ;;  %1677 = vmatprep.subr.bf16.mxu1 %v1828_v1 }
  0x2c   : > { %702 = vmatpush1.bf16.msra.mxu0 %v1726_v12  ;;  %1689 = vmatpush1.bf16.msra.mxu1 %v1726_v12 }
  0x2d   : > { %703 = vmatprep.subr.bf16.mxu0 %v1828_v1  ;;  %1678 = vmatprep.subr.bf16.mxu1 %v1828_v1 }
  0x30   : > { %704 = vmatpush1.bf16.msra.mxu0 %v1727_v13  ;;  %1690 = vmatpush1.bf16.msra.mxu1 %v1727_v13 }
  0x31   : > { %705 = vmatprep.subr.bf16.mxu0 %v1828_v1  ;;  %1679 = vmatprep.subr.bf16.mxu1 %v1828_v1 }
  0x34   : > { %706 = vmatpush1.bf16.msra.mxu0 %v1728_v14  ;;  %1691 = vmatpush1.bf16.msra.mxu1 %v1728_v14 }
  0x37   : > { %716 = vmatmul.mubr.bf16.vlgmr.msra.gmra.mrb[0].mxu0 %v1729_v15  ;;  %820 = vmatmul.mubr.bf16.vlgmr.msra.gmra.mrb[0].mxu1 %v1732_v16 }
  0x38   : > { %1392 = vmatprep.mubr.msk.bf16.mxu0 %vm607_vm0, %v1735_v17  ;;  %1405 = vmatprep.mubr.msk.bf16.mxu1 %vm607_vm0, %v1738_v18 }
  0x3f   : > { %724 = vmatmul.mubr.bf16.gmra.mrb[4].mxu0 %v1737_v19  ;;  %828 = vmatmul.mubr.bf16.gmra.mrb[4].mxu1 %v1740_v20 }
  0x40   : > { %1393 = vmatprep.mubr.msk.bf16.mxu0 %vm607_vm0, %v1741_v21  ;;  %1406 = vmatprep.mubr.msk.bf16.mxu1 %vm607_vm0, %v1744_v22 }
  0x47   : > { %732 = vmatmul.mubr.bf16.gmra.mrb[8].mxu0 %v1743_v23  ;;  %836 = vmatmul.mubr.bf16.gmra.mrb[8].mxu1 %v1746_v24 }
  0x48   : > { %1394 = vmatprep.mubr.msk.bf16.mxu0 %vm607_vm0, %v1747_v25  ;;  %1407 = vmatprep.mubr.msk.bf16.mxu1 %vm607_vm0, %v1750_v26 }
  0x4f   : > { %740 = vmatmul.mubr.bf16.gmra.mrb[12].mxu0 %v1749_v27  ;;  %844 = vmatmul.mubr.bf16.gmra.mrb[12].mxu1 %v1752_v28 }
  0x50   : > { %1395 = vmatprep.mubr.msk.bf16.mxu0 %vm607_vm0, %v1753_v29  ;;  %1408 = vmatprep.mubr.msk.bf16.mxu1 %vm607_vm0, %v1756_v30 }
  0x57   : > { %748 = vmatmul.mubr.bf16.gmra.mrb[16].mxu0 %v1755_v31  ;;  %852 = vmatmul.mubr.bf16.gmra.mrb[16].mxu1 %v1758_v32 }
  0x58   : > { %1396 = vmatprep.mubr.msk.bf16.mxu0 %vm607_vm0, %v1759_v33  ;;  %1409 = vmatprep.mubr.msk.bf16.mxu1 %vm607_vm0, %v1762_v34 }
  0x5f   : > { %756 = vmatmul.mubr.bf16.gmra.mrb[20].mxu0 %v1761_v35  ;;  %860 = vmatmul.mubr.bf16.gmra.mrb[20].mxu1 %v1764_v36 }
  0x60   : > { %1397 = vmatprep.mubr.msk.bf16.mxu0 %vm607_vm0, %v1765_v37  ;;  %1410 = vmatprep.mubr.msk.bf16.mxu1 %vm607_vm0, %v1768_v38 }
  0x67   : > { %764 = vmatmul.mubr.bf16.gmra.mrb[24].mxu0 %v1767_v39  ;;  %868 = vmatmul.mubr.bf16.gmra.mrb[24].mxu1 %v1770_v40 }
  0x68   : > { %1398 = vmatprep.mubr.msk.bf16.mxu0 %vm607_vm0, %v1771_v41  ;;  %1411 = vmatprep.mubr.msk.bf16.mxu1 %vm607_vm0, %v1774_v42 }
  0x6f   : > { %772 = vmatmul.mubr.bf16.gmra.mrb[28].mxu0 %v1773_v43  ;;  %876 = vmatmul.mubr.bf16.gmra.mrb[28].mxu1 %v1776_v44 }
  0x70   : > { %1399 = vmatprep.mubr.msk.bf16.mxu0 %vm607_vm0, %v1777_v45  ;;  %1412 = vmatprep.mubr.msk.bf16.mxu1 %vm607_vm0, %v1780_v46 }
  0x77   : > { %780 = vmatmul.mubr.bf16.gmra.mrb[32].mxu0 %v1779_v47  ;;  %884 = vmatmul.mubr.bf16.gmra.mrb[32].mxu1 %v1782_v48 }
  0x78   : > { %1400 = vmatprep.mubr.msk.bf16.mxu0 %vm607_vm0, %v1783_v49  ;;  %1413 = vmatprep.mubr.msk.bf16.mxu1 %vm607_vm0, %v1786_v50 }
  0x7f   : > { %788 = vmatmul.mubr.bf16.gmra.mrb[36].mxu0 %v1785_v51  ;;  %892 = vmatmul.mubr.bf16.gmra.mrb[36].mxu1 %v1788_v52 }
  0x80   : > { %1401 = vmatprep.mubr.msk.bf16.mxu0 %vm607_vm0, %v1789_v53  ;;  %1414 = vmatprep.mubr.msk.bf16.mxu1 %vm607_vm0, %v1792_v54 }
  0x87   : > { %796 = vmatmul.mubr.bf16.gmra.mrb[40].mxu0 %v1791_v55  ;;  %900 = vmatmul.mubr.bf16.gmra.mrb[40].mxu1 %v1794_v56 }
  0x88   : > { %1402 = vmatprep.mubr.msk.bf16.mxu0 %vm607_vm0, %v1795_v57  ;;  %1415 = vmatprep.mubr.msk.bf16.mxu1 %vm607_vm0, %v1798_v58 }
  0x8f   : > { %804 = vmatmul.mubr.bf16.gmra.mrb[44].mxu0 %v1797_v59  ;;  %908 = vmatmul.mubr.bf16.gmra.mrb[44].mxu1 %v1800_v60 }
  0x90   : > { %1403 = vmatprep.mubr.msk.bf16.mxu0 %vm607_vm0, %v1801_v61 }
  0x97   : > { %812 = vmatmul.mubr.bf16.gmra.mrb[48].mxu0 %v1803_v62 }
 0x10a   : > { %v717_v0 = vpop.f32.mrb[0].mxu0  ;;  %v821_v1 = vpop.f32.mrb[0].mxu1 }
 0x10b   : > { %v718_v2 = vadd.f32 %v2013_v63, %v717_v0  ;;  %v719_v3 = vpop.f32.mrb[1].mxu0  ;;  %v822_v4 = vadd.f32 %v2013_v63, %v821_v1  ;;  %v823_v5 = vpop.f32.mrb[1].mxu1 }
 0x10c   : > { %v720_v6 = vpop.f32.mrb[2].mxu0  ;;  %v824_v7 = vpop.f32.mrb[2].mxu1 }
 0x10d   : > { %v721_v8 = vadd.f32 %v2013_v63, %v720_v6  ;;  %v722_v9 = vpop.f32.mrb[3].mxu0  ;;  %v942_v10 = vmax.f32 %v822_v4, 0.0  ;;  %v825_v11 = vadd.f32 %v2013_v63, %v824_v7  ;;  %v826_v12 = vpop.f32.mrb[3].mxu1  ;;  %v916_v13 = vmax.f32 %v718_v2, 0.0 }
 0x10f   : > { %v917_v14 = vmax.f32 %v721_v8, 0.0  ;;  %v943_v15 = vmax.f32 %v825_v11, 0.0 }
 0x111   : > { %v1522_v16 = vpack.c.bf16 %v917_v14, %v916_v13  ;;  %v1587_v17 = vpack.c.bf16 %v943_v15, %v942_v10 }
 0x112   : > { %v725_v18 = vpop.f32.mrb[4].mxu0  ;;  %v829_v19 = vpop.f32.mrb[4].mxu1 }
 0x113   : > { %1523 = vst [vmem:[%s2023_s27] sm:$0xff] %v1522_v16   ;;  %1656 = vst [vmem:[%s2023_s27 + $0x68] sm:$0xff] %v1587_v17   ;;  %v726_v20 = vadd.f32 %v2013_v63, %v725_v18  ;;  %v727_v21 = vpop.f32.mrb[5].mxu0  ;;  %v830_v22 = vadd.f32 %v2013_v63, %v829_v19  ;;  %v831_v23 = vpop.f32.mrb[5].mxu1 }
 0x114   : > { %v728_v24 = vpop.f32.mrb[6].mxu0  ;;  %v832_v25 = vpop.f32.mrb[6].mxu1 }
 0x115   : > { %v729_v26 = vadd.f32 %v2013_v63, %v728_v24  ;;  %v730_v27 = vpop.f32.mrb[7].mxu0  ;;  %v944_v28 = vmax.f32 %v830_v22, 0.0  ;;  %v833_v29 = vadd.f32 %v2013_v63, %v832_v25  ;;  %v834_v30 = vpop.f32.mrb[7].mxu1  ;;  %v918_v31 = vmax.f32 %v726_v20, 0.0 }
 0x117   : > { %v919_v32 = vmax.f32 %v729_v26, 0.0  ;;  %v945_v33 = vmax.f32 %v833_v29, 0.0 }
 0x119   : > { %v1527_v34 = vpack.c.bf16 %v919_v32, %v918_v31  ;;  %v1592_v35 = vpack.c.bf16 %v945_v33, %v944_v28 }
 0x11a   : > { %v733_v36 = vpop.f32.mrb[8].mxu0  ;;  %v837_v37 = vpop.f32.mrb[8].mxu1 }
 0x11b   : > { %1644 = vst [vmem:[%s2023_s27 + $0x8] sm:$0xff] %v1527_v34   ;;  %1657 = vst [vmem:[%s2023_s27 + $0x70] sm:$0xff] %v1592_v35   ;;  %v734_v38 = vadd.f32 %v2013_v63, %v733_v36  ;;  %v735_v39 = vpop.f32.mrb[9].mxu0  ;;  %v838_v40 = vadd.f32 %v2013_v63, %v837_v37  ;;  %v839_v41 = vpop.f32.mrb[9].mxu1 }
 0x11c   : > { %v736_v42 = vpop.f32.mrb[10].mxu0  ;;  %v840_v43 = vpop.f32.mrb[10].mxu1 }
 0x11d   : > { %v737_v44 = vadd.f32 %v2013_v63, %v736_v42  ;;  %v738_v45 = vpop.f32.mrb[11].mxu0  ;;  %v946_v46 = vmax.f32 %v838_v40, 0.0  ;;  %v841_v47 = vadd.f32 %v2013_v63, %v840_v43  ;;  %v842_v48 = vpop.f32.mrb[11].mxu1  ;;  %v920_v49 = vmax.f32 %v734_v38, 0.0 }
 0x11f   : > { %v921_v50 = vmax.f32 %v737_v44, 0.0  ;;  %v947_v51 = vmax.f32 %v841_v47, 0.0 }
 0x121   : > { %v1532_v52 = vpack.c.bf16 %v921_v50, %v920_v49  ;;  %v1597_v53 = vpack.c.bf16 %v947_v51, %v946_v46 }
 0x122   : > { %v741_v54 = vpop.f32.mrb[12].mxu0  ;;  %v845_v55 = vpop.f32.mrb[12].mxu1 }
 0x123   : > { %1645 = vst [vmem:[%s2023_s27 + $0x10] sm:$0xff] %v1532_v52   ;;  %1658 = vst [vmem:[%s2023_s27 + $0x78] sm:$0xff] %v1597_v53   ;;  %v742_v56 = vadd.f32 %v2013_v63, %v741_v54  ;;  %v743_v57 = vpop.f32.mrb[13].mxu0  ;;  %v846_v58 = vadd.f32 %v2013_v63, %v845_v55  ;;  %v847_v59 = vpop.f32.mrb[13].mxu1 }
 0x124   : > { %v744_v60 = vpop.f32.mrb[14].mxu0  ;;  %v848_v61 = vpop.f32.mrb[14].mxu1 }
 0x125   : > { %v745_v62 = vadd.f32 %v2013_v63, %v744_v60  ;;  %v746_v0 = vpop.f32.mrb[15].mxu0  ;;  %v948_v1 = vmax.f32 %v846_v58, 0.0  ;;  %v849_v2 = vadd.f32 %v2013_v63, %v848_v61  ;;  %v850_v3 = vpop.f32.mrb[15].mxu1  ;;  %v922_v4 = vmax.f32 %v742_v56, 0.0 }
 0x127   : > { %v923_v5 = vmax.f32 %v745_v62, 0.0  ;;  %v949_v6 = vmax.f32 %v849_v2, 0.0 }
 0x129   : > { %v1537_v7 = vpack.c.bf16 %v923_v5, %v922_v4  ;;  %v1602_v8 = vpack.c.bf16 %v949_v6, %v948_v1 }
 0x12a   : > { %v749_v9 = vpop.f32.mrb[16].mxu0  ;;  %v853_v10 = vpop.f32.mrb[16].mxu1 }
 0x12b   : > { %1646 = vst [vmem:[%s2023_s27 + $0x18] sm:$0xff] %v1537_v7   ;;  %1659 = vst [vmem:[%s2023_s27 + $0x80] sm:$0xff] %v1602_v8   ;;  %v750_v11 = vadd.f32 %v2013_v63, %v749_v9  ;;  %v751_v12 = vpop.f32.mrb[17].mxu0  ;;  %v854_v13 = vadd.f32 %v2013_v63, %v853_v10  ;;  %v855_v14 = vpop.f32.mrb[17].mxu1 }
 0x12c   : > { %v752_v15 = vpop.f32.mrb[18].mxu0  ;;  %v856_v16 = vpop.f32.mrb[18].mxu1 }
 0x12d   : > { %v753_v17 = vadd.f32 %v2013_v63, %v752_v15  ;;  %v754_v18 = vpop.f32.mrb[19].mxu0  ;;  %v950_v19 = vmax.f32 %v854_v13, 0.0  ;;  %v857_v20 = vadd.f32 %v2013_v63, %v856_v16  ;;  %v858_v21 = vpop.f32.mrb[19].mxu1  ;;  %v924_v22 = vmax.f32 %v750_v11, 0.0 }
 0x12f   : > { %v925_v23 = vmax.f32 %v753_v17, 0.0  ;;  %v951_v24 = vmax.f32 %v857_v20, 0.0 }
 0x131   : > { %v1542_v25 = vpack.c.bf16 %v925_v23, %v924_v22  ;;  %v1607_v26 = vpack.c.bf16 %v951_v24, %v950_v19 }
 0x132   : > { %v757_v27 = vpop.f32.mrb[20].mxu0  ;;  %v861_v28 = vpop.f32.mrb[20].mxu1 }
 0x133   : > { %1647 = vst [vmem:[%s2023_s27 + $0x20] sm:$0xff] %v1542_v25   ;;  %1660 = vst [vmem:[%s2023_s27 + $0x88] sm:$0xff] %v1607_v26   ;;  %v758_v29 = vadd.f32 %v2013_v63, %v757_v27  ;;  %v759_v30 = vpop.f32.mrb[21].mxu0  ;;  %v862_v31 = vadd.f32 %v2013_v63, %v861_v28  ;;  %v863_v32 = vpop.f32.mrb[21].mxu1 }
 0x134   : > { %v760_v33 = vpop.f32.mrb[22].mxu0  ;;  %v864_v34 = vpop.f32.mrb[22].mxu1 }
 0x135   : > { %v761_v35 = vadd.f32 %v2013_v63, %v760_v33  ;;  %v762_v36 = vpop.f32.mrb[23].mxu0  ;;  %v952_v37 = vmax.f32 %v862_v31, 0.0  ;;  %v865_v38 = vadd.f32 %v2013_v63, %v864_v34  ;;  %v866_v39 = vpop.f32.mrb[23].mxu1  ;;  %v926_v40 = vmax.f32 %v758_v29, 0.0 }
 0x137   : > { %v927_v41 = vmax.f32 %v761_v35, 0.0  ;;  %v953_v42 = vmax.f32 %v865_v38, 0.0 }
 0x139   : > { %v1547_v43 = vpack.c.bf16 %v927_v41, %v926_v40  ;;  %v1612_v44 = vpack.c.bf16 %v953_v42, %v952_v37 }
 0x13a   : > { %v765_v45 = vpop.f32.mrb[24].mxu0  ;;  %v869_v46 = vpop.f32.mrb[24].mxu1 }
 0x13b   : > { %1648 = vst [vmem:[%s2023_s27 + $0x28] sm:$0xff] %v1547_v43   ;;  %1661 = vst [vmem:[%s2023_s27 + $0x90] sm:$0xff] %v1612_v44   ;;  %v766_v47 = vadd.f32 %v2013_v63, %v765_v45  ;;  %v767_v48 = vpop.f32.mrb[25].mxu0  ;;  %v870_v49 = vadd.f32 %v2013_v63, %v869_v46  ;;  %v871_v50 = vpop.f32.mrb[25].mxu1 }
 0x13c   : > { %v768_v51 = vpop.f32.mrb[26].mxu0  ;;  %v872_v52 = vpop.f32.mrb[26].mxu1 }
 0x13d   : > { %v769_v53 = vadd.f32 %v2013_v63, %v768_v51  ;;  %v770_v54 = vpop.f32.mrb[27].mxu0  ;;  %v954_v55 = vmax.f32 %v870_v49, 0.0  ;;  %v873_v56 = vadd.f32 %v2013_v63, %v872_v52  ;;  %v874_v57 = vpop.f32.mrb[27].mxu1  ;;  %v928_v58 = vmax.f32 %v766_v47, 0.0 }
 0x13f   : > { %v929_v59 = vmax.f32 %v769_v53, 0.0  ;;  %v955_v60 = vmax.f32 %v873_v56, 0.0 }
 0x141   : > { %v1552_v61 = vpack.c.bf16 %v929_v59, %v928_v58  ;;  %v1617_v62 = vpack.c.bf16 %v955_v60, %v954_v55 }
 0x142   : > { %v773_v0 = vpop.f32.mrb[28].mxu0  ;;  %v877_v1 = vpop.f32.mrb[28].mxu1 }
 0x143   : > { %1649 = vst [vmem:[%s2023_s27 + $0x30] sm:$0xff] %v1552_v61   ;;  %1662 = vst [vmem:[%s2023_s27 + $0x98] sm:$0xff] %v1617_v62   ;;  %v774_v2 = vadd.f32 %v2013_v63, %v773_v0  ;;  %v775_v3 = vpop.f32.mrb[29].mxu0  ;;  %v878_v4 = vadd.f32 %v2013_v63, %v877_v1  ;;  %v879_v5 = vpop.f32.mrb[29].mxu1 }
 0x144   : > { %v776_v6 = vpop.f32.mrb[30].mxu0  ;;  %v880_v7 = vpop.f32.mrb[30].mxu1 }
 0x145   : > { %v777_v8 = vadd.f32 %v2013_v63, %v776_v6  ;;  %v778_v9 = vpop.f32.mrb[31].mxu0  ;;  %v956_v10 = vmax.f32 %v878_v4, 0.0  ;;  %v881_v11 = vadd.f32 %v2013_v63, %v880_v7  ;;  %v882_v12 = vpop.f32.mrb[31].mxu1  ;;  %v930_v13 = vmax.f32 %v774_v2, 0.0 }
 0x147   : > { %v931_v14 = vmax.f32 %v777_v8, 0.0  ;;  %v957_v15 = vmax.f32 %v881_v11, 0.0 }
 0x149   : > { %v1557_v16 = vpack.c.bf16 %v931_v14, %v930_v13  ;;  %v1622_v17 = vpack.c.bf16 %v957_v15, %v956_v10 }
 0x14a   : > { %v781_v18 = vpop.f32.mrb[32].mxu0  ;;  %v885_v19 = vpop.f32.mrb[32].mxu1 }
 0x14b   : > { %1650 = vst [vmem:[%s2023_s27 + $0x38] sm:$0xff] %v1557_v16   ;;  %1663 = vst [vmem:[%s2023_s27 + $0xa0] sm:$0xff] %v1622_v17   ;;  %v782_v20 = vadd.f32 %v2013_v63, %v781_v18  ;;  %v783_v21 = vpop.f32.mrb[33].mxu0  ;;  %v886_v22 = vadd.f32 %v2013_v63, %v885_v19  ;;  %v887_v23 = vpop.f32.mrb[33].mxu1 }
 0x14c   : > { %v784_v24 = vpop.f32.mrb[34].mxu0  ;;  %v888_v25 = vpop.f32.mrb[34].mxu1 }
 0x14d   : > { %v785_v26 = vadd.f32 %v2013_v63, %v784_v24  ;;  %v786_v27 = vpop.f32.mrb[35].mxu0  ;;  %v958_v28 = vmax.f32 %v886_v22, 0.0  ;;  %v889_v29 = vadd.f32 %v2013_v63, %v888_v25  ;;  %v890_v30 = vpop.f32.mrb[35].mxu1  ;;  %v932_v31 = vmax.f32 %v782_v20, 0.0 }
 0x14f   : > { %v933_v32 = vmax.f32 %v785_v26, 0.0  ;;  %v959_v33 = vmax.f32 %v889_v29, 0.0 }
 0x151   : > { %v1562_v34 = vpack.c.bf16 %v933_v32, %v932_v31  ;;  %v1627_v35 = vpack.c.bf16 %v959_v33, %v958_v28 }
 0x152   : > { %v789_v36 = vpop.f32.mrb[36].mxu0  ;;  %v893_v37 = vpop.f32.mrb[36].mxu1 }
 0x153   : > { %1651 = vst [vmem:[%s2023_s27 + $0x40] sm:$0xff] %v1562_v34   ;;  %1664 = vst [vmem:[%s2023_s27 + $0xa8] sm:$0xff] %v1627_v35   ;;  %v790_v38 = vadd.f32 %v2013_v63, %v789_v36  ;;  %v791_v39 = vpop.f32.mrb[37].mxu0  ;;  %v894_v40 = vadd.f32 %v2013_v63, %v893_v37  ;;  %v895_v41 = vpop.f32.mrb[37].mxu1 }
 0x154   : > { %v792_v42 = vpop.f32.mrb[38].mxu0  ;;  %v896_v43 = vpop.f32.mrb[38].mxu1 }
 0x155   : > { %v793_v44 = vadd.f32 %v2013_v63, %v792_v42  ;;  %v794_v45 = vpop.f32.mrb[39].mxu0  ;;  %v960_v46 = vmax.f32 %v894_v40, 0.0  ;;  %v897_v47 = vadd.f32 %v2013_v63, %v896_v43  ;;  %v898_v48 = vpop.f32.mrb[39].mxu1  ;;  %v934_v49 = vmax.f32 %v790_v38, 0.0 }
 0x157   : > { %v935_v50 = vmax.f32 %v793_v44, 0.0  ;;  %v961_v51 = vmax.f32 %v897_v47, 0.0 }
 0x159   : > { %v1567_v52 = vpack.c.bf16 %v935_v50, %v934_v49  ;;  %v1632_v53 = vpack.c.bf16 %v961_v51, %v960_v46 }
 0x15a   : > { %v797_v54 = vpop.f32.mrb[40].mxu0  ;;  %v901_v55 = vpop.f32.mrb[40].mxu1 }
 0x15b   : > { %1652 = vst [vmem:[%s2023_s27 + $0x48] sm:$0xff] %v1567_v52   ;;  %1665 = vst [vmem:[%s2023_s27 + $0xb0] sm:$0xff] %v1632_v53   ;;  %v798_v56 = vadd.f32 %v2013_v63, %v797_v54  ;;  %v799_v57 = vpop.f32.mrb[41].mxu0  ;;  %v902_v58 = vadd.f32 %v2013_v63, %v901_v55  ;;  %v903_v59 = vpop.f32.mrb[41].mxu1 }
 0x15c   : > { %v800_v60 = vpop.f32.mrb[42].mxu0  ;;  %v904_v61 = vpop.f32.mrb[42].mxu1 }
 0x15d   : > { %v801_v62 = vadd.f32 %v2013_v63, %v800_v60  ;;  %v802_v0 = vpop.f32.mrb[43].mxu0  ;;  %v962_v1 = vmax.f32 %v902_v58, 0.0  ;;  %v905_v2 = vadd.f32 %v2013_v63, %v904_v61  ;;  %v906_v3 = vpop.f32.mrb[43].mxu1  ;;  %v936_v4 = vmax.f32 %v798_v56, 0.0 }
 0x15f   : > { %v937_v5 = vmax.f32 %v801_v62, 0.0  ;;  %v963_v6 = vmax.f32 %v905_v2, 0.0 }
 0x161   : > { %v1572_v7 = vpack.c.bf16 %v937_v5, %v936_v4  ;;  %v1637_v8 = vpack.c.bf16 %v963_v6, %v962_v1 }
 0x162   : > { %v805_v9 = vpop.f32.mrb[44].mxu0  ;;  %v909_v10 = vpop.f32.mrb[44].mxu1 }
 0x163   : > { %1653 = vst [vmem:[%s2023_s27 + $0x50] sm:$0xff] %v1572_v7   ;;  %1666 = vst [vmem:[%s2023_s27 + $0xb8] sm:$0xff] %v1637_v8   ;;  %v806_v11 = vadd.f32 %v2013_v63, %v805_v9  ;;  %v807_v12 = vpop.f32.mrb[45].mxu0  ;;  %v910_v13 = vadd.f32 %v2013_v63, %v909_v10  ;;  %v911_v14 = vpop.f32.mrb[45].mxu1 }
 0x164   : > { %v808_v15 = vpop.f32.mrb[46].mxu0  ;;  %v912_v16 = vpop.f32.mrb[46].mxu1 }
 0x165   : > { %v809_v17 = vadd.f32 %v2013_v63, %v808_v15  ;;  %v810_v18 = vpop.f32.mrb[47].mxu0  ;;  %v964_v19 = vmax.f32 %v910_v13, 0.0  ;;  %v913_v20 = vadd.f32 %v2013_v63, %v912_v16  ;;  %v914_v21 = vpop.f32.mrb[47].mxu1  ;;  %v938_v22 = vmax.f32 %v806_v11, 0.0 }
 0x167   : > { %v939_v23 = vmax.f32 %v809_v17, 0.0  ;;  %v965_v24 = vmax.f32 %v913_v20, 0.0 }
 0x169   : > { %v1577_v25 = vpack.c.bf16 %v939_v23, %v938_v22  ;;  %v1642_v26 = vpack.c.bf16 %v965_v24, %v964_v19 }
 0x16a   : > { %v813_v27 = vpop.f32.mrb[48].mxu0 }
 0x16b   : > { %1654 = vst [vmem:[%s2023_s27 + $0x58] sm:$0xff] %v1577_v25   ;;  %1667 = vst [vmem:[%s2023_s27 + $0xc0] sm:$0xff] %v1642_v26   ;;  %v814_v28 = vadd.f32 %v2013_v63, %v813_v27  ;;  %v815_v29 = vpop.f32.mrb[49].mxu0 }
 0x16c   : > { %v816_v30 = vpop.f32.mrb[50].mxu0 }
 0x16d   : > { %v817_v31 = vadd.f32 %v2013_v63, %v816_v30  ;;  %v818_v32 = vpop.f32.mrb[51].mxu0  ;;  %v940_v33 = vmax.f32 %v814_v28, 0.0 }
 0x16f   : > { %v941_v34 = vmax.f32 %v817_v31, 0.0 }
 0x171   : > { %v1582_v35 = vpack.c.bf16 %v941_v34, %v940_v33 }
 0x173   : > { %1655 = vst [vmem:[%s2023_s27 + $0x60] sm:$0xff] %v1582_v35  }
 0x174 PF: > { %s13_s14 = sadd.s32 1, %s1826_s14   ;;  %s2109_s12 = smov %s1822_s13 }
 0x175   : > { %p10_p5 = scmp.ge.s32.totalorder %s13_s14, 4   ;;  %s2110_s13 = smov %s2112_s15 }
 0x177   :  { %12 = sbr.rel (!%p10_p5) target bundleno = 2 (0x2), region = 68 }

// kernel: cnn_value_forward.5
= control target key start
LH: loop header
LB: loop body
LE: loop exit
PB: predicated region body
PF: predicated region fallthrough
CT: control target
= control target key end

     0   :  { %s1701_s12 = smov 0   ;;  %s1703_s13 = smov 0   ;;  %s1961_s0 = inlined_call_operand.vmem [shape: bf16[162,512], index: 0, kind: input, shape index: {}]   ;;  %s1962_s1 = inlined_call_operand.vmem [shape: bf16[512,128], index: 1, kind: input, shape index: {}]   ;;  %s1963_s2 = inlined_call_operand.vmem [shape: f32[1,128], index: 2, kind: input, shape index: {}]   ;;  %s1964_s3 = inlined_call_operand.vmem [shape: bf16[162,128], index: 3, kind: output, shape index: {}]  }
   0x1   :  { %s1705_s14 = smov 0   ;;  %s1707_s15 = smov 0  }
   0x2   :  { %s1709_s16 = smov 0  }
   0x3 LB: > { %s1166_s17 = sadd.s32 4294967295, %s1647_s16   ;;  %s25_s18 = sadd.s32 1, %s1643_s15  ;;  %s1647_s16 = sphi %s1709_s16, %s13_s16   ;;  %s1643_s15 = sphi %s1707_s15, %s1972_s15   ;;  %s1639_s14 = sphi %s1705_s14, %s1971_s14   ;;  %s1635_s13 = sphi %s1703_s13, %s1970_s13   ;;  %s1631_s12 = sphi %s1701_s12, %s1969_s12  }
   0x4   : > { %p27_p0 = scmp.ge.s32.totalorder %s25_s18, 2  ;;  %s112_s19 = sadd.s32 1, %s1635_s13 }
   0x5   : > { %p122_p1 = scmp.ne.s32.totalorder %s1635_s13, %s1631_s12  ;;  %p123_p2 = scmp.eq.s32.totalorder %s1166_s17, 1 }
   0x6   : > { %s1974_s18 = smov (%p27_p0, %s25_s18), 0  ;;  %p1172_p4 = scmp.ge.s32.totalorder %s1647_s16, 1 }
   0x7   : > { %p1733_p3 = por %p123_p2, %p122_p1  ;;  %s107_s21 = ssub.s32 %s1643_s15, %s1974_s18 }
   0x8   : > { %p180_p5 = scmp.lt.s32.totalorder %s1647_s16, 3  ;;  %p110_p6 = scmp.eq.s32.totalorder %s107_s21, 0 }
   0xa   : > { %p181_p7 = pnand %p1172_p4, %p180_p5 }
   0xb   : > { %s1742_s22 = scalar_select %p110_p6, %s1635_s13, %s112_s19  }
   0xc   : > { %184 = sbr.rel (%p181_p7) target bundleno = 379 (0x17b), region = 32  ;;  %v1507_v0 = vld [vmem:[%s1962_s1 + $0x40] sm:$0xff] (!%p181_p7)   ;;  %v1511_v4 = vld [vmem:[%s1962_s1 + $0x48] sm:$0xff] (!%p181_p7)   ;;  %v1515_v8 = vld [vmem:[%s1962_s1 + $0x50] sm:$0xff] (!%p181_p7)   ;;  %s213_s19 = sand.u32 (!%p181_p7), 1, %s1631_s12  }
   0xd   : > { %v1508_v1 = vld [vmem:[%s1962_s1 + $0xc0] sm:$0xff] (!%p181_p7)   ;;  %1297 = vmatprep.subr.bf16.mxu0 (!%p181_p7), %v1507_v0  ;;  %v1512_v5 = vld [vmem:[%s1962_s1 + $0xc8] sm:$0xff] (!%p181_p7)   ;;  %v1516_v9 = vld [vmem:[%s1962_s1 + $0xd0] sm:$0xff] (!%p181_p7)   ;;  %s1790_s7 = smul.u32 (!%p181_p7), 11, %s1639_s14 }
   0xe   : > { %v1509_v2 = vld [vmem:[%s1962_s1] sm:$0xff] (!%p181_p7)   ;;  %1349 = vmatprep.subr.bf16.mxu1 (!%p181_p7), %v1508_v1  ;;  %v1513_v6 = vld [vmem:[%s1962_s1 + $0x8] sm:$0xff] (!%p181_p7)   ;;  %v1517_v10 = vld [vmem:[%s1962_s1 + $0x10] sm:$0xff] (!%p181_p7)   ;;  %s1401_s21 = smul.u32 (!%p181_p7), 44, %s213_s19 }
   0xf   : > { %v1510_v3 = vld [vmem:[%s1962_s1 + $0x80] sm:$0xff] (!%p181_p7)   ;;  %1298 = vmatpush3.bf16.msra.mxu0 (!%p181_p7), %v1509_v2  ;;  %v1514_v7 = vld [vmem:[%s1962_s1 + $0x88] sm:$0xff] (!%p181_p7)   ;;  %v1518_v11 = vld [vmem:[%s1962_s1 + $0x90] sm:$0xff] (!%p181_p7)   ;;  %p222_p8 = scmp.lt.s32.totalorder (!%p181_p7), %s1790_s7, 20 }
  0x10   : > { %1350 = vmatpush3.bf16.msra.mxu1 (!%p181_p7), %v1510_v3  ;;  %1299 = vmatprep.subr.bf16.mxu0 (!%p181_p7), %v1511_v4  ;;  %v1519_v12 = vld [vmem:[%s1962_s1 + $0x58] sm:$0xff] (!%p181_p7)   ;;  %v1523_v16 = vld [vmem:[%s1962_s1 + $0x60] sm:$0xff] (!%p181_p7)   ;;  %v1527_v20 = vld [vmem:[%s1962_s1 + $0x68] sm:$0xff] (!%p181_p7)   ;;  %s1881_s12 = scalar_lea.vmem (!%p181_p7), [#allocation2], %s1401_s21  }
  0x11   : > { %1351 = vmatprep.subr.bf16.mxu1 (!%p181_p7), %v1512_v5  ;;  %v1520_v13 = vld [vmem:[%s1962_s1 + $0xd8] sm:$0xff] (!%p181_p7)   ;;  %v1524_v17 = vld [vmem:[%s1962_s1 + $0xe0] sm:$0xff] (!%p181_p7)   ;;  %v1528_v21 = vld [vmem:[%s1962_s1 + $0xe8] sm:$0xff] (!%p181_p7)  }
  0x12   : > { %v1521_v14 = vld [vmem:[%s1962_s1 + $0x18] sm:$0xff] (!%p181_p7)   ;;  %v1525_v18 = vld [vmem:[%s1962_s1 + $0x20] sm:$0xff] (!%p181_p7)   ;;  %v1529_v22 = vld [vmem:[%s1962_s1 + $0x28] sm:$0xff] (!%p181_p7)  }
  0x13   : > { %1300 = vmatpush3.bf16.msra.mxu0 %v1513_v6  ;;  %v1522_v15 = vld [vmem:[%s1962_s1 + $0x98] sm:$0xff]   ;;  %v1526_v19 = vld [vmem:[%s1962_s1 + $0xa0] sm:$0xff]   ;;  %s223_s5 = scalar_select %p222_p8, %s1790_s7, 20  ;;  %v1530_v23 = vld [vmem:[%s1962_s1 + $0xa8] sm:$0xff]  }
  0x14   : > { %1352 = vmatpush3.bf16.msra.mxu1 %v1514_v7  ;;  %1301 = vmatprep.subr.bf16.mxu0 %v1515_v8  ;;  %v1531_v24 = vld [vmem:[%s1962_s1 + $0x70] sm:$0xff]   ;;  %v1535_v28 = vld [vmem:[%s1962_s1 + $0x78] sm:$0xff]   ;;  %v1875_v60 = vld [vmem:[%s1963_s2] ss:$0 sm:$0xff]  ;;  %s1267_s24 = smul.u32 (%p1733_p3), 44, %s1639_s14 }
  0x15   : > { %1353 = vmatprep.subr.bf16.mxu1 %v1516_v9  ;;  %v1532_v25 = vld [vmem:[%s1962_s1 + $0xf0] sm:$0xff]   ;;  %s1255_s23 = sshll.u32 %s223_s5, 4  ;;  %v1536_v29 = vld [vmem:[%s1962_s1 + $0xf8] sm:$0xff]  }
  0x16   : > { %v1533_v26 = vld [vmem:[%s1962_s1 + $0x30] sm:$0xff]   ;;  %s1842_s6 = scalar_lea.vmem %s1961_s0, %s1255_s23  ;;  %v1537_v30 = vld [vmem:[%s1962_s1 + $0x38] sm:$0xff]   ;;  %s880_s23 = ssub.s32 (%p1733_p3), 21, %s1790_s7 }
  0x17   : > { %1302 = vmatpush3.bf16.msra.mxu0 %v1517_v10  ;;  %v1534_v27 = vld [vmem:[%s1962_s1 + $0xb0] sm:$0xff]   ;;  %v1538_v31 = vld [vmem:[%s1962_s1 + $0xb8] sm:$0xff]   ;;  %v266_v50 = vld [vmem:[%s1842_s6 + $0xa0] sm:$0xff]  ;;  %p881_p9 = scmp.lt.s32.totalorder (%p1733_p3), %s880_s23, 11  ;;  %s1904_s27 = scalar_lea.vmem (%p1733_p3), %s1964_s3, %s1267_s24  }
  0x18   : > { %1354 = vmatpush3.bf16.msra.mxu1 %v1518_v11  ;;  %1303 = vmatprep.subr.bf16.mxu0 %v1519_v12  ;;  %v1539_v32 = vld [vmem:[%s1842_s6] ss:$16 sps:$4 sm:$0xff]   ;;  %v1541_v33 = vld [vmem:[%s1842_s6 + $0x4] ss:$16 sps:$4 sm:$0xff]   ;;  %v1542_v34 = vld [vmem:[%s1842_s6 + $0x8] ss:$16 sps:$4 sm:$0xff]   ;;  %v1197_v54 = vcombine.high %v266_v50, %v266_v50  ;;  %v1196_v56 = vcombine.low %v266_v50, %v266_v50 }
  0x19   : > { %1355 = vmatprep.subr.bf16.mxu1 %v1520_v13  ;;  %v1544_v35 = vld [vmem:[%s1842_s6 + $0xc] ss:$16 sps:$4 sm:$0xff]   ;;  %677 = vmatprep.mubr.bf16.mxu0 %v1541_v33  ;;  %v1545_v36 = vld [vmem:[%s1842_s6 + $0x24] ss:$16 sps:$4 sm:$0xff]   ;;  %v1549_v38 = vld [vmem:[%s1842_s6 + $0x20] ss:$16 sps:$4 sm:$0xff]  }
  0x1a   : > { %757 = vmatprep.mubr.bf16.mxu1 %v1544_v35  ;;  %v1547_v37 = vld [vmem:[%s1842_s6 + $0x2c] ss:$16 sps:$4 sm:$0xff]   ;;  %v1550_v39 = vld [vmem:[%s1842_s6 + $0x28] ss:$16 sps:$4 sm:$0xff]   ;;  %v1551_v40 = vld [vmem:[%s1842_s6 + $0x44] ss:$16 sps:$4 sm:$0xff]  }
  0x1b   : > { %1304 = vmatpush3.bf16.msra.mxu0 %v1521_v14  ;;  %v1553_v41 = vld [vmem:[%s1842_s6 + $0x4c] ss:$16 sps:$4 sm:$0xff]   ;;  %v1555_v42 = vld [vmem:[%s1842_s6 + $0x40] ss:$16 sps:$4 sm:$0xff]   ;;  %v1556_v43 = vld [vmem:[%s1842_s6 + $0x48] ss:$16 sps:$4 sm:$0xff]  }
  0x1c   : > { %1356 = vmatpush3.bf16.msra.mxu1 %v1522_v15  ;;  %1305 = vmatprep.subr.bf16.mxu0 %v1523_v16  ;;  %v1557_v44 = vld [vmem:[%s1842_s6 + $0x64] ss:$16 sps:$4 sm:$0xff]   ;;  %v1559_v45 = vld [vmem:[%s1842_s6 + $0x6c] ss:$16 sps:$4 sm:$0xff]   ;;  %v1561_v46 = vld [vmem:[%s1842_s6 + $0x60] ss:$16 sps:$4 sm:$0xff]  }
  0x1d   : > { %1357 = vmatprep.subr.bf16.mxu1 %v1524_v17  ;;  %v1562_v47 = vld [vmem:[%s1842_s6 + $0x68] ss:$16 sps:$4 sm:$0xff]   ;;  %v1563_v48 = vld [vmem:[%s1842_s6 + $0x84] ss:$16 sps:$4 sm:$0xff]   ;;  %v1565_v49 = vld [vmem:[%s1842_s6 + $0x8c] ss:$16 sps:$4 sm:$0xff]  }
  0x1e   : > { %v267_v51 = vld [vmem:[%s1842_s6 + $0xa8] sm:$0xff]  ;;  %v1567_v52 = vld [vmem:[%s1842_s6 + $0x80] ss:$16 sps:$4 sm:$0xff]  }
  0x1f   : > { %1306 = vmatpush3.bf16.msra.mxu0 %v1525_v18  ;;  %v1568_v53 = vld [vmem:[%s1842_s6 + $0x88] ss:$16 sps:$4 sm:$0xff]   ;;  %v1199_v55 = vcombine.high %v267_v51, %v267_v51  ;;  %v1198_v57 = vcombine.low %v267_v51, %v267_v51 }
  0x20   : > { %1358 = vmatpush3.bf16.msra.mxu1 %v1526_v19  ;;  %1307 = vmatprep.subr.bf16.mxu0 %v1527_v20 }
  0x21   : > { %1359 = vmatprep.subr.bf16.mxu1 %v1528_v21 }
  0x23   : > { %1308 = vmatpush3.bf16.msra.mxu0 %v1529_v22 }
  0x24   : > { %1360 = vmatpush3.bf16.msra.mxu1 %v1530_v23  ;;  %1309 = vmatprep.subr.bf16.mxu0 %v1531_v24 }
  0x25   : > { %1361 = vmatprep.subr.bf16.mxu1 %v1532_v25 }
  0x27   : > { %1310 = vmatpush3.bf16.msra.mxu0 %v1533_v26 }
  0x28   : > { %1362 = vmatpush3.bf16.msra.mxu1 %v1534_v27  ;;  %1311 = vmatprep.subr.bf16.mxu0 %v1535_v28 }
  0x29   : > { %1363 = vmatprep.subr.bf16.mxu1 %v1536_v29 }
  0x2b   : > { %1312 = vmatpush3.bf16.msra.mxu0 %v1537_v30 }
  0x2c   : > { %1364 = vmatpush3.bf16.msra.mxu1 %v1538_v31 }
  0x2e   : > { %678 = vmatmul.mubr.bf16.vlgmr.msra.gmra.mrb[0].mxu0 %v1539_v32 }
  0x2f   : > { %758 = vmatmul.mubr.bf16.vlgmr.msra.gmra.mrb[0].mxu1 %v1542_v34  ;;  %685 = vmatprep.mubr.bf16.mxu0 %v1545_v36 }
  0x30   : > { %765 = vmatprep.mubr.bf16.mxu1 %v1547_v37 }
  0x36   : > { %686 = vmatmul.mubr.bf16.gmra.mrb[4].mxu0 %v1549_v38 }
  0x37   : > { %766 = vmatmul.mubr.bf16.gmra.mrb[4].mxu1 %v1550_v39  ;;  %693 = vmatprep.mubr.bf16.mxu0 %v1551_v40 }
  0x38   : > { %773 = vmatprep.mubr.bf16.mxu1 %v1553_v41 }
  0x3e   : > { %694 = vmatmul.mubr.bf16.gmra.mrb[8].mxu0 %v1555_v42 }
  0x3f   : > { %774 = vmatmul.mubr.bf16.gmra.mrb[8].mxu1 %v1556_v43  ;;  %701 = vmatprep.mubr.bf16.mxu0 %v1557_v44 }
  0x40   : > { %781 = vmatprep.mubr.bf16.mxu1 %v1559_v45 }
  0x46   : > { %702 = vmatmul.mubr.bf16.gmra.mrb[12].mxu0 %v1561_v46 }
  0x47   : > { %782 = vmatmul.mubr.bf16.gmra.mrb[12].mxu1 %v1562_v47  ;;  %709 = vmatprep.mubr.bf16.mxu0 %v1563_v48 }
  0x48   : > { %789 = vmatprep.mubr.bf16.mxu1 %v1565_v49 }
  0x4e   : > { %710 = vmatmul.mubr.bf16.gmra.mrb[16].mxu0 %v1567_v52 }
  0x4f   : > { %790 = vmatmul.mubr.bf16.gmra.mrb[16].mxu1 %v1568_v53  ;;  %717 = vmatprep.mubr.bf16.mxu0 %v1197_v54 }
  0x50   : > { %797 = vmatprep.mubr.bf16.mxu1 %v1199_v55 }
  0x56   : > { %718 = vmatmul.mubr.bf16.gmra.mrb[20].mxu0 %v1196_v56 }
  0x57   : > { %798 = vmatmul.mubr.bf16.gmra.mrb[20].mxu1 %v1198_v57 }
 0x101   : > { %v1313_v58 = vpop.f32.mrb[0].mxu0 }
 0x102   : > { %v1365_v59 = vpop.f32.mrb[0].mxu1  ;;  %v1314_v61 = vpop.f32.mrb[1].mxu0 }
 0x103   : > { %v1315_v62 = vadd.f32 %v1314_v61, %v1313_v58  ;;  %v1366_v63 = vpop.f32.mrb[1].mxu1  ;;  %v1316_v0 = vpop.f32.mrb[2].mxu0 }
 0x104   : > { %v1367_v1 = vadd.f32 %v1366_v63, %v1365_v59  ;;  %v1368_v2 = vpop.f32.mrb[2].mxu1  ;;  %v1317_v3 = vpop.f32.mrb[3].mxu0 }
 0x105   : > { %v680_v4 = vadd.f32 %v1315_v62, %v1875_v60  ;;  %v1318_v5 = vadd.f32 %v1317_v3, %v1316_v0  ;;  %v1369_v6 = vpop.f32.mrb[3].mxu1 }
 0x106   : > { %v1370_v7 = vadd.f32 %v1369_v6, %v1368_v2 }
 0x107   : > { %v760_v8 = vadd.f32 %v1367_v1, %v680_v4  ;;  %v683_v9 = vadd.f32 %v1318_v5, %v1875_v60 }
 0x109   : > { %v763_v10 = vadd.f32 %v1370_v7, %v683_v9  ;;  %v1319_v11 = vpop.f32.mrb[4].mxu0  ;;  %v805_v14 = vmax.f32 %v760_v8, 0.0 }
 0x10a   : > { %v1371_v12 = vpop.f32.mrb[4].mxu1  ;;  %v1320_v13 = vpop.f32.mrb[5].mxu0 }
 0x10b   : > { %v806_v15 = vmax.f32 %v763_v10, 0.0  ;;  %v1321_v16 = vadd.f32 %v1320_v13, %v1319_v11  ;;  %v1372_v17 = vpop.f32.mrb[5].mxu1  ;;  %v1322_v18 = vpop.f32.mrb[6].mxu0 }
 0x10c   : > { %v1373_v19 = vadd.f32 %v1372_v17, %v1371_v12  ;;  %v1374_v20 = vpop.f32.mrb[6].mxu1  ;;  %v1323_v21 = vpop.f32.mrb[7].mxu0 }
 0x10d   : > { %v1271_v22 = vpack.c.bf16 %v806_v15, %v805_v14  ;;  %v688_v23 = vadd.f32 %v1321_v16, %v1875_v60  ;;  %v1324_v24 = vadd.f32 %v1323_v21, %v1322_v18  ;;  %v1375_v25 = vpop.f32.mrb[7].mxu1 }
 0x10e   : > { %v1376_v26 = vadd.f32 %v1375_v25, %v1374_v20 }
 0x10f   : > { %1272 = vst [vmem:[%s1881_s12] sm:$0xff] %v1271_v22   ;;  %v768_v27 = vadd.f32 %v1373_v19, %v688_v23  ;;  %v691_v28 = vadd.f32 %v1324_v24, %v1875_v60 }
 0x111   : > { %v771_v29 = vadd.f32 %v1376_v26, %v691_v28  ;;  %v1325_v30 = vpop.f32.mrb[8].mxu0  ;;  %v807_v33 = vmax.f32 %v768_v27, 0.0 }
 0x112   : > { %v1377_v31 = vpop.f32.mrb[8].mxu1  ;;  %v1326_v32 = vpop.f32.mrb[9].mxu0 }
 0x113   : > { %v808_v34 = vmax.f32 %v771_v29, 0.0  ;;  %v1327_v35 = vadd.f32 %v1326_v32, %v1325_v30  ;;  %v1378_v36 = vpop.f32.mrb[9].mxu1  ;;  %v1328_v37 = vpop.f32.mrb[10].mxu0 }
 0x114   : > { %v1379_v38 = vadd.f32 %v1378_v36, %v1377_v31  ;;  %v1380_v39 = vpop.f32.mrb[10].mxu1  ;;  %v1329_v40 = vpop.f32.mrb[11].mxu0 }
 0x115   : > { %v1276_v41 = vpack.c.bf16 %v808_v34, %v807_v33  ;;  %v696_v42 = vadd.f32 %v1327_v35, %v1875_v60  ;;  %v1330_v43 = vadd.f32 %v1329_v40, %v1328_v37  ;;  %v1381_v44 = vpop.f32.mrb[11].mxu1 }
 0x116   : > { %v1382_v45 = vadd.f32 %v1381_v44, %v1380_v39 }
 0x117   : > { %1293 = vst [vmem:[%s1881_s12 + $0x8] sm:$0xff] %v1276_v41   ;;  %v776_v46 = vadd.f32 %v1379_v38, %v696_v42  ;;  %v699_v47 = vadd.f32 %v1330_v43, %v1875_v60 }
 0x119   : > { %v779_v48 = vadd.f32 %v1382_v45, %v699_v47  ;;  %v1331_v49 = vpop.f32.mrb[12].mxu0  ;;  %v809_v52 = vmax.f32 %v776_v46, 0.0 }
 0x11a   : > { %v1383_v50 = vpop.f32.mrb[12].mxu1  ;;  %v1332_v51 = vpop.f32.mrb[13].mxu0 }
 0x11b   : > { %v810_v53 = vmax.f32 %v779_v48, 0.0  ;;  %v1333_v54 = vadd.f32 %v1332_v51, %v1331_v49  ;;  %v1384_v55 = vpop.f32.mrb[13].mxu1  ;;  %v1334_v56 = vpop.f32.mrb[14].mxu0 }
 0x11c   : > { %v1385_v57 = vadd.f32 %v1384_v55, %v1383_v50  ;;  %v1386_v58 = vpop.f32.mrb[14].mxu1  ;;  %v1335_v59 = vpop.f32.mrb[15].mxu0 }
 0x11d   : > { %v1281_v61 = vpack.c.bf16 %v810_v53, %v809_v52  ;;  %v704_v62 = vadd.f32 %v1333_v54, %v1875_v60  ;;  %v1336_v63 = vadd.f32 %v1335_v59, %v1334_v56  ;;  %v1387_v0 = vpop.f32.mrb[15].mxu1 }
 0x11e   : > { %v1388_v1 = vadd.f32 %v1387_v0, %v1386_v58 }
 0x11f   : > { %1294 = vst [vmem:[%s1881_s12 + $0x10] sm:$0xff] %v1281_v61   ;;  %v784_v2 = vadd.f32 %v1385_v57, %v704_v62  ;;  %v707_v3 = vadd.f32 %v1336_v63, %v1875_v60 }
 0x121   : > { %v787_v4 = vadd.f32 %v1388_v1, %v707_v3  ;;  %v1337_v5 = vpop.f32.mrb[16].mxu0  ;;  %v811_v8 = vmax.f32 %v784_v2, 0.0 }
 0x122   : > { %v1389_v6 = vpop.f32.mrb[16].mxu1  ;;  %v1338_v7 = vpop.f32.mrb[17].mxu0 }
 0x123   : > { %v812_v9 = vmax.f32 %v787_v4, 0.0  ;;  %v1339_v10 = vadd.f32 %v1338_v7, %v1337_v5  ;;  %v1390_v11 = vpop.f32.mrb[17].mxu1  ;;  %v1340_v12 = vpop.f32.mrb[18].mxu0 }
 0x124   : > { %v1391_v13 = vadd.f32 %v1390_v11, %v1389_v6  ;;  %v1392_v14 = vpop.f32.mrb[18].mxu1  ;;  %v1341_v15 = vpop.f32.mrb[19].mxu0 }
 0x125   : > { %v1286_v16 = vpack.c.bf16 %v812_v9, %v811_v8  ;;  %v712_v17 = vadd.f32 %v1339_v10, %v1875_v60  ;;  %v1342_v18 = vadd.f32 %v1341_v15, %v1340_v12  ;;  %v1393_v19 = vpop.f32.mrb[19].mxu1 }
 0x126   : > { %v1394_v20 = vadd.f32 %v1393_v19, %v1392_v14 }
 0x127   : > { %1295 = vst [vmem:[%s1881_s12 + $0x18] sm:$0xff] %v1286_v16   ;;  %v792_v21 = vadd.f32 %v1391_v13, %v712_v17  ;;  %v715_v22 = vadd.f32 %v1342_v18, %v1875_v60 }
 0x129   : > { %v795_v23 = vadd.f32 %v1394_v20, %v715_v22  ;;  %v1343_v24 = vpop.f32.mrb[20].mxu0  ;;  %v813_v27 = vmax.f32 %v792_v21, 0.0 }
 0x12a   : > { %v1395_v25 = vpop.f32.mrb[20].mxu1  ;;  %v1344_v26 = vpop.f32.mrb[21].mxu0 }
 0x12b   : > { %v814_v28 = vmax.f32 %v795_v23, 0.0  ;;  %v1345_v29 = vadd.f32 %v1344_v26, %v1343_v24  ;;  %v1396_v30 = vpop.f32.mrb[21].mxu1  ;;  %v1346_v31 = vpop.f32.mrb[22].mxu0 }
 0x12c   : > { %v1397_v32 = vadd.f32 %v1396_v30, %v1395_v25  ;;  %v1398_v33 = vpop.f32.mrb[22].mxu1  ;;  %v1347_v34 = vpop.f32.mrb[23].mxu0 }
 0x12d   : > { %v1291_v35 = vpack.c.bf16 %v814_v28, %v813_v27  ;;  %v720_v36 = vadd.f32 %v1345_v29, %v1875_v60  ;;  %v1399_v37 = vpop.f32.mrb[23].mxu1 }
 0x12f   : > { %1296 = vst [vmem:[%s1881_s12 + $0x20] sm:$0xff] %v1291_v35   ;;  %v800_v38 = vadd.f32 %v1397_v32, %v720_v36  ;;  %878 = sbr.rel (!%p1733_p3) target bundleno = 379 (0x17b), region = 36 }
 0x131   : > { %v815_v39 = vmax.f32 %v800_v38, 0.0 }
 0x133   : > { %v1266_v40 = vpack.c.bf16 %v815_v39, %v815_v39 }
 0x135   : > { %871 = vst [vmem:[%s1881_s12 + $0x28] sm:$0xf] %v1266_v40 }
 0x136   : > { %s1976_s23 = smov (!%p881_p9, %s880_s23), 11 }
 0x137   : > { %s1243_s28 = sshll.u32 %s1976_s23, 6 }
 0x138   : > { %p1246_p10 = scmp.eq.s32.totalorder %s1243_s28, 0 }
 0x139   : > { %1573 = sdivrem.u32 (!%p1246_p10), %s1976_s23, 11 }
 0x13a   : > { %890 = sbr.rel (%p1246_p10) target bundleno = 379 (0x17b), region = 40 }
 0x142   : > { %s1910_s20 = spop.drf %1573 }
 0x143   : > { %p1247_p11 = scmp.le.s32.totalorder %s1910_s20, 0 }
 0x144   : > { %s1966_s14 = smov (!%p1247_p11), %s1904_s27  ;;  %s1967_s7 = smov (!%p1247_p11), %s1881_s12 }
 0x145   : > { %1096 = sbr.rel (%p1247_p11) target bundleno = 350 (0x15e), region = 118  ;;  %s1919_s29 = smov (!%p1247_p11), 0  }
 0x146   : > { %s1921_s30 = smov (!%p1247_p11), 0  }
 0x14c LB: >> { %v907_v60 = vld [vmem:[%s1655_s7] sm:$0xf]  ;;  %v909_v41 = vld [vmem:[%s1655_s7 + $0x4] sm:$0xf]  ;;  %v911_v42 = vld [vmem:[%s1655_s7 + $0x8] sm:$0xf]  ;;  %s1663_s30 = sphi %s1921_s30, %s901_s30   ;;  %s1659_s29 = sphi %s1919_s29, %s1968_s29   ;;  %s1655_s7 = sphi %s1967_s7, %s934_s7   ;;  %s1651_s14 = sphi %s1966_s14, %s935_s14  }
 0x14d   : >> { %908 = vst [vmem:[%s1651_s14] sm:$0xf] %v907_v60  ;;  %910 = vst [vmem:[%s1651_s14 + $0x4] sm:$0xf] %v909_v41  ;;  %v913_v43 = vld [vmem:[%s1655_s7 + $0xc] sm:$0xf]  ;;  %s929_s4 = sadd.s32 1, %s1659_s29 }
 0x14e   : >> { %912 = vst [vmem:[%s1651_s14 + $0x8] sm:$0xf] %v911_v42  ;;  %v915_v44 = vld [vmem:[%s1655_s7 + $0x10] sm:$0xf]  ;;  %v917_v45 = vld [vmem:[%s1655_s7 + $0x14] sm:$0xf]  ;;  %p930_p12 = scmp.ge.s32.totalorder %s929_s4, %s1910_s20 }
 0x14f   : >> { %914 = vst [vmem:[%s1651_s14 + $0xc] sm:$0xf] %v913_v43  ;;  %916 = vst [vmem:[%s1651_s14 + $0x10] sm:$0xf] %v915_v44  ;;  %v919_v46 = vld [vmem:[%s1655_s7 + $0x18] sm:$0xf] }
 0x150   : >> { %918 = vst [vmem:[%s1651_s14 + $0x14] sm:$0xf] %v917_v45  ;;  %v921_v47 = vld [vmem:[%s1655_s7 + $0x1c] sm:$0xf]  ;;  %v923_v48 = vld [vmem:[%s1655_s7 + $0x20] sm:$0xf] }
 0x151   : >> { %920 = vst [vmem:[%s1651_s14 + $0x18] sm:$0xf] %v919_v46  ;;  %922 = vst [vmem:[%s1651_s14 + $0x1c] sm:$0xf] %v921_v47  ;;  %v925_v49 = vld [vmem:[%s1655_s7 + $0x24] sm:$0xf] }
 0x152   : >> { %924 = vst [vmem:[%s1651_s14 + $0x20] sm:$0xf] %v923_v48  ;;  %v927_v50 = vld [vmem:[%s1655_s7 + $0x28] sm:$0xf]  ;;  %926 = vst [vmem:[%s1651_s14 + $0x24] sm:$0xf] %v925_v49 }
 0x153   : >> { %928 = vst [vmem:[%s1651_s14 + $0x28] sm:$0xf] %v927_v50  ;;  %s1978_s4 = smov (%p930_p12, %s929_s4), 0  ;;  %s901_s30 = sadd.s32 1, %s1663_s30  }
 0x154   : >> { %s932_s6 = smul.u32 44, %s1978_s4  ;;  %p900_p13 = scmp.ge.s32.totalorder %s901_s30, %s1910_s20 }
 0x155   : >> { %s1968_s29 = smov %s1978_s4 }
 0x156   : >> { %s934_s7 = scalar_lea.vmem %s1881_s12, %s932_s6 [#allocation2]   ;;  %s935_s14 = scalar_lea.vmem %s1904_s27, %s932_s6  }
 0x157   : > { %903 = sbr.rel (!%p900_p13) target bundleno = 332 (0x14c), region = 124 }
 0x15e PF: > { %1575 = sdivrem.u32 %s1976_s23, 11 }
 0x15f   : > { %s1248_s5 = smul.u32 44, %s1910_s20 }
 0x161   : > { %s940_s8 = scalar_lea.vmem %s1881_s12, %s1248_s5 [#allocation2]   ;;  %s942_s9 = scalar_lea.vmem %s1904_s27, %s1248_s5  }
 0x167   : > { %s1576_s10 = spop.drf %1575 }
 0x168   : > { %p1250_p0 = scmp.le.s32.totalorder %s1576_s10, 0 }
 0x169   : > { %s1665_s11 = smov (!%p1250_p0), %s942_s9   ;;  %s1669_s17 = smov (!%p1250_p0), %s940_s8  }
 0x16a   : > { %1110 = sbr.rel (%p1250_p0) target bundleno = 379 (0x17b), region = 129  ;;  %s1673_s19 = smov (!%p1250_p0), 0  }
 0x16b   : > { %s1677_s21 = smov (!%p1250_p0), 0  }
 0x171 LB: >> { %v952_v51 = vld [vmem:[%s1671_s17] sm:$0xf]  ;;  %s954_s24 = sadd.s32 1, %s1675_s19  ;;  %s946_s21 = sadd.s32 1, %s1679_s21   ;;  %s1679_s21 = sphi %s1677_s21, %s946_s21   ;;  %s1675_s19 = sphi %s1673_s19, %s1674_s19   ;;  %s1671_s17 = sphi %s1669_s17, %s959_s17   ;;  %s1667_s11 = sphi %s1665_s11, %s960_s11  }
 0x172   : >> { %953 = vst [vmem:[%s1667_s11] sm:$0xf] %v952_v51  ;;  %p955_p1 = scmp.ge.s32.totalorder %s954_s24, %s1576_s10  ;;  %p945_p2 = scmp.ge.s32.totalorder %s946_s21, %s1576_s10 }
 0x174   : >> { %s1980_s24 = smov (%p955_p1, %s954_s24), 0  ;;  %948 = sbr.rel (!%p945_p2) target bundleno = 369 (0x171), region = 135 }
 0x175   : >> { %s1251_s12 = sshll.u32 %s1980_s24, 2  ;;  %s1674_s19 = smov %s1980_s24  }
 0x176   : >> { %s959_s17 = scalar_lea.vmem %s940_s8, %s1251_s12 [#allocation2]   ;;  %s960_s11 = scalar_lea.vmem %s942_s9, %s1251_s12  }
 0x17b PF: > { %s13_s16 = sadd.s32 1, %s1647_s16   ;;  %s1969_s12 = smov %s1635_s13 }
 0x17c   : > { %p10_p3 = scmp.ge.s32.totalorder %s13_s16, 4   ;;  %s1970_s13 = smov %s1742_s22 }
 0x17d   : > { %s1971_s14 = smov %s1643_s15  ;;  %s1972_s15 = smov %s1974_s18 }
 0x17e   :  { %12 = sbr.rel (!%p10_p3) target bundleno = 3 (0x3), region = 146 }

// kernel: cnn_value_forward.6
= control target key start
LH: loop header
LB: loop body
LE: loop exit
PB: predicated region body
PF: predicated region fallthrough
CT: control target
= control target key end

     0   :  { %v1281_v34 = vmov 0.0   ;;  %vm1282_vm0 = vmmov 0   ;;  %vm516_vm1 = vcmask 523264   ;;  %s1602_s1 = inlined_call_operand.vmem [shape: bf16[576,128], index: 1, kind: input, shape index: {}]   ;;  %s1603_s0 = inlined_call_operand.vmem [shape: bf16[98,576], index: 0, kind: input, shape index: {}]   ;;  %s1604_s2 = inlined_call_operand.vmem [shape: f32[1,128], index: 2, kind: input, shape index: {}]   ;;  %s1605_s3 = inlined_call_operand.vmem [shape: bf16[98,128], index: 3, kind: output, shape index: {}]  }
   0x1   :  { %v1198_v0 = vld [vmem:[%s1602_s1 + $0x40] sm:$0xff]   ;;  %v1202_v4 = vld [vmem:[%s1602_s1 + $0x48] sm:$0xff]   ;;  %v1206_v8 = vld [vmem:[%s1602_s1 + $0x50] sm:$0xff]  }
   0x2   :  { %v1199_v1 = vld [vmem:[%s1602_s1 + $0xc0] sm:$0xff]   ;;  %1025 = vmatprep.subr.bf16.mxu0 %v1198_v0  ;;  %v1203_v5 = vld [vmem:[%s1602_s1 + $0xc8] sm:$0xff]   ;;  %v1207_v9 = vld [vmem:[%s1602_s1 + $0xd0] sm:$0xff]  }
   0x3   :  { %v1200_v2 = vld [vmem:[%s1602_s1] sm:$0xff]   ;;  %1083 = vmatprep.subr.bf16.mxu1 %v1199_v1  ;;  %v1204_v6 = vld [vmem:[%s1602_s1 + $0x8] sm:$0xff]   ;;  %v1208_v10 = vld [vmem:[%s1602_s1 + $0x10] sm:$0xff]  }
   0x4   :  { %v1201_v3 = vld [vmem:[%s1602_s1 + $0x80] sm:$0xff]   ;;  %1026 = vmatpush3.bf16.msra.mxu0 %v1200_v2  ;;  %v1205_v7 = vld [vmem:[%s1602_s1 + $0x88] sm:$0xff]   ;;  %v1209_v11 = vld [vmem:[%s1602_s1 + $0x90] sm:$0xff]  }
   0x5   :  { %1084 = vmatpush3.bf16.msra.mxu1 %v1201_v3  ;;  %1027 = vmatprep.subr.bf16.mxu0 %v1202_v4  ;;  %v1210_v12 = vld [vmem:[%s1602_s1 + $0x58] sm:$0xff]   ;;  %v1214_v16 = vld [vmem:[%s1602_s1 + $0x60] sm:$0xff]   ;;  %v1218_v20 = vld [vmem:[%s1602_s1 + $0x68] sm:$0xff]  }
   0x6   :  { %1085 = vmatprep.subr.bf16.mxu1 %v1203_v5  ;;  %v1211_v13 = vld [vmem:[%s1602_s1 + $0xd8] sm:$0xff]   ;;  %v1215_v17 = vld [vmem:[%s1602_s1 + $0xe0] sm:$0xff]   ;;  %v1219_v21 = vld [vmem:[%s1602_s1 + $0xe8] sm:$0xff]  }
   0x7   :  { %v1212_v14 = vld [vmem:[%s1602_s1 + $0x18] sm:$0xff]   ;;  %v1216_v18 = vld [vmem:[%s1602_s1 + $0x20] sm:$0xff]   ;;  %v1220_v22 = vld [vmem:[%s1602_s1 + $0x28] sm:$0xff]  }
   0x8   :  { %1028 = vmatpush3.bf16.msra.mxu0 %v1204_v6  ;;  %v1213_v15 = vld [vmem:[%s1602_s1 + $0x98] sm:$0xff]   ;;  %v1217_v19 = vld [vmem:[%s1602_s1 + $0xa0] sm:$0xff]   ;;  %v1221_v23 = vld [vmem:[%s1602_s1 + $0xa8] sm:$0xff]  }
   0x9   :  { %1086 = vmatpush3.bf16.msra.mxu1 %v1205_v7  ;;  %1029 = vmatprep.subr.bf16.mxu0 %v1206_v8  ;;  %v1222_v24 = vld [vmem:[%s1602_s1 + $0x70] sm:$0xff]   ;;  %v1226_v28 = vld [vmem:[%s1602_s1 + $0x78] sm:$0xff]   ;;  %v1235_v36 = vld [vmem:[%s1603_s0 + $0xc] ss:$20 sps:$4 sm:$0xff]  }
   0xa   :  { %1087 = vmatprep.subr.bf16.mxu1 %v1207_v9  ;;  %v1223_v25 = vld [vmem:[%s1602_s1 + $0xf0] sm:$0xff]   ;;  %v1227_v29 = vld [vmem:[%s1602_s1 + $0xf8] sm:$0xff]   ;;  %v1236_v37 = vld [vmem:[%s1602_s1 + $0x100] sm:$0xff]   ;;  %658 = vmatprep.mubr.bf16.mxu1 %v1235_v36 }
   0xb   :  { %v1224_v26 = vld [vmem:[%s1602_s1 + $0x30] sm:$0xff]   ;;  %v1228_v30 = vld [vmem:[%s1602_s1 + $0x38] sm:$0xff]   ;;  %v1237_v38 = vld [vmem:[%s1603_s0 + $0x2c] ss:$20 sps:$4 sm:$0xff]  }
   0xc   :  { %1030 = vmatpush3.bf16.msra.mxu0 %v1208_v10  ;;  %v1225_v27 = vld [vmem:[%s1602_s1 + $0xb0] sm:$0xff]   ;;  %v1229_v31 = vld [vmem:[%s1602_s1 + $0xb8] sm:$0xff]   ;;  %v1247_v43 = vld [vmem:[%s1602_s1 + $0x108] sm:$0xff]  }
   0xd   :  { %1088 = vmatpush3.bf16.msra.mxu1 %v1209_v11  ;;  %1031 = vmatprep.subr.bf16.mxu0 %v1210_v12  ;;  %v1230_v32 = vld [vmem:[%s1603_s0] ss:$20 sps:$4 sm:$0xff]   ;;  %v1232_v33 = vld [vmem:[%s1603_s0 + $0x4] ss:$20 sps:$4 sm:$0xff]   ;;  %v1233_v35 = vld [vmem:[%s1603_s0 + $0x8] ss:$20 sps:$4 sm:$0xff]  }
   0xe   :  { %1089 = vmatprep.subr.bf16.mxu1 %v1211_v13  ;;  %570 = vmatprep.mubr.bf16.mxu0 %v1232_v33  ;;  %v1239_v39 = vld [vmem:[%s1603_s0 + $0x34] ss:$20 sps:$4 sm:$0xff]   ;;  %v1242_v41 = vld [vmem:[%s1603_s0 + $0x30] ss:$20 sps:$4 sm:$0xff]   ;;  %v1249_v47 = vld [vmem:[%s1603_s0 + $0x58] ss:$20 sps:$4 sm:$0xff]  }
   0xf   :  { %v1241_v40 = vld [vmem:[%s1603_s0 + $0x28] ss:$20 sps:$4 sm:$0xff]   ;;  %v1256_v45 = vld [vmem:[%s1602_s1 + $0x110] sm:$0xff]   ;;  %v1252_v49 = vld [vmem:[%s1603_s0 + $0x84] ss:$20 sps:$4 sm:$0xff]  }
  0x10   :  { %1032 = vmatpush3.bf16.msra.mxu0 %v1212_v14  ;;  %v1243_v42 = vld [vmem:[%s1603_s0 + $0x54] ss:$20 sps:$4 sm:$0xff]   ;;  %v1245_v44 = vld [vmem:[%s1603_s0 + $0x5c] ss:$20 sps:$4 sm:$0xff]   ;;  %v1254_v51 = vld [vmem:[%s1603_s0 + $0x78] ss:$20 sps:$4 sm:$0xff]  }
  0x11   :  { %1090 = vmatpush3.bf16.msra.mxu1 %v1213_v15  ;;  %1033 = vmatprep.subr.bf16.mxu0 %v1214_v16  ;;  %v1248_v46 = vld [vmem:[%s1603_s0 + $0x50] ss:$20 sps:$4 sm:$0xff]   ;;  %v1269_v50 = vld [vmem:[%s1602_s1 + $0x118] sm:$0xff]   ;;  %v1255_v52 = vld [vmem:[%s1603_s0 + $0x80] ss:$20 sps:$4 sm:$0xff]  }
  0x12   :  { %1091 = vmatprep.subr.bf16.mxu1 %v1215_v17  ;;  %v1250_v48 = vld [vmem:[%s1603_s0 + $0x7c] ss:$20 sps:$4 sm:$0xff]   ;;  %v1257_v53 = vld [vmem:[%s1603_s0 + $0xa4] ss:$20 sps:$4 sm:$0xff]   ;;  %v1259_v54 = vld [vmem:[%s1603_s0 + $0xac] ss:$20 sps:$4 sm:$0xff]  }
  0x13   :  { %v1261_v55 = vld [vmem:[%s1603_s0 + $0xa0] ss:$20 sps:$4 sm:$0xff]   ;;  %v1262_v56 = vld [vmem:[%s1603_s0 + $0xa8] ss:$20 sps:$4 sm:$0xff]   ;;  %v1268_v62 = vld [vmem:[%s1603_s0 + $0xd0] ss:$20 sps:$4 sm:$0xff]  }
  0x14   :  { %1034 = vmatpush3.bf16.msra.mxu0 %v1216_v18  ;;  %v1263_v57 = vld [vmem:[%s1603_s0 + $0xcc] ss:$20 sps:$4 sm:$0xff]   ;;  %v1265_v58 = vld [vmem:[%s1603_s0 + $0xd4] ss:$20 sps:$4 sm:$0xff]   ;;  %v52_v60 = vld [vmem:[%s1603_s0 + $0xf8] sm:$0x11] }
  0x15   :  { %1092 = vmatpush3.bf16.msra.mxu1 %v1217_v19  ;;  %1035 = vmatprep.subr.bf16.mxu0 %v1218_v20  ;;  %v51_v59 = vld [vmem:[%s1603_s0 + $0xf0] sm:$0x11]  ;;  %v1267_v61 = vld [vmem:[%s1603_s0 + $0xc8] ss:$20 sps:$4 sm:$0xff]   ;;  %v919_v0 = vcombine.high %v52_v60, %v52_v60  ;;  %v918_v2 = vcombine.low %v52_v60, %v52_v60  ;;  %v1276_v5 = vld [vmem:[%s1603_s0 + $0x38] ss:$20 sps:$4 sm:$0xff]  }
  0x16   :  { %1093 = vmatprep.subr.bf16.mxu1 %v1219_v21  ;;  %v917_v63 = vcombine.high %v51_v59, %v51_v59  ;;  %v916_v1 = vcombine.low %v51_v59, %v51_v59  ;;  %v1274_v3 = vld [vmem:[%s1603_s0 + $0x10] ss:$20 sps:$4 sm:$0xff]   ;;  %v1277_v6 = vld [vmem:[%s1603_s0 + $0xd8] ss:$20 sps:$4 sm:$0xff]   ;;  %v1278_v7 = vld [vmem:[%s1603_s0 + $0x60] ss:$20 sps:$4 sm:$0xff]  }
  0x17   :  { %v1275_v4 = vld [vmem:[%s1603_s0 + $0xb0] ss:$20 sps:$4 sm:$0xff]   ;;  %v1279_v8 = vld [vmem:[%s1603_s0 + $0x100] ss:$0 sps:$4 sm:$0x11]  }
  0x18   :  { %1036 = vmatpush3.bf16.msra.mxu0 %v1220_v22  ;;  %v1280_v9 = vld [vmem:[%s1603_s0 + $0x88] ss:$20 sps:$4 sm:$0xff]   ;;  %v1542_v11 = vld [vmem:[%s1604_s2] ss:$0 sm:$0xff] }
  0x19   :  { %1094 = vmatpush3.bf16.msra.mxu1 %v1221_v23  ;;  %1037 = vmatprep.subr.bf16.mxu0 %v1222_v24 }
  0x1a   :  { %1095 = vmatprep.subr.bf16.mxu1 %v1223_v25 }
  0x1c   :  { %1038 = vmatpush3.bf16.msra.mxu0 %v1224_v26 }
  0x1d   :  { %1096 = vmatpush3.bf16.msra.mxu1 %v1225_v27  ;;  %1039 = vmatprep.subr.bf16.mxu0 %v1226_v28 }
  0x1e   :  { %1097 = vmatprep.subr.bf16.mxu1 %v1227_v29 }
  0x20   :  { %1040 = vmatpush3.bf16.msra.mxu0 %v1228_v30 }
  0x21   :  { %1098 = vmatpush3.bf16.msra.mxu1 %v1229_v31  ;;  %1152 = vmatprep.subr.bf16.mxu0 %v1281_v34 }
  0x22   :  { %1188 = vmatprep.subr.bf16.mxu1 %v1281_v34 }
  0x23   :  { %571 = vmatmul.mubr.bf16.vlgmr.msra.gmra.mrb[0].mxu0 %v1230_v32 }
  0x24   :  { %659 = vmatmul.mubr.bf16.vlgmr.msra.gmra.mrb[0].mxu1 %v1233_v35  ;;  %1153 = vmatpush3.bf16.msra.mxu0 %v1236_v37 }
  0x25   :  { %578 = vmatprep.mubr.bf16.mxu0 %v1237_v38  ;;  %1192 = vmatpush3.bf16.msra.mxu1 %v1236_v37 }
  0x26   :  { %666 = vmatprep.mubr.bf16.mxu1 %v1239_v39  ;;  %1154 = vmatprep.subr.bf16.mxu0 %v1281_v34 }
  0x27   :  { %1189 = vmatprep.subr.bf16.mxu1 %v1281_v34 }
  0x28   :  { %1155 = vmatpush3.bf16.msra.mxu0 %v1247_v43 }
  0x29   :  { %1193 = vmatpush3.bf16.msra.mxu1 %v1247_v43  ;;  %1156 = vmatprep.subr.bf16.mxu0 %v1281_v34 }
  0x2a   :  { %1190 = vmatprep.subr.bf16.mxu1 %v1281_v34 }
  0x2b   :  { %579 = vmatmul.mubr.bf16.gmra.mrb[4].mxu0 %v1241_v40 }
  0x2c   :  { %667 = vmatmul.mubr.bf16.gmra.mrb[4].mxu1 %v1242_v41  ;;  %586 = vmatprep.mubr.bf16.mxu0 %v1243_v42 }
  0x2d   :  { %674 = vmatprep.mubr.bf16.mxu1 %v1245_v44  ;;  %1157 = vmatpush3.bf16.msra.mxu0 %v1256_v45 }
  0x2e   :  { %1194 = vmatpush3.bf16.msra.mxu1 %v1256_v45  ;;  %1158 = vmatprep.subr.bf16.mxu0 %v1281_v34 }
  0x2f   :  { %1191 = vmatprep.subr.bf16.mxu1 %v1281_v34 }
  0x31   :  { %1159 = vmatpush3.bf16.msra.mxu0 %v1269_v50 }
  0x32   :  { %1195 = vmatpush3.bf16.msra.mxu1 %v1269_v50 }
  0x33   :  { %587 = vmatmul.mubr.bf16.gmra.mrb[8].mxu0 %v1248_v46 }
  0x34   :  { %675 = vmatmul.mubr.bf16.gmra.mrb[8].mxu1 %v1249_v47  ;;  %594 = vmatprep.mubr.bf16.mxu0 %v1250_v48 }
  0x35   :  { %682 = vmatprep.mubr.bf16.mxu1 %v1252_v49 }
  0x3b   :  { %595 = vmatmul.mubr.bf16.gmra.mrb[12].mxu0 %v1254_v51 }
  0x3c   :  { %683 = vmatmul.mubr.bf16.gmra.mrb[12].mxu1 %v1255_v52  ;;  %602 = vmatprep.mubr.bf16.mxu0 %v1257_v53 }
  0x3d   :  { %690 = vmatprep.mubr.bf16.mxu1 %v1259_v54 }
  0x43   :  { %603 = vmatmul.mubr.bf16.gmra.mrb[16].mxu0 %v1261_v55 }
  0x44   :  { %691 = vmatmul.mubr.bf16.gmra.mrb[16].mxu1 %v1262_v56  ;;  %610 = vmatprep.mubr.bf16.mxu0 %v1263_v57 }
  0x45   :  { %698 = vmatprep.mubr.bf16.mxu1 %v1265_v58 }
  0x4b   :  { %611 = vmatmul.mubr.bf16.gmra.mrb[20].mxu0 %v1267_v61 }
  0x4c   :  { %699 = vmatmul.mubr.bf16.gmra.mrb[20].mxu1 %v1268_v62  ;;  %618 = vmatprep.mubr.bf16.mxu0 %v917_v63 }
  0x4d   :  { %706 = vmatprep.mubr.bf16.mxu1 %v919_v0 }
  0x53   :  { %619 = vmatmul.mubr.bf16.gmra.mrb[24].mxu0 %v916_v1 }
  0x54   :  { %707 = vmatmul.mubr.bf16.gmra.mrb[24].mxu1 %v918_v2  ;;  %1160 = vmatprep.mubr.msk.bf16.mxu0 %vm1282_vm0, %v1281_v34 }
  0x55   :  { %1176 = vmatprep.mubr.msk.bf16.mxu1 %vm1282_vm0, %v1281_v34 }
  0x5b   :  { %1161 = vmatmul.mubr.msk.bf16.vlgmr.msra.gmra.mrb[28].mxu0 %vm516_vm1, %v1274_v3 }
  0x5c   :  { %1177 = vmatmul.mubr.msk.bf16.vlgmr.msra.gmra.mrb[28].mxu1 %vm516_vm1, %v1275_v4  ;;  %1164 = vmatprep.mubr.msk.bf16.mxu0 %vm1282_vm0, %v1281_v34 }
  0x5d   :  { %1180 = vmatprep.mubr.msk.bf16.mxu1 %vm1282_vm0, %v1281_v34 }
  0x63   :  { %1165 = vmatmul.mubr.msk.bf16.gmra.mrb[32].mxu0 %vm516_vm1, %v1276_v5 }
  0x64   :  { %1181 = vmatmul.mubr.msk.bf16.gmra.mrb[32].mxu1 %vm516_vm1, %v1277_v6  ;;  %1168 = vmatprep.mubr.msk.bf16.mxu0 %vm1282_vm0, %v1281_v34 }
  0x65   :  { %1184 = vmatprep.mubr.msk.bf16.mxu1 %vm1282_vm0, %v1281_v34 }
  0x6b   :  { %1169 = vmatmul.mubr.msk.bf16.gmra.mrb[36].mxu0 %vm516_vm1, %v1278_v7 }
  0x6c   :  { %1185 = vmatmul.mubr.msk.bf16.gmra.mrb[36].mxu1 %vm516_vm1, %v1279_v8  ;;  %1172 = vmatprep.mubr.msk.bf16.mxu0 %vm1282_vm0, %v1281_v34 }
  0x73   :  { %1173 = vmatmul.mubr.msk.bf16.gmra.mrb[40].mxu0 %vm516_vm1, %v1280_v9 }
  0xf6   :  { %v1041_v10 = vpop.f32.mrb[0].mxu0 }
  0xf7   :  { %v1042_v12 = vpop.f32.mrb[1].mxu0  ;;  %v1099_v13 = vpop.f32.mrb[0].mxu1 }
  0xf8   :  { %v1043_v14 = vadd.f32 %v1042_v12, %v1041_v10  ;;  %v1044_v15 = vpop.f32.mrb[2].mxu0  ;;  %v1100_v16 = vpop.f32.mrb[1].mxu1 }
  0xf9   :  { %v1045_v17 = vpop.f32.mrb[3].mxu0  ;;  %v1101_v18 = vadd.f32 %v1100_v16, %v1099_v13  ;;  %v1102_v19 = vpop.f32.mrb[2].mxu1 }
  0xfa   :  { %v573_v20 = vadd.f32 %v1043_v14, %v1542_v11  ;;  %v1046_v21 = vadd.f32 %v1045_v17, %v1044_v15  ;;  %v1103_v22 = vpop.f32.mrb[3].mxu1 }
  0xfb   :  { %v1104_v23 = vadd.f32 %v1103_v22, %v1102_v19 }
  0xfc   :  { %v576_v24 = vadd.f32 %v1046_v21, %v1542_v11  ;;  %v1546_v25 = vadd.f32 %v1101_v18, %v573_v20 }
  0xfe   :  { %v1047_v26 = vpop.f32.mrb[4].mxu0  ;;  %v1548_v27 = vadd.f32 %v1104_v23, %v576_v24 }
  0xff   :  { %v1048_v28 = vpop.f32.mrb[5].mxu0  ;;  %v1105_v29 = vpop.f32.mrb[4].mxu1 }
 0x100   :  { %v1049_v30 = vadd.f32 %v1048_v28, %v1047_v26  ;;  %v1050_v31 = vpop.f32.mrb[6].mxu0  ;;  %v1106_v32 = vpop.f32.mrb[5].mxu1 }
 0x101   :  { %v1051_v33 = vpop.f32.mrb[7].mxu0  ;;  %v1107_v34 = vadd.f32 %v1106_v32, %v1105_v29  ;;  %v1108_v35 = vpop.f32.mrb[6].mxu1 }
 0x102   :  { %v581_v36 = vadd.f32 %v1049_v30, %v1542_v11  ;;  %v1052_v37 = vadd.f32 %v1051_v33, %v1050_v31  ;;  %v1109_v38 = vpop.f32.mrb[7].mxu1 }
 0x103   :  { %v1110_v39 = vadd.f32 %v1109_v38, %v1108_v35 }
 0x104   :  { %v584_v40 = vadd.f32 %v1052_v37, %v1542_v11  ;;  %v1552_v41 = vadd.f32 %v1107_v34, %v581_v36 }
 0x106   :  { %v1053_v42 = vpop.f32.mrb[8].mxu0  ;;  %v1554_v43 = vadd.f32 %v1110_v39, %v584_v40 }
 0x107   :  { %v1054_v44 = vpop.f32.mrb[9].mxu0  ;;  %v1111_v45 = vpop.f32.mrb[8].mxu1 }
 0x108   :  { %v1055_v46 = vadd.f32 %v1054_v44, %v1053_v42  ;;  %v1056_v47 = vpop.f32.mrb[10].mxu0  ;;  %v1112_v48 = vpop.f32.mrb[9].mxu1 }
 0x109   :  { %v1057_v49 = vpop.f32.mrb[11].mxu0  ;;  %v1113_v50 = vadd.f32 %v1112_v48, %v1111_v45  ;;  %v1114_v51 = vpop.f32.mrb[10].mxu1 }
 0x10a   :  { %v589_v52 = vadd.f32 %v1055_v46, %v1542_v11  ;;  %v1058_v53 = vadd.f32 %v1057_v49, %v1056_v47  ;;  %v1115_v54 = vpop.f32.mrb[11].mxu1 }
 0x10b   :  { %v1116_v55 = vadd.f32 %v1115_v54, %v1114_v51 }
 0x10c   :  { %v592_v56 = vadd.f32 %v1058_v53, %v1542_v11  ;;  %v1558_v57 = vadd.f32 %v1113_v50, %v589_v52 }
 0x10e   :  { %v1059_v58 = vpop.f32.mrb[12].mxu0  ;;  %v1560_v59 = vadd.f32 %v1116_v55, %v592_v56 }
 0x10f   :  { %v1060_v60 = vpop.f32.mrb[13].mxu0  ;;  %v1117_v61 = vpop.f32.mrb[12].mxu1 }
 0x110   :  { %v1061_v62 = vadd.f32 %v1060_v60, %v1059_v58  ;;  %v1062_v63 = vpop.f32.mrb[14].mxu0  ;;  %v1118_v0 = vpop.f32.mrb[13].mxu1 }
 0x111   :  { %v1063_v1 = vpop.f32.mrb[15].mxu0  ;;  %v1119_v2 = vadd.f32 %v1118_v0, %v1117_v61  ;;  %v1120_v3 = vpop.f32.mrb[14].mxu1 }
 0x112   :  { %v597_v4 = vadd.f32 %v1061_v62, %v1542_v11  ;;  %v1064_v5 = vadd.f32 %v1063_v1, %v1062_v63  ;;  %v1121_v6 = vpop.f32.mrb[15].mxu1 }
 0x113   :  { %v1122_v7 = vadd.f32 %v1121_v6, %v1120_v3 }
 0x114   :  { %v600_v8 = vadd.f32 %v1064_v5, %v1542_v11  ;;  %v1564_v9 = vadd.f32 %v1119_v2, %v597_v4 }
 0x116   :  { %v1065_v10 = vpop.f32.mrb[16].mxu0  ;;  %v1566_v12 = vadd.f32 %v1122_v7, %v600_v8 }
 0x117   :  { %v1066_v13 = vpop.f32.mrb[17].mxu0  ;;  %v1123_v14 = vpop.f32.mrb[16].mxu1 }
 0x118   :  { %v1067_v15 = vadd.f32 %v1066_v13, %v1065_v10  ;;  %v1068_v16 = vpop.f32.mrb[18].mxu0  ;;  %v1124_v17 = vpop.f32.mrb[17].mxu1 }
 0x119   :  { %v1069_v18 = vpop.f32.mrb[19].mxu0  ;;  %v1125_v19 = vadd.f32 %v1124_v17, %v1123_v14  ;;  %v1126_v20 = vpop.f32.mrb[18].mxu1 }
 0x11a   :  { %v605_v21 = vadd.f32 %v1067_v15, %v1542_v11  ;;  %v1070_v22 = vadd.f32 %v1069_v18, %v1068_v16  ;;  %v1127_v23 = vpop.f32.mrb[19].mxu1 }
 0x11b   :  { %v1128_v24 = vadd.f32 %v1127_v23, %v1126_v20 }
 0x11c   :  { %v608_v26 = vadd.f32 %v1070_v22, %v1542_v11  ;;  %v693_v28 = vadd.f32 %v1125_v19, %v605_v21 }
 0x11e   :  { %v1071_v29 = vpop.f32.mrb[20].mxu0  ;;  %v696_v30 = vadd.f32 %v1128_v24, %v608_v26 }
 0x11f   :  { %v1072_v31 = vpop.f32.mrb[21].mxu0  ;;  %v1129_v32 = vpop.f32.mrb[20].mxu1 }
 0x120   :  { %v1073_v33 = vadd.f32 %v1072_v31, %v1071_v29  ;;  %v1074_v34 = vpop.f32.mrb[22].mxu0  ;;  %v1130_v35 = vpop.f32.mrb[21].mxu1 }
 0x121   :  { %v1075_v36 = vpop.f32.mrb[23].mxu0  ;;  %v1131_v37 = vadd.f32 %v1130_v35, %v1129_v32  ;;  %v1132_v38 = vpop.f32.mrb[22].mxu1 }
 0x122   :  { %v613_v39 = vadd.f32 %v1073_v33, %v1542_v11  ;;  %v1076_v40 = vadd.f32 %v1075_v36, %v1074_v34  ;;  %v1133_v42 = vpop.f32.mrb[23].mxu1 }
 0x123   :  { %v1134_v44 = vadd.f32 %v1133_v42, %v1132_v38 }
 0x124   :  { %v616_v45 = vadd.f32 %v1076_v40, %v1542_v11  ;;  %v701_v46 = vadd.f32 %v1131_v37, %v613_v39 }
 0x126   :  { %v1077_v47 = vpop.f32.mrb[24].mxu0  ;;  %v704_v48 = vadd.f32 %v1134_v44, %v616_v45 }
 0x127   :  { %v1078_v49 = vpop.f32.mrb[25].mxu0  ;;  %v1135_v50 = vpop.f32.mrb[24].mxu1 }
 0x128   :  { %v1079_v51 = vadd.f32 %v1078_v49, %v1077_v47  ;;  %v1080_v52 = vpop.f32.mrb[26].mxu0  ;;  %v1136_v53 = vpop.f32.mrb[25].mxu1 }
 0x129   :  { %v1081_v54 = vpop.f32.mrb[27].mxu0  ;;  %v1137_v55 = vadd.f32 %v1136_v53, %v1135_v50  ;;  %v1138_v56 = vpop.f32.mrb[26].mxu1 }
 0x12a   :  { %v621_v58 = vadd.f32 %v1079_v51, %v1542_v11  ;;  %v1139_v60 = vpop.f32.mrb[27].mxu1 }
 0x12c   :  { %v709_v61 = vadd.f32 %v1137_v55, %v621_v58 }
 0x12e   :  { %v748_v62 = vpop.f32.mrb[28].mxu0 }
 0x12f   :  { %v749_v63 = vadd.f32 %v748_v62, %v1546_v25  ;;  %v780_v0 = vpop.f32.mrb[28].mxu1  ;;  %v1162_v1 = vpop.f32.mrb[29].mxu0 }
 0x130   :  { %v781_v2 = vadd.f32 %v780_v0, %v693_v28  ;;  %v1178_v3 = vpop.f32.mrb[29].mxu1  ;;  %v751_v4 = vpop.f32.mrb[30].mxu0 }
 0x131   :  { %v752_v5 = vadd.f32 %v751_v4, %v1548_v27  ;;  %v783_v6 = vpop.f32.mrb[30].mxu1  ;;  %v1163_v7 = vpop.f32.mrb[31].mxu0  ;;  %v802_v13 = vmax.f32 %v749_v63, 0.0 }
 0x132   :  { %v784_v8 = vadd.f32 %v783_v6, %v696_v30  ;;  %v1179_v10 = vpop.f32.mrb[31].mxu1  ;;  %v810_v15 = vmax.f32 %v781_v2, 0.0 }
 0x133   :  { %v803_v14 = vmax.f32 %v752_v5, 0.0 }
 0x134   :  { %v811_v11 = vmax.f32 %v784_v8, 0.0 }
 0x135   :  { %v993_v16 = vpack.c.bf16 %v803_v14, %v802_v13 }
 0x136   :  { %v1013_v17 = vpack.c.bf16 %v811_v11, %v810_v15  ;;  %v756_v18 = vpop.f32.mrb[32].mxu0 }
 0x137   :  { %994 = vst [vmem:[%s1605_s3] sm:$0xff] %v993_v16   ;;  %v757_v25 = vadd.f32 %v756_v18, %v1552_v41  ;;  %v788_v19 = vpop.f32.mrb[32].mxu1  ;;  %v1166_v20 = vpop.f32.mrb[33].mxu0 }
 0x138   :  { %1023 = vst [vmem:[%s1605_s3 + $0x20] sm:$0xff] %v1013_v17   ;;  %v789_v27 = vadd.f32 %v788_v19, %v701_v46  ;;  %v1182_v21 = vpop.f32.mrb[33].mxu1  ;;  %v759_v22 = vpop.f32.mrb[34].mxu0 }
 0x139   :  { %v760_v23 = vadd.f32 %v759_v22, %v1554_v43  ;;  %v791_v24 = vpop.f32.mrb[34].mxu1  ;;  %v1167_v26 = vpop.f32.mrb[35].mxu0  ;;  %v804_v30 = vmax.f32 %v757_v25, 0.0 }
 0x13a   :  { %v792_v28 = vadd.f32 %v791_v24, %v704_v48  ;;  %v1183_v29 = vpop.f32.mrb[35].mxu1  ;;  %v812_v32 = vmax.f32 %v789_v27, 0.0 }
 0x13b   :  { %v805_v31 = vmax.f32 %v760_v23, 0.0 }
 0x13c   :  { %v813_v33 = vmax.f32 %v792_v28, 0.0 }
 0x13d   :  { %v998_v41 = vpack.c.bf16 %v805_v31, %v804_v30 }
 0x13e   :  { %v1018_v34 = vpack.c.bf16 %v813_v33, %v812_v32  ;;  %v764_v35 = vpop.f32.mrb[36].mxu0 }
 0x13f   :  { %1020 = vst [vmem:[%s1605_s3 + $0x8] sm:$0xff] %v998_v41   ;;  %v765_v36 = vadd.f32 %v764_v35, %v1558_v57  ;;  %v796_v37 = vpop.f32.mrb[36].mxu1  ;;  %v1170_v38 = vpop.f32.mrb[37].mxu0 }
 0x140   :  { %1024 = vst [vmem:[%s1605_s3 + $0x28] sm:$0xff] %v1018_v34   ;;  %v797_v43 = vadd.f32 %v796_v37, %v709_v61  ;;  %v767_v39 = vpop.f32.mrb[38].mxu0  ;;  %v1186_v40 = vpop.f32.mrb[37].mxu1 }
 0x141   :  { %v768_v42 = vadd.f32 %v767_v39, %v1560_v59  ;;  %v1171_v44 = vpop.f32.mrb[39].mxu0  ;;  %v799_v45 = vpop.f32.mrb[38].mxu1  ;;  %v806_v48 = vmax.f32 %v765_v36, 0.0 }
 0x142   :  { %v814_v46 = vmax.f32 %v797_v43, 0.0  ;;  %v1187_v47 = vpop.f32.mrb[39].mxu1 }
 0x143   :  { %v807_v49 = vmax.f32 %v768_v42, 0.0 }
 0x144   :  { %v989_v50 = vpack.c.bf16 %v814_v46, %v814_v46 }
 0x145   :  { %v1003_v51 = vpack.c.bf16 %v807_v49, %v806_v48 }
 0x146   :  { %880 = vst [vmem:[%s1605_s3 + $0x30] sm:$0x1] %v989_v50  ;;  %v772_v57 = vpop.f32.mrb[40].mxu0 }
 0x147   :  { %1021 = vst [vmem:[%s1605_s3 + $0x10] sm:$0xff] %v1003_v51   ;;  %v773_v52 = vadd.f32 %v772_v57, %v1564_v9  ;;  %v1174_v59 = vpop.f32.mrb[41].mxu0 }
 0x148   :  { %v775_v53 = vpop.f32.mrb[42].mxu0 }
 0x149   :  { %v776_v54 = vadd.f32 %v775_v53, %v1566_v12  ;;  %v1175_v55 = vpop.f32.mrb[43].mxu0  ;;  %v808_v56 = vmax.f32 %v773_v52, 0.0 }
 0x14b   :  { %v809_v58 = vmax.f32 %v776_v54, 0.0 }
 0x14d   :  { %v1008_v60 = vpack.c.bf16 %v809_v58, %v808_v56 }
 0x14f   :  { %1022 = vst [vmem:[%s1605_s3 + $0x18] sm:$0xff] %v1008_v60  }

// kernel: cnn_value_forward.7
= control target key start
LH: loop header
LB: loop body
LE: loop exit
PB: predicated region body
PF: predicated region fallthrough
CT: control target
= control target key end

     0   :  { %v811_v36 = vlaneseq  ;;  %v8545_v37 = vmov 1966171168   ;;  %vm4940_vm0 = vcmask 523264   ;;  %s11177_s1 = inlined_call_operand.vmem [shape: bf16[3136,512], index: 1, kind: input, shape index: {}]   ;;  %s11178_s0 = inlined_call_operand.vmem [shape: bf16[2,3136], index: 0, kind: input, shape index: {}]   ;;  %s11179_s3 = inlined_call_operand.vmem [shape: bf16[512,128], index: 3, kind: input, shape index: {}]   ;;  %s11180_s2 = inlined_call_operand.vmem [shape: f32[1,512], index: 2, kind: input, shape index: {}]   ;;  %s11181_s4 = inlined_call_operand.vmem [shape: f32[1,128], index: 4, kind: input, shape index: {}]   ;;  %s11182_s5 = inlined_call_operand.vmem [shape: f32[2,128], index: 5, kind: output, shape index: {}]  }
   0x1   :  { %v7332_v0 = vld [vmem:[%s11177_s1 + $0x4] ss:$16 sps:$4 sm:$0xff]   ;;  %v7334_v1 = vld [vmem:[%s11177_s1 + $0xc] ss:$16 sps:$4 sm:$0xff]   ;;  %v7336_v2 = vld [vmem:[%s11177_s1] ss:$16 sps:$4 sm:$0xff]   ;;  %v837_v38 = vunpack.c.l.s4 %v8545_v37 }
   0x2   :  { %4944 = vmatprep.subr.bf16.mxu0 %v7332_v0  ;;  %v7337_v3 = vld [vmem:[%s11177_s1 + $0x8] ss:$16 sps:$4 sm:$0xff]   ;;  %5477 = vmatprep.subr.bf16.mxu1 %v7334_v1  ;;  %v7338_v4 = vld [vmem:[%s11177_s1 + $0x24] ss:$16 sps:$4 sm:$0xff]   ;;  %v7340_v5 = vld [vmem:[%s11177_s1 + $0x2c] ss:$16 sps:$4 sm:$0xff]  }
   0x3   :  { %4945 = vmatpush1.bf16.msra.mxu0 %v7336_v2  ;;  %5478 = vmatpush1.bf16.msra.mxu1 %v7337_v3  ;;  %v7342_v6 = vld [vmem:[%s11177_s1 + $0x20] ss:$16 sps:$4 sm:$0xff]   ;;  %v7343_v7 = vld [vmem:[%s11177_s1 + $0x28] ss:$16 sps:$4 sm:$0xff]   ;;  %v7344_v8 = vld [vmem:[%s11177_s1 + $0x44] ss:$16 sps:$4 sm:$0xff]   ;;  %v838_v43 = vunpack.c.0.s8 %v837_v38 }
   0x4   :  { %4946 = vmatprep.subr.bf16.mxu0 %v7338_v4  ;;  %5479 = vmatprep.subr.bf16.mxu1 %v7340_v5  ;;  %v7346_v9 = vld [vmem:[%s11177_s1 + $0x4c] ss:$16 sps:$4 sm:$0xff]   ;;  %v7348_v10 = vld [vmem:[%s11177_s1 + $0x40] ss:$16 sps:$4 sm:$0xff]   ;;  %v7349_v11 = vld [vmem:[%s11177_s1 + $0x48] ss:$16 sps:$4 sm:$0xff]  }
   0x5   :  { %v7350_v12 = vld [vmem:[%s11177_s1 + $0x64] ss:$16 sps:$4 sm:$0xff]   ;;  %v7352_v13 = vld [vmem:[%s11177_s1 + $0x6c] ss:$16 sps:$4 sm:$0xff]   ;;  %v7354_v14 = vld [vmem:[%s11177_s1 + $0x60] ss:$16 sps:$4 sm:$0xff]  }
   0x6   :  { %v7355_v15 = vld [vmem:[%s11177_s1 + $0x68] ss:$16 sps:$4 sm:$0xff]   ;;  %v7356_v16 = vld [vmem:[%s11177_s1 + $0x84] ss:$16 sps:$4 sm:$0xff]   ;;  %v7358_v17 = vld [vmem:[%s11177_s1 + $0x8c] ss:$16 sps:$4 sm:$0xff]  }
   0x7   :  { %4947 = vmatpush1.bf16.msra.mxu0 %v7342_v6  ;;  %5480 = vmatpush1.bf16.msra.mxu1 %v7343_v7  ;;  %v7360_v18 = vld [vmem:[%s11177_s1 + $0x80] ss:$16 sps:$4 sm:$0xff]   ;;  %v7361_v19 = vld [vmem:[%s11177_s1 + $0x88] ss:$16 sps:$4 sm:$0xff]   ;;  %v7362_v20 = vld [vmem:[%s11177_s1 + $0xa4] ss:$16 sps:$4 sm:$0xff]  }
   0x8   :  { %4948 = vmatprep.subr.bf16.mxu0 %v7344_v8  ;;  %5481 = vmatprep.subr.bf16.mxu1 %v7346_v9  ;;  %v7364_v21 = vld [vmem:[%s11177_s1 + $0xac] ss:$16 sps:$4 sm:$0xff]   ;;  %v7366_v22 = vld [vmem:[%s11177_s1 + $0xa0] ss:$16 sps:$4 sm:$0xff]   ;;  %v7367_v23 = vld [vmem:[%s11177_s1 + $0xa8] ss:$16 sps:$4 sm:$0xff]  }
   0x9   :  { %v7368_v24 = vld [vmem:[%s11177_s1 + $0xc4] ss:$16 sps:$4 sm:$0xff]   ;;  %v7370_v25 = vld [vmem:[%s11177_s1 + $0xcc] ss:$16 sps:$4 sm:$0xff]   ;;  %v7372_v26 = vld [vmem:[%s11177_s1 + $0xc0] ss:$16 sps:$4 sm:$0xff]  }
   0xa   :  { %v7373_v27 = vld [vmem:[%s11177_s1 + $0xc8] ss:$16 sps:$4 sm:$0xff]   ;;  %v7374_v28 = vld [vmem:[%s11177_s1 + $0xe4] ss:$16 sps:$4 sm:$0xff]   ;;  %v7376_v29 = vld [vmem:[%s11177_s1 + $0xec] ss:$16 sps:$4 sm:$0xff]  }
   0xb   :  { %4949 = vmatpush1.bf16.msra.mxu0 %v7348_v10  ;;  %5482 = vmatpush1.bf16.msra.mxu1 %v7349_v11  ;;  %v7378_v30 = vld [vmem:[%s11177_s1 + $0xe0] ss:$16 sps:$4 sm:$0xff]   ;;  %v7379_v31 = vld [vmem:[%s11177_s1 + $0xe8] ss:$16 sps:$4 sm:$0xff]   ;;  %v7380_v32 = vld [vmem:[%s11177_s1 + $0x104] ss:$16 sps:$4 sm:$0xff]  }
   0xc   :  { %4950 = vmatprep.subr.bf16.mxu0 %v7350_v12  ;;  %5483 = vmatprep.subr.bf16.mxu1 %v7352_v13  ;;  %v7382_v33 = vld [vmem:[%s11177_s1 + $0x10c] ss:$16 sps:$4 sm:$0xff]   ;;  %v7384_v34 = vld [vmem:[%s11177_s1 + $0x100] ss:$16 sps:$4 sm:$0xff]   ;;  %v7385_v35 = vld [vmem:[%s11177_s1 + $0x108] ss:$16 sps:$4 sm:$0xff]  }
   0xd   :  { %v7386_v39 = vld [vmem:[%s11177_s1 + $0x124] ss:$16 sps:$4 sm:$0xff]   ;;  %v7388_v40 = vld [vmem:[%s11177_s1 + $0x12c] ss:$16 sps:$4 sm:$0xff]   ;;  %v7390_v41 = vld [vmem:[%s11177_s1 + $0x120] ss:$16 sps:$4 sm:$0xff]  }
   0xe   :  { %v8694_v42 = vshrl.u32 %v811_v36, 7  ;;  %v7391_v44 = vld [vmem:[%s11177_s1 + $0x128] ss:$16 sps:$4 sm:$0xff]   ;;  %v7392_v45 = vld [vmem:[%s11177_s1 + $0x144] ss:$16 sps:$4 sm:$0xff]  }
   0xf   :  { %4951 = vmatpush1.bf16.msra.mxu0 %v7354_v14  ;;  %5484 = vmatpush1.bf16.msra.mxu1 %v7355_v15  ;;  %v7394_v46 = vld [vmem:[%s11177_s1 + $0x14c] ss:$16 sps:$4 sm:$0xff]   ;;  %v7396_v47 = vld [vmem:[%s11177_s1 + $0x140] ss:$16 sps:$4 sm:$0xff]   ;;  %v7397_v48 = vld [vmem:[%s11177_s1 + $0x148] ss:$16 sps:$4 sm:$0xff]  }
  0x10   :  { %4952 = vmatprep.subr.bf16.mxu0 %v7356_v16  ;;  %5485 = vmatprep.subr.bf16.mxu1 %v7358_v17  ;;  %v8712_v49 = vsub.s32 %v838_v43, %v8694_v42  ;;  %v7398_v50 = vld [vmem:[%s11177_s1 + $0x164] ss:$16 sps:$4 sm:$0xff]   ;;  %v7400_v51 = vld [vmem:[%s11177_s1 + $0x16c] ss:$16 sps:$4 sm:$0xff]   ;;  %v7402_v53 = vld [vmem:[%s11177_s1 + $0x160] ss:$16 sps:$4 sm:$0xff]  }
  0x11   :  { %v8723_v52 = vld [vmem:[%s11178_s0] sm:$0xff]  ;;  %v7403_v55 = vld [vmem:[%s11177_s1 + $0x168] ss:$16 sps:$4 sm:$0xff]   ;;  %v7406_v57 = vld [vmem:[%s11177_s1 + $0x18c] ss:$16 sps:$4 sm:$0xff]  }
  0x12   :  { %v842_v54 = vrot.slane %v8723_v52, %v8712_v49  ;;  %v7404_v56 = vld [vmem:[%s11177_s1 + $0x184] ss:$16 sps:$4 sm:$0xff]   ;;  %v7408_v59 = vld [vmem:[%s11177_s1 + $0x180] ss:$16 sps:$4 sm:$0xff]   ;;  %v7409_v61 = vld [vmem:[%s11177_s1 + $0x188] ss:$16 sps:$4 sm:$0xff]  }
  0x13   :  { %4953 = vmatpush1.bf16.msra.mxu0 %v7360_v18  ;;  %5486 = vmatpush1.bf16.msra.mxu1 %v7361_v19  ;;  %v7410_v62 = vld [vmem:[%s11177_s1 + $0x1a4] ss:$16 sps:$4 sm:$0xff]   ;;  %v7412_v63 = vld [vmem:[%s11177_s1 + $0x1ac] ss:$16 sps:$4 sm:$0xff]   ;;  %v7414_v0 = vld [vmem:[%s11177_s1 + $0x1a0] ss:$16 sps:$4 sm:$0xff]  }
  0x14   :  { %4954 = vmatprep.subr.bf16.mxu0 %v7362_v20  ;;  %5487 = vmatprep.subr.bf16.mxu1 %v7364_v21  ;;  %v850_v58 = vcombine.high %v842_v54, %v842_v54  ;;  %v7415_v1 = vld [vmem:[%s11177_s1 + $0x1a8] ss:$16 sps:$4 sm:$0xff]   ;;  %v7416_v2 = vld [vmem:[%s11177_s1 + $0x1c4] ss:$16 sps:$4 sm:$0xff]   ;;  %v7418_v3 = vld [vmem:[%s11177_s1 + $0x1cc] ss:$16 sps:$4 sm:$0xff]   ;;  %v8792_v13 = vrot.slane %v842_v54, %v8712_v49 }
  0x15   :  { %v7420_v4 = vld [vmem:[%s11177_s1 + $0x1c0] ss:$16 sps:$4 sm:$0xff]   ;;  %v7421_v5 = vld [vmem:[%s11177_s1 + $0x1c8] ss:$16 sps:$4 sm:$0xff]   ;;  %v7422_v6 = vld [vmem:[%s11177_s1 + $0x1e4] ss:$16 sps:$4 sm:$0xff]  }
  0x16   :  { %v872_v60 = vrot.slane %v850_v58, %v8712_v49  ;;  %v7424_v7 = vld [vmem:[%s11177_s1 + $0x1ec] ss:$16 sps:$4 sm:$0xff]   ;;  %v7426_v8 = vld [vmem:[%s11177_s1 + $0x1e0] ss:$16 sps:$4 sm:$0xff]   ;;  %v7427_v9 = vld [vmem:[%s11177_s1 + $0x1e8] ss:$16 sps:$4 sm:$0xff]  }
  0x17   :  { %4955 = vmatpush1.bf16.msra.mxu0 %v7366_v22  ;;  %5488 = vmatpush1.bf16.msra.mxu1 %v7367_v23  ;;  %v7430_v10 = vld [vmem:[%s11177_s1 + $0x204] ss:$16 sps:$4 sm:$0xff]   ;;  %v7433_v11 = vld [vmem:[%s11177_s1 + $0x20c] ss:$16 sps:$4 sm:$0xff]   ;;  %v7428_v12 = vld [vmem:[%s11177_s1 + $0x200] ss:$16 sps:$4 sm:$0xff]  }
  0x18   :  { %4956 = vmatprep.subr.bf16.mxu0 %v7368_v24  ;;  %5489 = vmatprep.subr.bf16.mxu1 %v7370_v25  ;;  %v7431_v14 = vld [vmem:[%s11177_s1 + $0x208] ss:$16 sps:$4 sm:$0xff]   ;;  %v7436_v15 = vld [vmem:[%s11177_s1 + $0x224] ss:$16 sps:$4 sm:$0xff]   ;;  %v7439_v16 = vld [vmem:[%s11177_s1 + $0x22c] ss:$16 sps:$4 sm:$0xff]   ;;  %v882_v17 = vcombine.high %v872_v60, %v872_v60 }
  0x19   :  { %4976 = vmatprep.mubr.bf16.mxu0 %v872_v60  ;;  %5509 = vmatprep.mubr.bf16.mxu1 %v872_v60  ;;  %v7434_v18 = vld [vmem:[%s11177_s1 + $0x220] ss:$16 sps:$4 sm:$0xff]   ;;  %v7437_v19 = vld [vmem:[%s11177_s1 + $0x228] ss:$16 sps:$4 sm:$0xff]   ;;  %v7442_v20 = vld [vmem:[%s11177_s1 + $0x244] ss:$16 sps:$4 sm:$0xff]  }
  0x1a   :  { %v7445_v21 = vld [vmem:[%s11177_s1 + $0x24c] ss:$16 sps:$4 sm:$0xff]   ;;  %v7440_v22 = vld [vmem:[%s11177_s1 + $0x240] ss:$16 sps:$4 sm:$0xff]   ;;  %v7443_v23 = vld [vmem:[%s11177_s1 + $0x248] ss:$16 sps:$4 sm:$0xff]  }
  0x1b   :  { %4957 = vmatpush1.bf16.msra.mxu0 %v7372_v26  ;;  %5490 = vmatpush1.bf16.msra.mxu1 %v7373_v27  ;;  %v7448_v24 = vld [vmem:[%s11177_s1 + $0x264] ss:$16 sps:$4 sm:$0xff]   ;;  %v7451_v25 = vld [vmem:[%s11177_s1 + $0x26c] ss:$16 sps:$4 sm:$0xff]   ;;  %v7446_v26 = vld [vmem:[%s11177_s1 + $0x260] ss:$16 sps:$4 sm:$0xff]  }
  0x1c   :  { %4958 = vmatprep.subr.bf16.mxu0 %v7374_v28  ;;  %5491 = vmatprep.subr.bf16.mxu1 %v7376_v29  ;;  %v7449_v27 = vld [vmem:[%s11177_s1 + $0x268] ss:$16 sps:$4 sm:$0xff]   ;;  %v7454_v28 = vld [vmem:[%s11177_s1 + $0x284] ss:$16 sps:$4 sm:$0xff]   ;;  %v7457_v29 = vld [vmem:[%s11177_s1 + $0x28c] ss:$16 sps:$4 sm:$0xff]  }
  0x1d   :  { %v7466_v36 = vld [vmem:[%s11177_s1 + $0x2c4] ss:$16 sps:$4 sm:$0xff]   ;;  %v7469_v37 = vld [vmem:[%s11177_s1 + $0x2cc] ss:$16 sps:$4 sm:$0xff]   ;;  %v7464_v38 = vld [vmem:[%s11177_s1 + $0x2c0] ss:$16 sps:$4 sm:$0xff]  }
  0x1e   :  { %v7470_v43 = vld [vmem:[%s11177_s1 + $0x2e0] ss:$16 sps:$4 sm:$0xff]   ;;  %v7485_v54 = vld [vmem:[%s11177_s1 + $0x328] ss:$16 sps:$4 sm:$0xff]   ;;  %v7499_v60 = vld [vmem:[%s11177_s1 + $0x36c] ss:$16 sps:$4 sm:$0xff]  }
  0x1f   :  { %4959 = vmatpush1.bf16.msra.mxu0 %v7378_v30  ;;  %5492 = vmatpush1.bf16.msra.mxu1 %v7379_v31  ;;  %v7452_v30 = vld [vmem:[%s11177_s1 + $0x280] ss:$16 sps:$4 sm:$0xff]   ;;  %v7455_v31 = vld [vmem:[%s11177_s1 + $0x288] ss:$16 sps:$4 sm:$0xff]  }
  0x20   :  { %4960 = vmatprep.subr.bf16.mxu0 %v7380_v32  ;;  %5493 = vmatprep.subr.bf16.mxu1 %v7382_v33  ;;  %v7460_v32 = vld [vmem:[%s11177_s1 + $0x2a4] ss:$16 sps:$4 sm:$0xff]   ;;  %v7463_v33 = vld [vmem:[%s11177_s1 + $0x2ac] ss:$16 sps:$4 sm:$0xff]   ;;  %v7491_v58 = vld [vmem:[%s11177_s1 + $0x348] ss:$16 sps:$4 sm:$0xff]  }
  0x23   :  { %4961 = vmatpush1.bf16.msra.mxu0 %v7384_v34  ;;  %5494 = vmatpush1.bf16.msra.mxu1 %v7385_v35  ;;  %v7458_v34 = vld [vmem:[%s11177_s1 + $0x2a0] ss:$16 sps:$4 sm:$0xff]   ;;  %v7461_v35 = vld [vmem:[%s11177_s1 + $0x2a8] ss:$16 sps:$4 sm:$0xff]  }
  0x24   :  { %4962 = vmatprep.subr.bf16.mxu0 %v7386_v39  ;;  %5495 = vmatprep.subr.bf16.mxu1 %v7388_v40  ;;  %v7467_v39 = vld [vmem:[%s11177_s1 + $0x2c8] ss:$16 sps:$4 sm:$0xff]   ;;  %v7472_v40 = vld [vmem:[%s11177_s1 + $0x2e4] ss:$16 sps:$4 sm:$0xff]  }
  0x27   :  { %4963 = vmatpush1.bf16.msra.mxu0 %v7390_v41  ;;  %5496 = vmatpush1.bf16.msra.mxu1 %v7391_v44  ;;  %v7475_v41 = vld [vmem:[%s11177_s1 + $0x2ec] ss:$16 sps:$4 sm:$0xff]   ;;  %v7473_v44 = vld [vmem:[%s11177_s1 + $0x2e8] ss:$16 sps:$4 sm:$0xff]  }
  0x28   :  { %4964 = vmatprep.subr.bf16.mxu0 %v7392_v45  ;;  %5497 = vmatprep.subr.bf16.mxu1 %v7394_v46  ;;  %v7478_v45 = vld [vmem:[%s11177_s1 + $0x304] ss:$16 sps:$4 sm:$0xff]   ;;  %v7481_v46 = vld [vmem:[%s11177_s1 + $0x30c] ss:$16 sps:$4 sm:$0xff]  }
  0x2b   :  { %4965 = vmatpush1.bf16.msra.mxu0 %v7396_v47  ;;  %5498 = vmatpush1.bf16.msra.mxu1 %v7397_v48  ;;  %v7476_v47 = vld [vmem:[%s11177_s1 + $0x300] ss:$16 sps:$4 sm:$0xff]   ;;  %v7479_v48 = vld [vmem:[%s11177_s1 + $0x308] ss:$16 sps:$4 sm:$0xff]  }
  0x2c   :  { %4966 = vmatprep.subr.bf16.mxu0 %v7398_v50  ;;  %5499 = vmatprep.subr.bf16.mxu1 %v7400_v51  ;;  %v7484_v50 = vld [vmem:[%s11177_s1 + $0x324] ss:$16 sps:$4 sm:$0xff]   ;;  %v7487_v51 = vld [vmem:[%s11177_s1 + $0x32c] ss:$16 sps:$4 sm:$0xff]  }
  0x2f   :  { %4967 = vmatpush1.bf16.msra.mxu0 %v7402_v53  ;;  %5500 = vmatpush1.bf16.msra.mxu1 %v7403_v55  ;;  %v7482_v53 = vld [vmem:[%s11177_s1 + $0x320] ss:$16 sps:$4 sm:$0xff]   ;;  %v7490_v55 = vld [vmem:[%s11177_s1 + $0x344] ss:$16 sps:$4 sm:$0xff]  }
  0x30   :  { %4968 = vmatprep.subr.bf16.mxu0 %v7404_v56  ;;  %5501 = vmatprep.subr.bf16.mxu1 %v7406_v57  ;;  %v7493_v56 = vld [vmem:[%s11177_s1 + $0x34c] ss:$16 sps:$4 sm:$0xff]   ;;  %v7488_v57 = vld [vmem:[%s11177_s1 + $0x340] ss:$16 sps:$4 sm:$0xff]  }
  0x33   :  { %4969 = vmatpush1.bf16.msra.mxu0 %v7408_v59  ;;  %5502 = vmatpush1.bf16.msra.mxu1 %v7409_v61  ;;  %v7496_v59 = vld [vmem:[%s11177_s1 + $0x364] ss:$16 sps:$4 sm:$0xff]   ;;  %v7494_v61 = vld [vmem:[%s11177_s1 + $0x360] ss:$16 sps:$4 sm:$0xff]  }
  0x34   :  { %4970 = vmatprep.subr.bf16.mxu0 %v7410_v62  ;;  %5503 = vmatprep.subr.bf16.mxu1 %v7412_v63  ;;  %v7497_v62 = vld [vmem:[%s11177_s1 + $0x368] ss:$16 sps:$4 sm:$0xff]   ;;  %v7502_v63 = vld [vmem:[%s11177_s1 + $0x384] ss:$16 sps:$4 sm:$0xff]  }
  0x37   :  { %4971 = vmatpush1.bf16.msra.mxu0 %v7414_v0  ;;  %5504 = vmatpush1.bf16.msra.mxu1 %v7415_v1  ;;  %v7505_v0 = vld [vmem:[%s11177_s1 + $0x38c] ss:$16 sps:$4 sm:$0xff]   ;;  %v7500_v1 = vld [vmem:[%s11177_s1 + $0x380] ss:$16 sps:$4 sm:$0xff]  }
  0x38   :  { %4972 = vmatprep.subr.bf16.mxu0 %v7416_v2  ;;  %5505 = vmatprep.subr.bf16.mxu1 %v7418_v3  ;;  %v7503_v2 = vld [vmem:[%s11177_s1 + $0x388] ss:$16 sps:$4 sm:$0xff]   ;;  %v7508_v3 = vld [vmem:[%s11177_s1 + $0x3a4] ss:$16 sps:$4 sm:$0xff]  }
  0x3b   :  { %4973 = vmatpush1.bf16.msra.mxu0 %v7420_v4  ;;  %5506 = vmatpush1.bf16.msra.mxu1 %v7421_v5  ;;  %v7511_v4 = vld [vmem:[%s11177_s1 + $0x3ac] ss:$16 sps:$4 sm:$0xff]   ;;  %v7506_v5 = vld [vmem:[%s11177_s1 + $0x3a0] ss:$16 sps:$4 sm:$0xff]  }
  0x3c   :  { %4974 = vmatprep.subr.bf16.mxu0 %v7422_v6  ;;  %5507 = vmatprep.subr.bf16.mxu1 %v7424_v7  ;;  %v7509_v6 = vld [vmem:[%s11177_s1 + $0x3a8] ss:$16 sps:$4 sm:$0xff]   ;;  %v7514_v7 = vld [vmem:[%s11177_s1 + $0x3c4] ss:$16 sps:$4 sm:$0xff]  }
  0x3f   :  { %4975 = vmatpush1.bf16.msra.mxu0 %v7426_v8  ;;  %5508 = vmatpush1.bf16.msra.mxu1 %v7427_v9  ;;  %v7517_v8 = vld [vmem:[%s11177_s1 + $0x3cc] ss:$16 sps:$4 sm:$0xff]   ;;  %v835_v9 = vcombine.high %v8723_v52, %v8723_v52 }
  0x40   :  { %4985 = vmatprep.subr.bf16.mxu0 %v7430_v10  ;;  %5518 = vmatprep.subr.bf16.mxu1 %v7433_v11  ;;  %v7512_v10 = vld [vmem:[%s11177_s1 + $0x3c0] ss:$16 sps:$4 sm:$0xff]   ;;  %v7515_v11 = vld [vmem:[%s11177_s1 + $0x3c8] ss:$16 sps:$4 sm:$0xff]   ;;  %v7523_v52 = vld [vmem:[%s11177_s1 + $0x3ec] ss:$16 sps:$4 sm:$0xff]  }
  0x42   :  { %4977 = vmatmul.mubr.bf16.vlgmr.msra.gmra.mrb[0].mxu0 %v8792_v13  ;;  %5510 = vmatmul.mubr.bf16.vlgmr.msra.gmra.mrb[0].mxu1 %v8792_v13 }
  0x43   :  { %4986 = vmatpush1.bf16.msra.mxu0 %v7428_v12  ;;  %5519 = vmatpush1.bf16.msra.mxu1 %v7431_v14  ;;  %v7520_v12 = vld [vmem:[%s11177_s1 + $0x3e4] ss:$16 sps:$4 sm:$0xff]   ;;  %v8976_v14 = vrot.slane %v835_v9, %v8712_v49  ;;  %v7599_v9 = vld [vmem:[%s11177_s1 + $0x588] ss:$16 sps:$4 sm:$0xff]  }
  0x44   :  { %4987 = vmatprep.subr.bf16.mxu0 %v7436_v15  ;;  %5520 = vmatprep.subr.bf16.mxu1 %v7439_v16  ;;  %v7518_v15 = vld [vmem:[%s11177_s1 + $0x3e0] ss:$16 sps:$4 sm:$0xff]   ;;  %v7521_v16 = vld [vmem:[%s11177_s1 + $0x3e8] ss:$16 sps:$4 sm:$0xff]  }
  0x45   :  { %5017 = vmatprep.mubr.bf16.mxu0 %v882_v17  ;;  %5550 = vmatprep.mubr.bf16.mxu1 %v882_v17  ;;  %v7526_v17 = vld [vmem:[%s11177_s1 + $0x404] ss:$16 sps:$4 sm:$0xff]  }
  0x47   :  { %4988 = vmatpush1.bf16.msra.mxu0 %v7434_v18  ;;  %5521 = vmatpush1.bf16.msra.mxu1 %v7437_v19  ;;  %v7529_v18 = vld [vmem:[%s11177_s1 + $0x40c] ss:$16 sps:$4 sm:$0xff]   ;;  %v851_v19 = vcombine.high %v8976_v14, %v8976_v14 }
  0x48   :  { %4989 = vmatprep.subr.bf16.mxu0 %v7442_v20  ;;  %5522 = vmatprep.subr.bf16.mxu1 %v7445_v21  ;;  %v7524_v20 = vld [vmem:[%s11177_s1 + $0x400] ss:$16 sps:$4 sm:$0xff]   ;;  %v880_v21 = vcombine.high %v8792_v13, %v8792_v13 }
  0x49   :  { %v7530_v13 = vld [vmem:[%s11177_s1 + $0x420] ss:$16 sps:$4 sm:$0xff]  }
  0x4b   :  { %4990 = vmatpush1.bf16.msra.mxu0 %v7440_v22  ;;  %5523 = vmatpush1.bf16.msra.mxu1 %v7443_v23  ;;  %v7527_v22 = vld [vmem:[%s11177_s1 + $0x408] ss:$16 sps:$4 sm:$0xff]   ;;  %v7532_v23 = vld [vmem:[%s11177_s1 + $0x424] ss:$16 sps:$4 sm:$0xff]  }
  0x4c   :  { %4991 = vmatprep.subr.bf16.mxu0 %v7448_v24  ;;  %5524 = vmatprep.subr.bf16.mxu1 %v7451_v25  ;;  %v7535_v24 = vld [vmem:[%s11177_s1 + $0x42c] ss:$16 sps:$4 sm:$0xff]   ;;  %v9007_v25 = vrot.slane %v851_v19, %v8712_v49  ;;  %v7616_v19 = vld [vmem:[%s11177_s1 + $0x5e4] ss:$16 sps:$4 sm:$0xff]  }
  0x4f   :  { %4992 = vmatpush1.bf16.msra.mxu0 %v7446_v26  ;;  %5525 = vmatpush1.bf16.msra.mxu1 %v7449_v27  ;;  %v7533_v26 = vld [vmem:[%s11177_s1 + $0x428] ss:$16 sps:$4 sm:$0xff]   ;;  %v7538_v27 = vld [vmem:[%s11177_s1 + $0x444] ss:$16 sps:$4 sm:$0xff]  }
  0x50   :  { %4993 = vmatprep.subr.bf16.mxu0 %v7454_v28  ;;  %5526 = vmatprep.subr.bf16.mxu1 %v7457_v29  ;;  %v7541_v28 = vld [vmem:[%s11177_s1 + $0x44c] ss:$16 sps:$4 sm:$0xff]   ;;  %v7536_v29 = vld [vmem:[%s11177_s1 + $0x440] ss:$16 sps:$4 sm:$0xff]  }
  0x53   :  { %4994 = vmatpush1.bf16.msra.mxu0 %v7452_v30  ;;  %5527 = vmatpush1.bf16.msra.mxu1 %v7455_v31  ;;  %v7539_v30 = vld [vmem:[%s11177_s1 + $0x448] ss:$16 sps:$4 sm:$0xff]   ;;  %v7544_v31 = vld [vmem:[%s11177_s1 + $0x464] ss:$16 sps:$4 sm:$0xff]  }
  0x54   :  { %4995 = vmatprep.subr.bf16.mxu0 %v7460_v32  ;;  %5528 = vmatprep.subr.bf16.mxu1 %v7463_v33  ;;  %v7547_v32 = vld [vmem:[%s11177_s1 + $0x46c] ss:$16 sps:$4 sm:$0xff]   ;;  %v7542_v33 = vld [vmem:[%s11177_s1 + $0x460] ss:$16 sps:$4 sm:$0xff]  }
  0x57   :  { %4996 = vmatpush1.bf16.msra.mxu0 %v7458_v34  ;;  %5529 = vmatpush1.bf16.msra.mxu1 %v7461_v35  ;;  %v7545_v34 = vld [vmem:[%s11177_s1 + $0x468] ss:$16 sps:$4 sm:$0xff]   ;;  %v7550_v35 = vld [vmem:[%s11177_s1 + $0x484] ss:$16 sps:$4 sm:$0xff]  }
  0x58   :  { %4997 = vmatprep.subr.bf16.mxu0 %v7466_v36  ;;  %5530 = vmatprep.subr.bf16.mxu1 %v7469_v37  ;;  %v7553_v36 = vld [vmem:[%s11177_s1 + $0x48c] ss:$16 sps:$4 sm:$0xff]   ;;  %v7548_v37 = vld [vmem:[%s11177_s1 + $0x480] ss:$16 sps:$4 sm:$0xff]  }
  0x5b   :  { %4998 = vmatpush1.bf16.msra.mxu0 %v7464_v38  ;;  %5531 = vmatpush1.bf16.msra.mxu1 %v7467_v39  ;;  %v7551_v38 = vld [vmem:[%s11177_s1 + $0x488] ss:$16 sps:$4 sm:$0xff]   ;;  %v7556_v39 = vld [vmem:[%s11177_s1 + $0x4a4] ss:$16 sps:$4 sm:$0xff]  }
  0x5c   :  { %4999 = vmatprep.subr.bf16.mxu0 %v7472_v40  ;;  %5532 = vmatprep.subr.bf16.mxu1 %v7475_v41  ;;  %v7559_v40 = vld [vmem:[%s11177_s1 + $0x4ac] ss:$16 sps:$4 sm:$0xff]   ;;  %v7554_v41 = vld [vmem:[%s11177_s1 + $0x4a0] ss:$16 sps:$4 sm:$0xff]  }
  0x5f   :  { %5000 = vmatpush1.bf16.msra.mxu0 %v7470_v43  ;;  %5533 = vmatpush1.bf16.msra.mxu1 %v7473_v44  ;;  %v7557_v43 = vld [vmem:[%s11177_s1 + $0x4a8] ss:$16 sps:$4 sm:$0xff]   ;;  %v7562_v44 = vld [vmem:[%s11177_s1 + $0x4c4] ss:$16 sps:$4 sm:$0xff]  }
  0x60   :  { %5001 = vmatprep.subr.bf16.mxu0 %v7478_v45  ;;  %5534 = vmatprep.subr.bf16.mxu1 %v7481_v46  ;;  %v7565_v45 = vld [vmem:[%s11177_s1 + $0x4cc] ss:$16 sps:$4 sm:$0xff]   ;;  %v7560_v46 = vld [vmem:[%s11177_s1 + $0x4c0] ss:$16 sps:$4 sm:$0xff]  }
  0x63   :  { %5002 = vmatpush1.bf16.msra.mxu0 %v7476_v47  ;;  %5535 = vmatpush1.bf16.msra.mxu1 %v7479_v48  ;;  %v7563_v47 = vld [vmem:[%s11177_s1 + $0x4c8] ss:$16 sps:$4 sm:$0xff]   ;;  %v7568_v48 = vld [vmem:[%s11177_s1 + $0x4e4] ss:$16 sps:$4 sm:$0xff]  }
  0x64   :  { %5003 = vmatprep.subr.bf16.mxu0 %v7484_v50  ;;  %5536 = vmatprep.subr.bf16.mxu1 %v7487_v51  ;;  %v7571_v50 = vld [vmem:[%s11177_s1 + $0x4ec] ss:$16 sps:$4 sm:$0xff]   ;;  %v7566_v51 = vld [vmem:[%s11177_s1 + $0x4e0] ss:$16 sps:$4 sm:$0xff]  }
  0x67   :  { %5004 = vmatpush1.bf16.msra.mxu0 %v7482_v53  ;;  %5537 = vmatpush1.bf16.msra.mxu1 %v7485_v54  ;;  %v7569_v53 = vld [vmem:[%s11177_s1 + $0x4e8] ss:$16 sps:$4 sm:$0xff]   ;;  %v7574_v54 = vld [vmem:[%s11177_s1 + $0x504] ss:$16 sps:$4 sm:$0xff]  }
  0x68   :  { %5005 = vmatprep.subr.bf16.mxu0 %v7490_v55  ;;  %5538 = vmatprep.subr.bf16.mxu1 %v7493_v56  ;;  %v7577_v55 = vld [vmem:[%s11177_s1 + $0x50c] ss:$16 sps:$4 sm:$0xff]   ;;  %v7572_v56 = vld [vmem:[%s11177_s1 + $0x500] ss:$16 sps:$4 sm:$0xff]  }
  0x6b   :  { %5006 = vmatpush1.bf16.msra.mxu0 %v7488_v57  ;;  %5539 = vmatpush1.bf16.msra.mxu1 %v7491_v58  ;;  %v7575_v57 = vld [vmem:[%s11177_s1 + $0x508] ss:$16 sps:$4 sm:$0xff]   ;;  %v7580_v58 = vld [vmem:[%s11177_s1 + $0x524] ss:$16 sps:$4 sm:$0xff]  }
  0x6c   :  { %5007 = vmatprep.subr.bf16.mxu0 %v7496_v59  ;;  %5540 = vmatprep.subr.bf16.mxu1 %v7499_v60  ;;  %v7583_v59 = vld [vmem:[%s11177_s1 + $0x52c] ss:$16 sps:$4 sm:$0xff]   ;;  %v7578_v60 = vld [vmem:[%s11177_s1 + $0x520] ss:$16 sps:$4 sm:$0xff]  }
  0x6f   :  { %5008 = vmatpush1.bf16.msra.mxu0 %v7494_v61  ;;  %5541 = vmatpush1.bf16.msra.mxu1 %v7497_v62  ;;  %v7581_v61 = vld [vmem:[%s11177_s1 + $0x528] ss:$16 sps:$4 sm:$0xff]   ;;  %v7586_v62 = vld [vmem:[%s11177_s1 + $0x544] ss:$16 sps:$4 sm:$0xff]  }
  0x70   :  { %5009 = vmatprep.subr.bf16.mxu0 %v7502_v63  ;;  %5542 = vmatprep.subr.bf16.mxu1 %v7505_v0  ;;  %v7589_v63 = vld [vmem:[%s11177_s1 + $0x54c] ss:$16 sps:$4 sm:$0xff]   ;;  %v7584_v0 = vld [vmem:[%s11177_s1 + $0x540] ss:$16 sps:$4 sm:$0xff]  }
  0x73   :  { %5010 = vmatpush1.bf16.msra.mxu0 %v7500_v1  ;;  %5543 = vmatpush1.bf16.msra.mxu1 %v7503_v2  ;;  %v7587_v1 = vld [vmem:[%s11177_s1 + $0x548] ss:$16 sps:$4 sm:$0xff]   ;;  %v7592_v2 = vld [vmem:[%s11177_s1 + $0x564] ss:$16 sps:$4 sm:$0xff]  }
  0x74   :  { %5011 = vmatprep.subr.bf16.mxu0 %v7508_v3  ;;  %5544 = vmatprep.subr.bf16.mxu1 %v7511_v4  ;;  %v7595_v3 = vld [vmem:[%s11177_s1 + $0x56c] ss:$16 sps:$4 sm:$0xff]   ;;  %v7590_v4 = vld [vmem:[%s11177_s1 + $0x560] ss:$16 sps:$4 sm:$0xff]  }
  0x77   :  { %5012 = vmatpush1.bf16.msra.mxu0 %v7506_v5  ;;  %5545 = vmatpush1.bf16.msra.mxu1 %v7509_v6  ;;  %v7593_v5 = vld [vmem:[%s11177_s1 + $0x568] ss:$16 sps:$4 sm:$0xff]   ;;  %v7598_v6 = vld [vmem:[%s11177_s1 + $0x584] ss:$16 sps:$4 sm:$0xff]  }
  0x78   :  { %5013 = vmatprep.subr.bf16.mxu0 %v7514_v7  ;;  %5546 = vmatprep.subr.bf16.mxu1 %v7517_v8  ;;  %v7601_v7 = vld [vmem:[%s11177_s1 + $0x58c] ss:$16 sps:$4 sm:$0xff]   ;;  %v7596_v8 = vld [vmem:[%s11177_s1 + $0x580] ss:$16 sps:$4 sm:$0xff]  }
  0x7b   :  { %5014 = vmatpush1.bf16.msra.mxu0 %v7512_v10  ;;  %5547 = vmatpush1.bf16.msra.mxu1 %v7515_v11  ;;  %v7604_v10 = vld [vmem:[%s11177_s1 + $0x5a4] ss:$16 sps:$4 sm:$0xff]   ;;  %v7607_v11 = vld [vmem:[%s11177_s1 + $0x5ac] ss:$16 sps:$4 sm:$0xff]  }
  0x7c   :  { %5015 = vmatprep.subr.bf16.mxu0 %v7520_v12  ;;  %5548 = vmatprep.subr.bf16.mxu1 %v7523_v52  ;;  %v7602_v12 = vld [vmem:[%s11177_s1 + $0x5a0] ss:$16 sps:$4 sm:$0xff]   ;;  %v7605_v52 = vld [vmem:[%s11177_s1 + $0x5a8] ss:$16 sps:$4 sm:$0xff]  }
  0x7f   :  { %5016 = vmatpush1.bf16.msra.mxu0 %v7518_v15  ;;  %5549 = vmatpush1.bf16.msra.mxu1 %v7521_v16  ;;  %v7610_v15 = vld [vmem:[%s11177_s1 + $0x5c4] ss:$16 sps:$4 sm:$0xff]   ;;  %v7613_v16 = vld [vmem:[%s11177_s1 + $0x5cc] ss:$16 sps:$4 sm:$0xff]  }
  0x80   :  { %5026 = vmatprep.subr.bf16.mxu0 %v7526_v17  ;;  %5559 = vmatprep.subr.bf16.mxu1 %v7529_v18  ;;  %v7608_v17 = vld [vmem:[%s11177_s1 + $0x5c0] ss:$16 sps:$4 sm:$0xff]   ;;  %v7611_v18 = vld [vmem:[%s11177_s1 + $0x5c8] ss:$16 sps:$4 sm:$0xff]  }
  0x82   :  { %5018 = vmatmul.mubr.bf16.vlgmr.msra.gmra.mrb[0].mxu0 %v880_v21  ;;  %5551 = vmatmul.mubr.bf16.vlgmr.msra.gmra.mrb[0].mxu1 %v880_v21  ;;  %v7614_v21 = vld [vmem:[%s11177_s1 + $0x5e0] ss:$16 sps:$4 sm:$0xff]  }
  0x83   :  { %5027 = vmatpush1.bf16.msra.mxu0 %v7524_v20  ;;  %5560 = vmatpush1.bf16.msra.mxu1 %v7527_v22  ;;  %v7619_v20 = vld [vmem:[%s11177_s1 + $0x5ec] ss:$16 sps:$4 sm:$0xff]   ;;  %v7617_v22 = vld [vmem:[%s11177_s1 + $0x5e8] ss:$16 sps:$4 sm:$0xff]  }
  0x84   :  { %5028 = vmatprep.subr.bf16.mxu0 %v7532_v23  ;;  %5561 = vmatprep.subr.bf16.mxu1 %v7535_v24  ;;  %v7623_v23 = vld [vmem:[%s11177_s1 + $0x604] ss:$16 sps:$4 sm:$0xff]   ;;  %v7626_v24 = vld [vmem:[%s11177_s1 + $0x60c] ss:$16 sps:$4 sm:$0xff]  }
  0x85   :  { %5058 = vmatprep.mubr.bf16.mxu0 %v9007_v25  ;;  %5591 = vmatprep.mubr.bf16.mxu1 %v9007_v25 }
  0x87   :  { %5029 = vmatpush1.bf16.msra.mxu0 %v7530_v13  ;;  %5562 = vmatpush1.bf16.msra.mxu1 %v7533_v26  ;;  %v7621_v13 = vld [vmem:[%s11177_s1 + $0x600] ss:$16 sps:$4 sm:$0xff]   ;;  %v9196_v26 = vrot.slane %v8976_v14, %v8712_v49  ;;  %v883_v14 = vcombine.high %v9007_v25, %v9007_v25  ;;  %v7635_v25 = vld [vmem:[%s11177_s1 + $0x644] ss:$16 sps:$4 sm:$0xff]  }
  0x88   :  { %5030 = vmatprep.subr.bf16.mxu0 %v7538_v27  ;;  %5563 = vmatprep.subr.bf16.mxu1 %v7541_v28  ;;  %v7624_v27 = vld [vmem:[%s11177_s1 + $0x608] ss:$16 sps:$4 sm:$0xff]   ;;  %v7629_v28 = vld [vmem:[%s11177_s1 + $0x624] ss:$16 sps:$4 sm:$0xff]  }
  0x8b   :  { %5031 = vmatpush1.bf16.msra.mxu0 %v7536_v29  ;;  %5564 = vmatpush1.bf16.msra.mxu1 %v7539_v30  ;;  %v7632_v29 = vld [vmem:[%s11177_s1 + $0x62c] ss:$16 sps:$4 sm:$0xff]   ;;  %v7627_v30 = vld [vmem:[%s11177_s1 + $0x620] ss:$16 sps:$4 sm:$0xff]  }
  0x8c   :  { %5032 = vmatprep.subr.bf16.mxu0 %v7544_v31  ;;  %5565 = vmatprep.subr.bf16.mxu1 %v7547_v32  ;;  %v7630_v31 = vld [vmem:[%s11177_s1 + $0x628] ss:$16 sps:$4 sm:$0xff]   ;;  %v7638_v32 = vld [vmem:[%s11177_s1 + $0x64c] ss:$16 sps:$4 sm:$0xff]  }
  0x8f   :  { %5033 = vmatpush1.bf16.msra.mxu0 %v7542_v33  ;;  %5566 = vmatpush1.bf16.msra.mxu1 %v7545_v34  ;;  %v7633_v33 = vld [vmem:[%s11177_s1 + $0x640] ss:$16 sps:$4 sm:$0xff]   ;;  %v7636_v34 = vld [vmem:[%s11177_s1 + $0x648] ss:$16 sps:$4 sm:$0xff]  }
  0x90   :  { %5034 = vmatprep.subr.bf16.mxu0 %v7550_v35  ;;  %5567 = vmatprep.subr.bf16.mxu1 %v7553_v36  ;;  %v7641_v35 = vld [vmem:[%s11177_s1 + $0x664] ss:$16 sps:$4 sm:$0xff]   ;;  %v7644_v36 = vld [vmem:[%s11177_s1 + $0x66c] ss:$16 sps:$4 sm:$0xff]  }
  0x93   :  { %5035 = vmatpush1.bf16.msra.mxu0 %v7548_v37  ;;  %5568 = vmatpush1.bf16.msra.mxu1 %v7551_v38  ;;  %v7639_v37 = vld [vmem:[%s11177_s1 + $0x660] ss:$16 sps:$4 sm:$0xff]   ;;  %v7642_v38 = vld [vmem:[%s11177_s1 + $0x668] ss:$16 sps:$4 sm:$0xff]  }
  0x94   :  { %5036 = vmatprep.subr.bf16.mxu0 %v7556_v39  ;;  %5569 = vmatprep.subr.bf16.mxu1 %v7559_v40  ;;  %v7647_v39 = vld [vmem:[%s11177_s1 + $0x684] ss:$16 sps:$4 sm:$0xff]   ;;  %v7650_v40 = vld [vmem:[%s11177_s1 + $0x68c] ss:$16 sps:$4 sm:$0xff]  }
  0x97   :  { %5037 = vmatpush1.bf16.msra.mxu0 %v7554_v41  ;;  %5570 = vmatpush1.bf16.msra.mxu1 %v7557_v43  ;;  %v7645_v41 = vld [vmem:[%s11177_s1 + $0x680] ss:$16 sps:$4 sm:$0xff]   ;;  %v7648_v43 = vld [vmem:[%s11177_s1 + $0x688] ss:$16 sps:$4 sm:$0xff]  }
  0x98   :  { %5038 = vmatprep.subr.bf16.mxu0 %v7562_v44  ;;  %5571 = vmatprep.subr.bf16.mxu1 %v7565_v45  ;;  %v7653_v44 = vld [vmem:[%s11177_s1 + $0x6a4] ss:$16 sps:$4 sm:$0xff]   ;;  %v7656_v45 = vld [vmem:[%s11177_s1 + $0x6ac] ss:$16 sps:$4 sm:$0xff]  }
  0x9b   :  { %5039 = vmatpush1.bf16.msra.mxu0 %v7560_v46  ;;  %5572 = vmatpush1.bf16.msra.mxu1 %v7563_v47  ;;  %v7651_v46 = vld [vmem:[%s11177_s1 + $0x6a0] ss:$16 sps:$4 sm:$0xff]   ;;  %v7654_v47 = vld [vmem:[%s11177_s1 + $0x6a8] ss:$16 sps:$4 sm:$0xff]  }
  0x9c   :  { %5040 = vmatprep.subr.bf16.mxu0 %v7568_v48  ;;  %5573 = vmatprep.subr.bf16.mxu1 %v7571_v50  ;;  %v7659_v48 = vld [vmem:[%s11177_s1 + $0x6c4] ss:$16 sps:$4 sm:$0xff]   ;;  %v7662_v50 = vld [vmem:[%s11177_s1 + $0x6cc] ss:$16 sps:$4 sm:$0xff]  }
  0x9f   :  { %5041 = vmatpush1.bf16.msra.mxu0 %v7566_v51  ;;  %5574 = vmatpush1.bf16.msra.mxu1 %v7569_v53  ;;  %v7657_v51 = vld [vmem:[%s11177_s1 + $0x6c0] ss:$16 sps:$4 sm:$0xff]   ;;  %v7660_v53 = vld [vmem:[%s11177_s1 + $0x6c8] ss:$16 sps:$4 sm:$0xff]  }
  0xa0   :  { %5042 = vmatprep.subr.bf16.mxu0 %v7574_v54  ;;  %5575 = vmatprep.subr.bf16.mxu1 %v7577_v55  ;;  %v7665_v54 = vld [vmem:[%s11177_s1 + $0x6e4] ss:$16 sps:$4 sm:$0xff]   ;;  %v7668_v55 = vld [vmem:[%s11177_s1 + $0x6ec] ss:$16 sps:$4 sm:$0xff]  }
  0xa3   :  { %5043 = vmatpush1.bf16.msra.mxu0 %v7572_v56  ;;  %5576 = vmatpush1.bf16.msra.mxu1 %v7575_v57  ;;  %v7663_v56 = vld [vmem:[%s11177_s1 + $0x6e0] ss:$16 sps:$4 sm:$0xff]   ;;  %v7666_v57 = vld [vmem:[%s11177_s1 + $0x6e8] ss:$16 sps:$4 sm:$0xff]  }
  0xa4   :  { %5044 = vmatprep.subr.bf16.mxu0 %v7580_v58  ;;  %5577 = vmatprep.subr.bf16.mxu1 %v7583_v59  ;;  %v7671_v58 = vld [vmem:[%s11177_s1 + $0x704] ss:$16 sps:$4 sm:$0xff]   ;;  %v7674_v59 = vld [vmem:[%s11177_s1 + $0x70c] ss:$16 sps:$4 sm:$0xff]  }
  0xa7   :  { %5045 = vmatpush1.bf16.msra.mxu0 %v7578_v60  ;;  %5578 = vmatpush1.bf16.msra.mxu1 %v7581_v61  ;;  %v7669_v60 = vld [vmem:[%s11177_s1 + $0x700] ss:$16 sps:$4 sm:$0xff]   ;;  %v7672_v61 = vld [vmem:[%s11177_s1 + $0x708] ss:$16 sps:$4 sm:$0xff]  }
  0xa8   :  { %5046 = vmatprep.subr.bf16.mxu0 %v7586_v62  ;;  %5579 = vmatprep.subr.bf16.mxu1 %v7589_v63  ;;  %v7677_v62 = vld [vmem:[%s11177_s1 + $0x724] ss:$16 sps:$4 sm:$0xff]   ;;  %v7680_v63 = vld [vmem:[%s11177_s1 + $0x72c] ss:$16 sps:$4 sm:$0xff]  }
  0xab   :  { %5047 = vmatpush1.bf16.msra.mxu0 %v7584_v0  ;;  %5580 = vmatpush1.bf16.msra.mxu1 %v7587_v1  ;;  %v7675_v0 = vld [vmem:[%s11177_s1 + $0x720] ss:$16 sps:$4 sm:$0xff]   ;;  %v7678_v1 = vld [vmem:[%s11177_s1 + $0x728] ss:$16 sps:$4 sm:$0xff]  }
  0xac   :  { %5048 = vmatprep.subr.bf16.mxu0 %v7592_v2  ;;  %5581 = vmatprep.subr.bf16.mxu1 %v7595_v3  ;;  %v7683_v2 = vld [vmem:[%s11177_s1 + $0x744] ss:$16 sps:$4 sm:$0xff]   ;;  %v7686_v3 = vld [vmem:[%s11177_s1 + $0x74c] ss:$16 sps:$4 sm:$0xff]  }
  0xaf   :  { %5049 = vmatpush1.bf16.msra.mxu0 %v7590_v4  ;;  %5582 = vmatpush1.bf16.msra.mxu1 %v7593_v5  ;;  %v7681_v4 = vld [vmem:[%s11177_s1 + $0x740] ss:$16 sps:$4 sm:$0xff]   ;;  %v7684_v5 = vld [vmem:[%s11177_s1 + $0x748] ss:$16 sps:$4 sm:$0xff]  }
  0xb0   :  { %5050 = vmatprep.subr.bf16.mxu0 %v7598_v6  ;;  %5583 = vmatprep.subr.bf16.mxu1 %v7601_v7  ;;  %v7689_v6 = vld [vmem:[%s11177_s1 + $0x764] ss:$16 sps:$4 sm:$0xff]   ;;  %v7692_v7 = vld [vmem:[%s11177_s1 + $0x76c] ss:$16 sps:$4 sm:$0xff]  }
  0xb3   :  { %5051 = vmatpush1.bf16.msra.mxu0 %v7596_v8  ;;  %5584 = vmatpush1.bf16.msra.mxu1 %v7599_v9  ;;  %v7687_v8 = vld [vmem:[%s11177_s1 + $0x760] ss:$16 sps:$4 sm:$0xff]   ;;  %v7690_v9 = vld [vmem:[%s11177_s1 + $0x768] ss:$16 sps:$4 sm:$0xff]  }
  0xb4   :  { %5052 = vmatprep.subr.bf16.mxu0 %v7604_v10  ;;  %5585 = vmatprep.subr.bf16.mxu1 %v7607_v11  ;;  %v7695_v10 = vld [vmem:[%s11177_s1 + $0x784] ss:$16 sps:$4 sm:$0xff]   ;;  %v7698_v11 = vld [vmem:[%s11177_s1 + $0x78c] ss:$16 sps:$4 sm:$0xff]  }
  0xb7   :  { %5053 = vmatpush1.bf16.msra.mxu0 %v7602_v12  ;;  %5586 = vmatpush1.bf16.msra.mxu1 %v7605_v52  ;;  %v7693_v12 = vld [vmem:[%s11177_s1 + $0x780] ss:$16 sps:$4 sm:$0xff]   ;;  %v7696_v52 = vld [vmem:[%s11177_s1 + $0x788] ss:$16 sps:$4 sm:$0xff]  }
  0xb8   :  { %5054 = vmatprep.subr.bf16.mxu0 %v7610_v15  ;;  %5587 = vmatprep.subr.bf16.mxu1 %v7613_v16  ;;  %v7701_v15 = vld [vmem:[%s11177_s1 + $0x7a4] ss:$16 sps:$4 sm:$0xff]   ;;  %v7704_v16 = vld [vmem:[%s11177_s1 + $0x7ac] ss:$16 sps:$4 sm:$0xff]  }
  0xbb   :  { %5055 = vmatpush1.bf16.msra.mxu0 %v7608_v17  ;;  %5588 = vmatpush1.bf16.msra.mxu1 %v7611_v18  ;;  %v7699_v17 = vld [vmem:[%s11177_s1 + $0x7a0] ss:$16 sps:$4 sm:$0xff]   ;;  %v7702_v18 = vld [vmem:[%s11177_s1 + $0x7a8] ss:$16 sps:$4 sm:$0xff]  }
  0xbc   :  { %5056 = vmatprep.subr.bf16.mxu0 %v7616_v19  ;;  %5589 = vmatprep.subr.bf16.mxu1 %v7619_v20  ;;  %v7707_v19 = vld [vmem:[%s11177_s1 + $0x7c4] ss:$16 sps:$4 sm:$0xff]   ;;  %v7710_v20 = vld [vmem:[%s11177_s1 + $0x7cc] ss:$16 sps:$4 sm:$0xff]  }
  0xbf   :  { %5057 = vmatpush1.bf16.msra.mxu0 %v7614_v21  ;;  %5590 = vmatpush1.bf16.msra.mxu1 %v7617_v22  ;;  %v9370_v21 = vld.sshfl [vmem:[%s11178_s0 + $0x8] sm:$0xff pattern:$0x75316420]  ;;  %v7705_v22 = vld [vmem:[%s11177_s1 + $0x7c0] ss:$16 sps:$4 sm:$0xff]  }
  0xc0   :  { %5067 = vmatprep.subr.bf16.mxu0 %v7623_v23  ;;  %5600 = vmatprep.subr.bf16.mxu1 %v7626_v24  ;;  %v7708_v23 = vld [vmem:[%s11177_s1 + $0x7c8] ss:$16 sps:$4 sm:$0xff]   ;;  %v7713_v24 = vld [vmem:[%s11177_s1 + $0x7e4] ss:$16 sps:$4 sm:$0xff]  }
  0xc2   :  { %5059 = vmatmul.mubr.bf16.vlgmr.msra.gmra.mrb[0].mxu0 %v9196_v26  ;;  %5592 = vmatmul.mubr.bf16.vlgmr.msra.gmra.mrb[0].mxu1 %v9196_v26 }
  0xc3   :  { %5068 = vmatpush1.bf16.msra.mxu0 %v7621_v13  ;;  %5601 = vmatpush1.bf16.msra.mxu1 %v7624_v27  ;;  %v7716_v13 = vld [vmem:[%s11177_s1 + $0x7ec] ss:$16 sps:$4 sm:$0xff]   ;;  %v7711_v27 = vld [vmem:[%s11177_s1 + $0x7e0] ss:$16 sps:$4 sm:$0xff]  }
  0xc4   :  { %5069 = vmatprep.subr.bf16.mxu0 %v7629_v28  ;;  %5602 = vmatprep.subr.bf16.mxu1 %v7632_v29  ;;  %v7714_v28 = vld [vmem:[%s11177_s1 + $0x7e8] ss:$16 sps:$4 sm:$0xff]   ;;  %v7719_v29 = vld [vmem:[%s11177_s1 + $0x804] ss:$16 sps:$4 sm:$0xff]  }
  0xc5   :  { %5099 = vmatprep.mubr.bf16.mxu0 %v883_v14  ;;  %5632 = vmatprep.mubr.bf16.mxu1 %v883_v14  ;;  %v7722_v14 = vld [vmem:[%s11177_s1 + $0x80c] ss:$16 sps:$4 sm:$0xff]  }
  0xc7   :  { %5070 = vmatpush1.bf16.msra.mxu0 %v7627_v30  ;;  %5603 = vmatpush1.bf16.msra.mxu1 %v7630_v31  ;;  %v899_v30 = vcombine.high %v9370_v21, %v9370_v21  ;;  %v881_v31 = vcombine.high %v9196_v26, %v9196_v26  ;;  %v7728_v26 = vld [vmem:[%s11177_s1 + $0x82c] ss:$16 sps:$4 sm:$0xff]  }
  0xc8   :  { %5071 = vmatprep.subr.bf16.mxu0 %v7635_v25  ;;  %5604 = vmatprep.subr.bf16.mxu1 %v7638_v32  ;;  %v7717_v25 = vld [vmem:[%s11177_s1 + $0x800] ss:$16 sps:$4 sm:$0xff]   ;;  %v7720_v32 = vld [vmem:[%s11177_s1 + $0x808] ss:$16 sps:$4 sm:$0xff]  }
  0xcb   :  { %5072 = vmatpush1.bf16.msra.mxu0 %v7633_v33  ;;  %5605 = vmatpush1.bf16.msra.mxu1 %v7636_v34  ;;  %v7725_v33 = vld [vmem:[%s11177_s1 + $0x824] ss:$16 sps:$4 sm:$0xff]   ;;  %v9413_v34 = vrot.slane %v899_v30, %v8712_v49 }
  0xcc   :  { %5073 = vmatprep.subr.bf16.mxu0 %v7641_v35  ;;  %5606 = vmatprep.subr.bf16.mxu1 %v7644_v36  ;;  %v7723_v35 = vld [vmem:[%s11177_s1 + $0x820] ss:$16 sps:$4 sm:$0xff]   ;;  %v7726_v36 = vld [vmem:[%s11177_s1 + $0x828] ss:$16 sps:$4 sm:$0xff]   ;;  %v7809_v30 = vld [vmem:[%s11177_s1 + $0x9e4] ss:$16 sps:$4 sm:$0xff]  }
  0xcf   :  { %5074 = vmatpush1.bf16.msra.mxu0 %v7639_v37  ;;  %5607 = vmatpush1.bf16.msra.mxu1 %v7642_v38  ;;  %v7731_v37 = vld [vmem:[%s11177_s1 + $0x844] ss:$16 sps:$4 sm:$0xff]   ;;  %v7734_v38 = vld [vmem:[%s11177_s1 + $0x84c] ss:$16 sps:$4 sm:$0xff]  }
  0xd0   :  { %5075 = vmatprep.subr.bf16.mxu0 %v7647_v39  ;;  %5608 = vmatprep.subr.bf16.mxu1 %v7650_v40  ;;  %v7729_v39 = vld [vmem:[%s11177_s1 + $0x840] ss:$16 sps:$4 sm:$0xff]   ;;  %v7732_v40 = vld [vmem:[%s11177_s1 + $0x848] ss:$16 sps:$4 sm:$0xff]  }
  0xd3   :  { %5076 = vmatpush1.bf16.msra.mxu0 %v7645_v41  ;;  %5609 = vmatpush1.bf16.msra.mxu1 %v7648_v43  ;;  %v7737_v41 = vld [vmem:[%s11177_s1 + $0x864] ss:$16 sps:$4 sm:$0xff]   ;;  %v7740_v43 = vld [vmem:[%s11177_s1 + $0x86c] ss:$16 sps:$4 sm:$0xff]  }
  0xd4   :  { %5077 = vmatprep.subr.bf16.mxu0 %v7653_v44  ;;  %5610 = vmatprep.subr.bf16.mxu1 %v7656_v45  ;;  %v7735_v44 = vld [vmem:[%s11177_s1 + $0x860] ss:$16 sps:$4 sm:$0xff]   ;;  %v7738_v45 = vld [vmem:[%s11177_s1 + $0x868] ss:$16 sps:$4 sm:$0xff]  }
  0xd7   :  { %5078 = vmatpush1.bf16.msra.mxu0 %v7651_v46  ;;  %5611 = vmatpush1.bf16.msra.mxu1 %v7654_v47  ;;  %v7743_v46 = vld [vmem:[%s11177_s1 + $0x884] ss:$16 sps:$4 sm:$0xff]   ;;  %v7746_v47 = vld [vmem:[%s11177_s1 + $0x88c] ss:$16 sps:$4 sm:$0xff]  }
  0xd8   :  { %5079 = vmatprep.subr.bf16.mxu0 %v7659_v48  ;;  %5612 = vmatprep.subr.bf16.mxu1 %v7662_v50  ;;  %v7741_v48 = vld [vmem:[%s11177_s1 + $0x880] ss:$16 sps:$4 sm:$0xff]   ;;  %v7744_v50 = vld [vmem:[%s11177_s1 + $0x888] ss:$16 sps:$4 sm:$0xff]  }
  0xdb   :  { %5080 = vmatpush1.bf16.msra.mxu0 %v7657_v51  ;;  %5613 = vmatpush1.bf16.msra.mxu1 %v7660_v53  ;;  %v7749_v51 = vld [vmem:[%s11177_s1 + $0x8a4] ss:$16 sps:$4 sm:$0xff]   ;;  %v7752_v53 = vld [vmem:[%s11177_s1 + $0x8ac] ss:$16 sps:$4 sm:$0xff]  }
  0xdc   :  { %5081 = vmatprep.subr.bf16.mxu0 %v7665_v54  ;;  %5614 = vmatprep.subr.bf16.mxu1 %v7668_v55  ;;  %v7747_v54 = vld [vmem:[%s11177_s1 + $0x8a0] ss:$16 sps:$4 sm:$0xff]   ;;  %v7750_v55 = vld [vmem:[%s11177_s1 + $0x8a8] ss:$16 sps:$4 sm:$0xff]  }
  0xdf   :  { %5082 = vmatpush1.bf16.msra.mxu0 %v7663_v56  ;;  %5615 = vmatpush1.bf16.msra.mxu1 %v7666_v57  ;;  %v7755_v56 = vld [vmem:[%s11177_s1 + $0x8c4] ss:$16 sps:$4 sm:$0xff]   ;;  %v7758_v57 = vld [vmem:[%s11177_s1 + $0x8cc] ss:$16 sps:$4 sm:$0xff]  }
  0xe0   :  { %5083 = vmatprep.subr.bf16.mxu0 %v7671_v58  ;;  %5616 = vmatprep.subr.bf16.mxu1 %v7674_v59  ;;  %v7753_v58 = vld [vmem:[%s11177_s1 + $0x8c0] ss:$16 sps:$4 sm:$0xff]   ;;  %v7756_v59 = vld [vmem:[%s11177_s1 + $0x8c8] ss:$16 sps:$4 sm:$0xff]  }
  0xe3   :  { %5084 = vmatpush1.bf16.msra.mxu0 %v7669_v60  ;;  %5617 = vmatpush1.bf16.msra.mxu1 %v7672_v61  ;;  %v7761_v60 = vld [vmem:[%s11177_s1 + $0x8e4] ss:$16 sps:$4 sm:$0xff]   ;;  %v7764_v61 = vld [vmem:[%s11177_s1 + $0x8ec] ss:$16 sps:$4 sm:$0xff]  }
  0xe4   :  { %5085 = vmatprep.subr.bf16.mxu0 %v7677_v62  ;;  %5618 = vmatprep.subr.bf16.mxu1 %v7680_v63  ;;  %v7759_v62 = vld [vmem:[%s11177_s1 + $0x8e0] ss:$16 sps:$4 sm:$0xff]   ;;  %v7762_v63 = vld [vmem:[%s11177_s1 + $0x8e8] ss:$16 sps:$4 sm:$0xff]  }
  0xe7   :  { %5086 = vmatpush1.bf16.msra.mxu0 %v7675_v0  ;;  %5619 = vmatpush1.bf16.msra.mxu1 %v7678_v1  ;;  %v7767_v0 = vld [vmem:[%s11177_s1 + $0x904] ss:$16 sps:$4 sm:$0xff]   ;;  %v7770_v1 = vld [vmem:[%s11177_s1 + $0x90c] ss:$16 sps:$4 sm:$0xff]  }
  0xe8   :  { %5087 = vmatprep.subr.bf16.mxu0 %v7683_v2  ;;  %5620 = vmatprep.subr.bf16.mxu1 %v7686_v3  ;;  %v7765_v2 = vld [vmem:[%s11177_s1 + $0x900] ss:$16 sps:$4 sm:$0xff]   ;;  %v7768_v3 = vld [vmem:[%s11177_s1 + $0x908] ss:$16 sps:$4 sm:$0xff]  }
  0xeb   :  { %5088 = vmatpush1.bf16.msra.mxu0 %v7681_v4  ;;  %5621 = vmatpush1.bf16.msra.mxu1 %v7684_v5  ;;  %v7773_v4 = vld [vmem:[%s11177_s1 + $0x924] ss:$16 sps:$4 sm:$0xff]   ;;  %v7776_v5 = vld [vmem:[%s11177_s1 + $0x92c] ss:$16 sps:$4 sm:$0xff]  }
  0xec   :  { %5089 = vmatprep.subr.bf16.mxu0 %v7689_v6  ;;  %5622 = vmatprep.subr.bf16.mxu1 %v7692_v7  ;;  %v7771_v6 = vld [vmem:[%s11177_s1 + $0x920] ss:$16 sps:$4 sm:$0xff]   ;;  %v7774_v7 = vld [vmem:[%s11177_s1 + $0x928] ss:$16 sps:$4 sm:$0xff]  }
  0xef   :  { %5090 = vmatpush1.bf16.msra.mxu0 %v7687_v8  ;;  %5623 = vmatpush1.bf16.msra.mxu1 %v7690_v9  ;;  %v7779_v8 = vld [vmem:[%s11177_s1 + $0x944] ss:$16 sps:$4 sm:$0xff]   ;;  %v7782_v9 = vld [vmem:[%s11177_s1 + $0x94c] ss:$16 sps:$4 sm:$0xff]  }
  0xf0   :  { %5091 = vmatprep.subr.bf16.mxu0 %v7695_v10  ;;  %5624 = vmatprep.subr.bf16.mxu1 %v7698_v11  ;;  %v7777_v10 = vld [vmem:[%s11177_s1 + $0x940] ss:$16 sps:$4 sm:$0xff]   ;;  %v7780_v11 = vld [vmem:[%s11177_s1 + $0x948] ss:$16 sps:$4 sm:$0xff]  }
  0xf3   :  { %5092 = vmatpush1.bf16.msra.mxu0 %v7693_v12  ;;  %5625 = vmatpush1.bf16.msra.mxu1 %v7696_v52  ;;  %v7785_v12 = vld [vmem:[%s11177_s1 + $0x964] ss:$16 sps:$4 sm:$0xff]   ;;  %v7788_v52 = vld [vmem:[%s11177_s1 + $0x96c] ss:$16 sps:$4 sm:$0xff]  }
  0xf4   :  { %5093 = vmatprep.subr.bf16.mxu0 %v7701_v15  ;;  %5626 = vmatprep.subr.bf16.mxu1 %v7704_v16  ;;  %v7783_v15 = vld [vmem:[%s11177_s1 + $0x960] ss:$16 sps:$4 sm:$0xff]   ;;  %v7786_v16 = vld [vmem:[%s11177_s1 + $0x968] ss:$16 sps:$4 sm:$0xff]  }
  0xf7   :  { %5094 = vmatpush1.bf16.msra.mxu0 %v7699_v17  ;;  %5627 = vmatpush1.bf16.msra.mxu1 %v7702_v18  ;;  %v7791_v17 = vld [vmem:[%s11177_s1 + $0x984] ss:$16 sps:$4 sm:$0xff]   ;;  %v7794_v18 = vld [vmem:[%s11177_s1 + $0x98c] ss:$16 sps:$4 sm:$0xff]  }
  0xf8   :  { %5095 = vmatprep.subr.bf16.mxu0 %v7707_v19  ;;  %5628 = vmatprep.subr.bf16.mxu1 %v7710_v20  ;;  %v7789_v19 = vld [vmem:[%s11177_s1 + $0x980] ss:$16 sps:$4 sm:$0xff]   ;;  %v7792_v20 = vld [vmem:[%s11177_s1 + $0x988] ss:$16 sps:$4 sm:$0xff]  }
  0xfb   :  { %5096 = vmatpush1.bf16.msra.mxu0 %v7705_v22  ;;  %5629 = vmatpush1.bf16.msra.mxu1 %v7708_v23  ;;  %v7797_v22 = vld [vmem:[%s11177_s1 + $0x9a4] ss:$16 sps:$4 sm:$0xff]   ;;  %v7800_v23 = vld [vmem:[%s11177_s1 + $0x9ac] ss:$16 sps:$4 sm:$0xff]  }
  0xfc   :  { %5097 = vmatprep.subr.bf16.mxu0 %v7713_v24  ;;  %5630 = vmatprep.subr.bf16.mxu1 %v7716_v13  ;;  %v7795_v24 = vld [vmem:[%s11177_s1 + $0x9a0] ss:$16 sps:$4 sm:$0xff]   ;;  %v7798_v13 = vld [vmem:[%s11177_s1 + $0x9a8] ss:$16 sps:$4 sm:$0xff]  }
  0xff   :  { %5098 = vmatpush1.bf16.msra.mxu0 %v7711_v27  ;;  %5631 = vmatpush1.bf16.msra.mxu1 %v7714_v28  ;;  %v7803_v27 = vld [vmem:[%s11177_s1 + $0x9c4] ss:$16 sps:$4 sm:$0xff]   ;;  %v7806_v28 = vld [vmem:[%s11177_s1 + $0x9cc] ss:$16 sps:$4 sm:$0xff]  }
 0x100   :  { %5108 = vmatprep.subr.bf16.mxu0 %v7719_v29  ;;  %5641 = vmatprep.subr.bf16.mxu1 %v7722_v14  ;;  %v7801_v29 = vld [vmem:[%s11177_s1 + $0x9c0] ss:$16 sps:$4 sm:$0xff]   ;;  %v7804_v14 = vld [vmem:[%s11177_s1 + $0x9c8] ss:$16 sps:$4 sm:$0xff]  }
 0x102   :  { %5100 = vmatmul.mubr.bf16.vlgmr.msra.gmra.mrb[0].mxu0 %v881_v31  ;;  %5633 = vmatmul.mubr.bf16.vlgmr.msra.gmra.mrb[0].mxu1 %v881_v31  ;;  %v7812_v31 = vld [vmem:[%s11177_s1 + $0x9ec] ss:$16 sps:$4 sm:$0xff]  }
 0x103   :  { %5109 = vmatpush1.bf16.msra.mxu0 %v7717_v25  ;;  %5642 = vmatpush1.bf16.msra.mxu1 %v7720_v32  ;;  %v7807_v25 = vld [vmem:[%s11177_s1 + $0x9e0] ss:$16 sps:$4 sm:$0xff]   ;;  %v7810_v32 = vld [vmem:[%s11177_s1 + $0x9e8] ss:$16 sps:$4 sm:$0xff]  }
 0x104   :  { %5110 = vmatprep.subr.bf16.mxu0 %v7725_v33  ;;  %5643 = vmatprep.subr.bf16.mxu1 %v7728_v26  ;;  %v7815_v33 = vld [vmem:[%s11177_s1 + $0xa04] ss:$16 sps:$4 sm:$0xff]   ;;  %v7818_v26 = vld [vmem:[%s11177_s1 + $0xa0c] ss:$16 sps:$4 sm:$0xff]  }
 0x105   :  { %5140 = vmatprep.mubr.bf16.mxu0 %v9413_v34  ;;  %5673 = vmatprep.mubr.bf16.mxu1 %v9413_v34 }
 0x107   :  { %5111 = vmatpush1.bf16.msra.mxu0 %v7723_v35  ;;  %5644 = vmatpush1.bf16.msra.mxu1 %v7726_v36  ;;  %v9599_v35 = vrot.slane %v9370_v21, %v8712_v49  ;;  %v7813_v36 = vld [vmem:[%s11177_s1 + $0xa00] ss:$16 sps:$4 sm:$0xff]   ;;  %v7824_v21 = vld [vmem:[%s11177_s1 + $0xa2c] ss:$16 sps:$4 sm:$0xff]  }
 0x108   :  { %5112 = vmatprep.subr.bf16.mxu0 %v7731_v37  ;;  %5645 = vmatprep.subr.bf16.mxu1 %v7734_v38  ;;  %v7816_v37 = vld [vmem:[%s11177_s1 + $0xa08] ss:$16 sps:$4 sm:$0xff]   ;;  %v7821_v38 = vld [vmem:[%s11177_s1 + $0xa24] ss:$16 sps:$4 sm:$0xff]  }
 0x10b   :  { %5113 = vmatpush1.bf16.msra.mxu0 %v7729_v39  ;;  %5646 = vmatpush1.bf16.msra.mxu1 %v7732_v40  ;;  %v931_v39 = vcombine.high %v9413_v34, %v9413_v34  ;;  %v7819_v40 = vld [vmem:[%s11177_s1 + $0xa20] ss:$16 sps:$4 sm:$0xff]   ;;  %v7827_v34 = vld [vmem:[%s11177_s1 + $0xa44] ss:$16 sps:$4 sm:$0xff]  }
 0x10c   :  { %5114 = vmatprep.subr.bf16.mxu0 %v7737_v41  ;;  %5647 = vmatprep.subr.bf16.mxu1 %v7740_v43  ;;  %v7822_v41 = vld [vmem:[%s11177_s1 + $0xa28] ss:$16 sps:$4 sm:$0xff]   ;;  %v7830_v43 = vld [vmem:[%s11177_s1 + $0xa4c] ss:$16 sps:$4 sm:$0xff]  }
 0x10f   :  { %5115 = vmatpush1.bf16.msra.mxu0 %v7735_v44  ;;  %5648 = vmatpush1.bf16.msra.mxu1 %v7738_v45  ;;  %v7825_v44 = vld [vmem:[%s11177_s1 + $0xa40] ss:$16 sps:$4 sm:$0xff]   ;;  %v7828_v45 = vld [vmem:[%s11177_s1 + $0xa48] ss:$16 sps:$4 sm:$0xff]  }
 0x110   :  { %5116 = vmatprep.subr.bf16.mxu0 %v7743_v46  ;;  %5649 = vmatprep.subr.bf16.mxu1 %v7746_v47  ;;  %v7833_v46 = vld [vmem:[%s11177_s1 + $0xa64] ss:$16 sps:$4 sm:$0xff]   ;;  %v7836_v47 = vld [vmem:[%s11177_s1 + $0xa6c] ss:$16 sps:$4 sm:$0xff]  }
 0x113   :  { %5117 = vmatpush1.bf16.msra.mxu0 %v7741_v48  ;;  %5650 = vmatpush1.bf16.msra.mxu1 %v7744_v50  ;;  %v7831_v48 = vld [vmem:[%s11177_s1 + $0xa60] ss:$16 sps:$4 sm:$0xff]   ;;  %v7834_v50 = vld [vmem:[%s11177_s1 + $0xa68] ss:$16 sps:$4 sm:$0xff]  }
 0x114   :  { %5118 = vmatprep.subr.bf16.mxu0 %v7749_v51  ;;  %5651 = vmatprep.subr.bf16.mxu1 %v7752_v53  ;;  %v7839_v51 = vld [vmem:[%s11177_s1 + $0xa84] ss:$16 sps:$4 sm:$0xff]   ;;  %v7842_v53 = vld [vmem:[%s11177_s1 + $0xa8c] ss:$16 sps:$4 sm:$0xff]  }
 0x117   :  { %5119 = vmatpush1.bf16.msra.mxu0 %v7747_v54  ;;  %5652 = vmatpush1.bf16.msra.mxu1 %v7750_v55  ;;  %v7837_v54 = vld [vmem:[%s11177_s1 + $0xa80] ss:$16 sps:$4 sm:$0xff]   ;;  %v7840_v55 = vld [vmem:[%s11177_s1 + $0xa88] ss:$16 sps:$4 sm:$0xff]  }
 0x118   :  { %5120 = vmatprep.subr.bf16.mxu0 %v7755_v56  ;;  %5653 = vmatprep.subr.bf16.mxu1 %v7758_v57  ;;  %v7845_v56 = vld [vmem:[%s11177_s1 + $0xaa4] ss:$16 sps:$4 sm:$0xff]   ;;  %v7848_v57 = vld [vmem:[%s11177_s1 + $0xaac] ss:$16 sps:$4 sm:$0xff]  }
 0x11b   :  { %5121 = vmatpush1.bf16.msra.mxu0 %v7753_v58  ;;  %5654 = vmatpush1.bf16.msra.mxu1 %v7756_v59  ;;  %v7843_v58 = vld [vmem:[%s11177_s1 + $0xaa0] ss:$16 sps:$4 sm:$0xff]   ;;  %v7846_v59 = vld [vmem:[%s11177_s1 + $0xaa8] ss:$16 sps:$4 sm:$0xff]  }
 0x11c   :  { %5122 = vmatprep.subr.bf16.mxu0 %v7761_v60  ;;  %5655 = vmatprep.subr.bf16.mxu1 %v7764_v61  ;;  %v7851_v60 = vld [vmem:[%s11177_s1 + $0xac4] ss:$16 sps:$4 sm:$0xff]   ;;  %v7854_v61 = vld [vmem:[%s11177_s1 + $0xacc] ss:$16 sps:$4 sm:$0xff]  }
 0x11f   :  { %5123 = vmatpush1.bf16.msra.mxu0 %v7759_v62  ;;  %5656 = vmatpush1.bf16.msra.mxu1 %v7762_v63  ;;  %v7849_v62 = vld [vmem:[%s11177_s1 + $0xac0] ss:$16 sps:$4 sm:$0xff]   ;;  %v7852_v63 = vld [vmem:[%s11177_s1 + $0xac8] ss:$16 sps:$4 sm:$0xff]  }
 0x120   :  { %5124 = vmatprep.subr.bf16.mxu0 %v7767_v0  ;;  %5657 = vmatprep.subr.bf16.mxu1 %v7770_v1  ;;  %v7857_v0 = vld [vmem:[%s11177_s1 + $0xae4] ss:$16 sps:$4 sm:$0xff]   ;;  %v7860_v1 = vld [vmem:[%s11177_s1 + $0xaec] ss:$16 sps:$4 sm:$0xff]  }
 0x123   :  { %5125 = vmatpush1.bf16.msra.mxu0 %v7765_v2  ;;  %5658 = vmatpush1.bf16.msra.mxu1 %v7768_v3  ;;  %v7855_v2 = vld [vmem:[%s11177_s1 + $0xae0] ss:$16 sps:$4 sm:$0xff]   ;;  %v7858_v3 = vld [vmem:[%s11177_s1 + $0xae8] ss:$16 sps:$4 sm:$0xff]  }
 0x124   :  { %5126 = vmatprep.subr.bf16.mxu0 %v7773_v4  ;;  %5659 = vmatprep.subr.bf16.mxu1 %v7776_v5  ;;  %v7863_v4 = vld [vmem:[%s11177_s1 + $0xb04] ss:$16 sps:$4 sm:$0xff]   ;;  %v7866_v5 = vld [vmem:[%s11177_s1 + $0xb0c] ss:$16 sps:$4 sm:$0xff]  }
 0x127   :  { %5127 = vmatpush1.bf16.msra.mxu0 %v7771_v6  ;;  %5660 = vmatpush1.bf16.msra.mxu1 %v7774_v7  ;;  %v7861_v6 = vld [vmem:[%s11177_s1 + $0xb00] ss:$16 sps:$4 sm:$0xff]   ;;  %v7864_v7 = vld [vmem:[%s11177_s1 + $0xb08] ss:$16 sps:$4 sm:$0xff]  }
 0x128   :  { %5128 = vmatprep.subr.bf16.mxu0 %v7779_v8  ;;  %5661 = vmatprep.subr.bf16.mxu1 %v7782_v9  ;;  %v7869_v8 = vld [vmem:[%s11177_s1 + $0xb24] ss:$16 sps:$4 sm:$0xff]   ;;  %v7872_v9 = vld [vmem:[%s11177_s1 + $0xb2c] ss:$16 sps:$4 sm:$0xff]  }
 0x12b   :  { %5129 = vmatpush1.bf16.msra.mxu0 %v7777_v10  ;;  %5662 = vmatpush1.bf16.msra.mxu1 %v7780_v11  ;;  %v7867_v10 = vld [vmem:[%s11177_s1 + $0xb20] ss:$16 sps:$4 sm:$0xff]   ;;  %v7870_v11 = vld [vmem:[%s11177_s1 + $0xb28] ss:$16 sps:$4 sm:$0xff]  }
 0x12c   :  { %5130 = vmatprep.subr.bf16.mxu0 %v7785_v12  ;;  %5663 = vmatprep.subr.bf16.mxu1 %v7788_v52  ;;  %v7875_v12 = vld [vmem:[%s11177_s1 + $0xb44] ss:$16 sps:$4 sm:$0xff]   ;;  %v7878_v52 = vld [vmem:[%s11177_s1 + $0xb4c] ss:$16 sps:$4 sm:$0xff]  }
 0x12f   :  { %5131 = vmatpush1.bf16.msra.mxu0 %v7783_v15  ;;  %5664 = vmatpush1.bf16.msra.mxu1 %v7786_v16  ;;  %v7873_v15 = vld [vmem:[%s11177_s1 + $0xb40] ss:$16 sps:$4 sm:$0xff]   ;;  %v7876_v16 = vld [vmem:[%s11177_s1 + $0xb48] ss:$16 sps:$4 sm:$0xff]  }
 0x130   :  { %5132 = vmatprep.subr.bf16.mxu0 %v7791_v17  ;;  %5665 = vmatprep.subr.bf16.mxu1 %v7794_v18  ;;  %v7881_v17 = vld [vmem:[%s11177_s1 + $0xb64] ss:$16 sps:$4 sm:$0xff]   ;;  %v7884_v18 = vld [vmem:[%s11177_s1 + $0xb6c] ss:$16 sps:$4 sm:$0xff]  }
 0x133   :  { %5133 = vmatpush1.bf16.msra.mxu0 %v7789_v19  ;;  %5666 = vmatpush1.bf16.msra.mxu1 %v7792_v20  ;;  %v7879_v19 = vld [vmem:[%s11177_s1 + $0xb60] ss:$16 sps:$4 sm:$0xff]   ;;  %v7882_v20 = vld [vmem:[%s11177_s1 + $0xb68] ss:$16 sps:$4 sm:$0xff]  }
 0x134   :  { %5134 = vmatprep.subr.bf16.mxu0 %v7797_v22  ;;  %5667 = vmatprep.subr.bf16.mxu1 %v7800_v23  ;;  %v7887_v22 = vld [vmem:[%s11177_s1 + $0xb84] ss:$16 sps:$4 sm:$0xff]   ;;  %v7890_v23 = vld [vmem:[%s11177_s1 + $0xb8c] ss:$16 sps:$4 sm:$0xff]  }
 0x137   :  { %5135 = vmatpush1.bf16.msra.mxu0 %v7795_v24  ;;  %5668 = vmatpush1.bf16.msra.mxu1 %v7798_v13  ;;  %v7885_v24 = vld [vmem:[%s11177_s1 + $0xb80] ss:$16 sps:$4 sm:$0xff]   ;;  %v7888_v13 = vld [vmem:[%s11177_s1 + $0xb88] ss:$16 sps:$4 sm:$0xff]  }
 0x138   :  { %5136 = vmatprep.subr.bf16.mxu0 %v7803_v27  ;;  %5669 = vmatprep.subr.bf16.mxu1 %v7806_v28  ;;  %v7893_v27 = vld [vmem:[%s11177_s1 + $0xba4] ss:$16 sps:$4 sm:$0xff]   ;;  %v7896_v28 = vld [vmem:[%s11177_s1 + $0xbac] ss:$16 sps:$4 sm:$0xff]  }
 0x13b   :  { %5137 = vmatpush1.bf16.msra.mxu0 %v7801_v29  ;;  %5670 = vmatpush1.bf16.msra.mxu1 %v7804_v14  ;;  %v7891_v29 = vld [vmem:[%s11177_s1 + $0xba0] ss:$16 sps:$4 sm:$0xff]   ;;  %v7894_v14 = vld [vmem:[%s11177_s1 + $0xba8] ss:$16 sps:$4 sm:$0xff]  }
 0x13c   :  { %5138 = vmatprep.subr.bf16.mxu0 %v7809_v30  ;;  %5671 = vmatprep.subr.bf16.mxu1 %v7812_v31  ;;  %v7899_v30 = vld [vmem:[%s11177_s1 + $0xbc4] ss:$16 sps:$4 sm:$0xff]   ;;  %v7902_v31 = vld [vmem:[%s11177_s1 + $0xbcc] ss:$16 sps:$4 sm:$0xff]  }
 0x13f   :  { %5139 = vmatpush1.bf16.msra.mxu0 %v7807_v25  ;;  %5672 = vmatpush1.bf16.msra.mxu1 %v7810_v32  ;;  %v8543_v25 = vld [vmem:[%s11178_s0 + $0x8] sm:$0xff] }
 0x140   :  { %5149 = vmatprep.subr.bf16.mxu0 %v7815_v33  ;;  %5682 = vmatprep.subr.bf16.mxu1 %v7818_v26  ;;  %v884_v32 = vcombine.high %v8543_v25, %v8543_v25  ;;  %v7897_v33 = vld [vmem:[%s11177_s1 + $0xbc0] ss:$16 sps:$4 sm:$0xff]   ;;  %v7900_v26 = vld [vmem:[%s11177_s1 + $0xbc8] ss:$16 sps:$4 sm:$0xff]  }
 0x141   :  { %v7981_v25 = vld [vmem:[%s11177_s1 + $0xd80] ss:$16 sps:$4 sm:$0xff]  }
 0x142   :  { %5141 = vmatmul.mubr.bf16.vlgmr.msra.gmra.mrb[0].mxu0 %v9599_v35  ;;  %5674 = vmatmul.mubr.bf16.vlgmr.msra.gmra.mrb[0].mxu1 %v9599_v35 }
 0x143   :  { %5150 = vmatpush1.bf16.msra.mxu0 %v7813_v36  ;;  %5683 = vmatpush1.bf16.msra.mxu1 %v7816_v37  ;;  %v7905_v36 = vld [vmem:[%s11177_s1 + $0xbe4] ss:$16 sps:$4 sm:$0xff]   ;;  %v7908_v37 = vld [vmem:[%s11177_s1 + $0xbec] ss:$16 sps:$4 sm:$0xff]  }
 0x144   :  { %5151 = vmatprep.subr.bf16.mxu0 %v7821_v38  ;;  %5684 = vmatprep.subr.bf16.mxu1 %v7824_v21  ;;  %v9789_v38 = vrot.slane %v884_v32, %v8712_v49  ;;  %v7903_v21 = vld [vmem:[%s11177_s1 + $0xbe0] ss:$16 sps:$4 sm:$0xff]   ;;  %v7984_v32 = vld [vmem:[%s11177_s1 + $0xd88] ss:$16 sps:$4 sm:$0xff]  }
 0x145   :  { %5181 = vmatprep.mubr.bf16.mxu0 %v931_v39  ;;  %5714 = vmatprep.mubr.bf16.mxu1 %v931_v39  ;;  %v7906_v39 = vld [vmem:[%s11177_s1 + $0xbe8] ss:$16 sps:$4 sm:$0xff]  }
 0x147   :  { %5152 = vmatpush1.bf16.msra.mxu0 %v7819_v40  ;;  %5685 = vmatpush1.bf16.msra.mxu1 %v7822_v41  ;;  %v7911_v40 = vld [vmem:[%s11177_s1 + $0xc04] ss:$16 sps:$4 sm:$0xff]   ;;  %v7914_v41 = vld [vmem:[%s11177_s1 + $0xc0c] ss:$16 sps:$4 sm:$0xff]  }
 0x148   :  { %5153 = vmatprep.subr.bf16.mxu0 %v7827_v34  ;;  %5686 = vmatprep.subr.bf16.mxu1 %v7830_v43  ;;  %v900_v34 = vcombine.high %v9789_v38, %v9789_v38  ;;  %v929_v43 = vcombine.high %v9599_v35, %v9599_v35  ;;  %v7920_v35 = vld [vmem:[%s11177_s1 + $0xc2c] ss:$16 sps:$4 sm:$0xff]  }
 0x14b   :  { %5154 = vmatpush1.bf16.msra.mxu0 %v7825_v44  ;;  %5687 = vmatpush1.bf16.msra.mxu1 %v7828_v45  ;;  %v7909_v44 = vld [vmem:[%s11177_s1 + $0xc00] ss:$16 sps:$4 sm:$0xff]   ;;  %v7912_v45 = vld [vmem:[%s11177_s1 + $0xc08] ss:$16 sps:$4 sm:$0xff]  }
 0x14c   :  { %5155 = vmatprep.subr.bf16.mxu0 %v7833_v46  ;;  %5688 = vmatprep.subr.bf16.mxu1 %v7836_v47  ;;  %v7917_v46 = vld [vmem:[%s11177_s1 + $0xc24] ss:$16 sps:$4 sm:$0xff]   ;;  %v9820_v47 = vrot.slane %v900_v34, %v8712_v49 }
 0x14d   :  { %v8001_v34 = vld [vmem:[%s11177_s1 + $0xde4] ss:$16 sps:$4 sm:$0xff]  }
 0x14f   :  { %5156 = vmatpush1.bf16.msra.mxu0 %v7831_v48  ;;  %5689 = vmatpush1.bf16.msra.mxu1 %v7834_v50  ;;  %v7915_v48 = vld [vmem:[%s11177_s1 + $0xc20] ss:$16 sps:$4 sm:$0xff]   ;;  %v7918_v50 = vld [vmem:[%s11177_s1 + $0xc28] ss:$16 sps:$4 sm:$0xff]  }
 0x150   :  { %5157 = vmatprep.subr.bf16.mxu0 %v7839_v51  ;;  %5690 = vmatprep.subr.bf16.mxu1 %v7842_v53  ;;  %v7923_v51 = vld [vmem:[%s11177_s1 + $0xc44] ss:$16 sps:$4 sm:$0xff]   ;;  %v7926_v53 = vld [vmem:[%s11177_s1 + $0xc4c] ss:$16 sps:$4 sm:$0xff]  }
 0x153   :  { %5158 = vmatpush1.bf16.msra.mxu0 %v7837_v54  ;;  %5691 = vmatpush1.bf16.msra.mxu1 %v7840_v55  ;;  %v7921_v54 = vld [vmem:[%s11177_s1 + $0xc40] ss:$16 sps:$4 sm:$0xff]   ;;  %v7924_v55 = vld [vmem:[%s11177_s1 + $0xc48] ss:$16 sps:$4 sm:$0xff]  }
 0x154   :  { %5159 = vmatprep.subr.bf16.mxu0 %v7845_v56  ;;  %5692 = vmatprep.subr.bf16.mxu1 %v7848_v57  ;;  %v7929_v56 = vld [vmem:[%s11177_s1 + $0xc64] ss:$16 sps:$4 sm:$0xff]   ;;  %v7932_v57 = vld [vmem:[%s11177_s1 + $0xc6c] ss:$16 sps:$4 sm:$0xff]  }
 0x157   :  { %5160 = vmatpush1.bf16.msra.mxu0 %v7843_v58  ;;  %5693 = vmatpush1.bf16.msra.mxu1 %v7846_v59  ;;  %v7927_v58 = vld [vmem:[%s11177_s1 + $0xc60] ss:$16 sps:$4 sm:$0xff]   ;;  %v7930_v59 = vld [vmem:[%s11177_s1 + $0xc68] ss:$16 sps:$4 sm:$0xff]  }
 0x158   :  { %5161 = vmatprep.subr.bf16.mxu0 %v7851_v60  ;;  %5694 = vmatprep.subr.bf16.mxu1 %v7854_v61  ;;  %v7935_v60 = vld [vmem:[%s11177_s1 + $0xc84] ss:$16 sps:$4 sm:$0xff]   ;;  %v7938_v61 = vld [vmem:[%s11177_s1 + $0xc8c] ss:$16 sps:$4 sm:$0xff]  }
 0x15b   :  { %5162 = vmatpush1.bf16.msra.mxu0 %v7849_v62  ;;  %5695 = vmatpush1.bf16.msra.mxu1 %v7852_v63  ;;  %v7933_v62 = vld [vmem:[%s11177_s1 + $0xc80] ss:$16 sps:$4 sm:$0xff]   ;;  %v7936_v63 = vld [vmem:[%s11177_s1 + $0xc88] ss:$16 sps:$4 sm:$0xff]  }
 0x15c   :  { %5163 = vmatprep.subr.bf16.mxu0 %v7857_v0  ;;  %5696 = vmatprep.subr.bf16.mxu1 %v7860_v1  ;;  %v7941_v0 = vld [vmem:[%s11177_s1 + $0xca4] ss:$16 sps:$4 sm:$0xff]   ;;  %v7944_v1 = vld [vmem:[%s11177_s1 + $0xcac] ss:$16 sps:$4 sm:$0xff]  }
 0x15f   :  { %5164 = vmatpush1.bf16.msra.mxu0 %v7855_v2  ;;  %5697 = vmatpush1.bf16.msra.mxu1 %v7858_v3  ;;  %v7939_v2 = vld [vmem:[%s11177_s1 + $0xca0] ss:$16 sps:$4 sm:$0xff]   ;;  %v7942_v3 = vld [vmem:[%s11177_s1 + $0xca8] ss:$16 sps:$4 sm:$0xff]  }
 0x160   :  { %5165 = vmatprep.subr.bf16.mxu0 %v7863_v4  ;;  %5698 = vmatprep.subr.bf16.mxu1 %v7866_v5  ;;  %v7947_v4 = vld [vmem:[%s11177_s1 + $0xcc4] ss:$16 sps:$4 sm:$0xff]   ;;  %v7950_v5 = vld [vmem:[%s11177_s1 + $0xccc] ss:$16 sps:$4 sm:$0xff]  }
 0x163   :  { %5166 = vmatpush1.bf16.msra.mxu0 %v7861_v6  ;;  %5699 = vmatpush1.bf16.msra.mxu1 %v7864_v7  ;;  %v7945_v6 = vld [vmem:[%s11177_s1 + $0xcc0] ss:$16 sps:$4 sm:$0xff]   ;;  %v7948_v7 = vld [vmem:[%s11177_s1 + $0xcc8] ss:$16 sps:$4 sm:$0xff]  }
 0x164   :  { %5167 = vmatprep.subr.bf16.mxu0 %v7869_v8  ;;  %5700 = vmatprep.subr.bf16.mxu1 %v7872_v9  ;;  %v7953_v8 = vld [vmem:[%s11177_s1 + $0xce4] ss:$16 sps:$4 sm:$0xff]   ;;  %v7956_v9 = vld [vmem:[%s11177_s1 + $0xcec] ss:$16 sps:$4 sm:$0xff]  }
 0x167   :  { %5168 = vmatpush1.bf16.msra.mxu0 %v7867_v10  ;;  %5701 = vmatpush1.bf16.msra.mxu1 %v7870_v11  ;;  %v7951_v10 = vld [vmem:[%s11177_s1 + $0xce0] ss:$16 sps:$4 sm:$0xff]   ;;  %v7954_v11 = vld [vmem:[%s11177_s1 + $0xce8] ss:$16 sps:$4 sm:$0xff]  }
 0x168   :  { %5169 = vmatprep.subr.bf16.mxu0 %v7875_v12  ;;  %5702 = vmatprep.subr.bf16.mxu1 %v7878_v52  ;;  %v7959_v12 = vld [vmem:[%s11177_s1 + $0xd04] ss:$16 sps:$4 sm:$0xff]   ;;  %v7962_v52 = vld [vmem:[%s11177_s1 + $0xd0c] ss:$16 sps:$4 sm:$0xff]  }
 0x16b   :  { %5170 = vmatpush1.bf16.msra.mxu0 %v7873_v15  ;;  %5703 = vmatpush1.bf16.msra.mxu1 %v7876_v16  ;;  %v7957_v15 = vld [vmem:[%s11177_s1 + $0xd00] ss:$16 sps:$4 sm:$0xff]   ;;  %v7960_v16 = vld [vmem:[%s11177_s1 + $0xd08] ss:$16 sps:$4 sm:$0xff]  }
 0x16c   :  { %5171 = vmatprep.subr.bf16.mxu0 %v7881_v17  ;;  %5704 = vmatprep.subr.bf16.mxu1 %v7884_v18  ;;  %v7965_v17 = vld [vmem:[%s11177_s1 + $0xd24] ss:$16 sps:$4 sm:$0xff]   ;;  %v7968_v18 = vld [vmem:[%s11177_s1 + $0xd2c] ss:$16 sps:$4 sm:$0xff]  }
 0x16f   :  { %5172 = vmatpush1.bf16.msra.mxu0 %v7879_v19  ;;  %5705 = vmatpush1.bf16.msra.mxu1 %v7882_v20  ;;  %v7963_v19 = vld [vmem:[%s11177_s1 + $0xd20] ss:$16 sps:$4 sm:$0xff]   ;;  %v7966_v20 = vld [vmem:[%s11177_s1 + $0xd28] ss:$16 sps:$4 sm:$0xff]  }
 0x170   :  { %5173 = vmatprep.subr.bf16.mxu0 %v7887_v22  ;;  %5706 = vmatprep.subr.bf16.mxu1 %v7890_v23  ;;  %v7971_v22 = vld [vmem:[%s11177_s1 + $0xd44] ss:$16 sps:$4 sm:$0xff]   ;;  %v7974_v23 = vld [vmem:[%s11177_s1 + $0xd4c] ss:$16 sps:$4 sm:$0xff]  }
 0x173   :  { %5174 = vmatpush1.bf16.msra.mxu0 %v7885_v24  ;;  %5707 = vmatpush1.bf16.msra.mxu1 %v7888_v13  ;;  %v7969_v24 = vld [vmem:[%s11177_s1 + $0xd40] ss:$16 sps:$4 sm:$0xff]   ;;  %v7972_v13 = vld [vmem:[%s11177_s1 + $0xd48] ss:$16 sps:$4 sm:$0xff]  }
 0x174   :  { %5175 = vmatprep.subr.bf16.mxu0 %v7893_v27  ;;  %5708 = vmatprep.subr.bf16.mxu1 %v7896_v28  ;;  %v7977_v27 = vld [vmem:[%s11177_s1 + $0xd64] ss:$16 sps:$4 sm:$0xff]   ;;  %v7980_v28 = vld [vmem:[%s11177_s1 + $0xd6c] ss:$16 sps:$4 sm:$0xff]  }
 0x177   :  { %5176 = vmatpush1.bf16.msra.mxu0 %v7891_v29  ;;  %5709 = vmatpush1.bf16.msra.mxu1 %v7894_v14  ;;  %v7975_v29 = vld [vmem:[%s11177_s1 + $0xd60] ss:$16 sps:$4 sm:$0xff]   ;;  %v7978_v14 = vld [vmem:[%s11177_s1 + $0xd68] ss:$16 sps:$4 sm:$0xff]  }
 0x178   :  { %5177 = vmatprep.subr.bf16.mxu0 %v7899_v30  ;;  %5710 = vmatprep.subr.bf16.mxu1 %v7902_v31  ;;  %v7983_v30 = vld [vmem:[%s11177_s1 + $0xd84] ss:$16 sps:$4 sm:$0xff]   ;;  %v7986_v31 = vld [vmem:[%s11177_s1 + $0xd8c] ss:$16 sps:$4 sm:$0xff]  }
 0x17b   :  { %5178 = vmatpush1.bf16.msra.mxu0 %v7897_v33  ;;  %5711 = vmatpush1.bf16.msra.mxu1 %v7900_v26  ;;  %v7989_v33 = vld [vmem:[%s11177_s1 + $0xda4] ss:$16 sps:$4 sm:$0xff]   ;;  %v7992_v26 = vld [vmem:[%s11177_s1 + $0xdac] ss:$16 sps:$4 sm:$0xff]  }
 0x17c   :  { %5179 = vmatprep.subr.bf16.mxu0 %v7905_v36  ;;  %5712 = vmatprep.subr.bf16.mxu1 %v7908_v37  ;;  %v7987_v36 = vld [vmem:[%s11177_s1 + $0xda0] ss:$16 sps:$4 sm:$0xff]   ;;  %v7990_v37 = vld [vmem:[%s11177_s1 + $0xda8] ss:$16 sps:$4 sm:$0xff]  }
 0x17f   :  { %5180 = vmatpush1.bf16.msra.mxu0 %v7903_v21  ;;  %5713 = vmatpush1.bf16.msra.mxu1 %v7906_v39  ;;  %v7995_v21 = vld [vmem:[%s11177_s1 + $0xdc4] ss:$16 sps:$4 sm:$0xff]   ;;  %v7998_v39 = vld [vmem:[%s11177_s1 + $0xdcc] ss:$16 sps:$4 sm:$0xff]  }
 0x180   :  { %5190 = vmatprep.subr.bf16.mxu0 %v7911_v40  ;;  %5723 = vmatprep.subr.bf16.mxu1 %v7914_v41  ;;  %v7993_v40 = vld [vmem:[%s11177_s1 + $0xdc0] ss:$16 sps:$4 sm:$0xff]   ;;  %v7996_v41 = vld [vmem:[%s11177_s1 + $0xdc8] ss:$16 sps:$4 sm:$0xff]  }
 0x182   :  { %5182 = vmatmul.mubr.bf16.vlgmr.msra.gmra.mrb[0].mxu0 %v929_v43  ;;  %5715 = vmatmul.mubr.bf16.vlgmr.msra.gmra.mrb[0].mxu1 %v929_v43  ;;  %v8004_v43 = vld [vmem:[%s11177_s1 + $0xdec] ss:$16 sps:$4 sm:$0xff]  }
 0x183   :  { %5191 = vmatpush1.bf16.msra.mxu0 %v7909_v44  ;;  %5724 = vmatpush1.bf16.msra.mxu1 %v7912_v45  ;;  %v7999_v44 = vld [vmem:[%s11177_s1 + $0xde0] ss:$16 sps:$4 sm:$0xff]   ;;  %v8002_v45 = vld [vmem:[%s11177_s1 + $0xde8] ss:$16 sps:$4 sm:$0xff]  }
 0x184   :  { %5192 = vmatprep.subr.bf16.mxu0 %v7917_v46  ;;  %5725 = vmatprep.subr.bf16.mxu1 %v7920_v35  ;;  %v8008_v46 = vld [vmem:[%s11177_s1 + $0xe04] ss:$16 sps:$4 sm:$0xff]   ;;  %v8011_v35 = vld [vmem:[%s11177_s1 + $0xe0c] ss:$16 sps:$4 sm:$0xff]  }
 0x185   :  { %5222 = vmatprep.mubr.bf16.mxu0 %v9820_v47  ;;  %5755 = vmatprep.mubr.bf16.mxu1 %v9820_v47 }
 0x187   :  { %5193 = vmatpush1.bf16.msra.mxu0 %v7915_v48  ;;  %5726 = vmatpush1.bf16.msra.mxu1 %v7918_v50  ;;  %v10006_v48 = vrot.slane %v9789_v38, %v8712_v49  ;;  %v8006_v50 = vld [vmem:[%s11177_s1 + $0xe00] ss:$16 sps:$4 sm:$0xff]   ;;  %v8017_v38 = vld [vmem:[%s11177_s1 + $0xe2c] ss:$16 sps:$4 sm:$0xff]  }
 0x188   :  { %5194 = vmatprep.subr.bf16.mxu0 %v7923_v51  ;;  %5727 = vmatprep.subr.bf16.mxu1 %v7926_v53  ;;  %v8009_v51 = vld [vmem:[%s11177_s1 + $0xe08] ss:$16 sps:$4 sm:$0xff]   ;;  %v8014_v53 = vld [vmem:[%s11177_s1 + $0xe24] ss:$16 sps:$4 sm:$0xff]  }
 0x18b   :  { %5195 = vmatpush1.bf16.msra.mxu0 %v7921_v54  ;;  %5728 = vmatpush1.bf16.msra.mxu1 %v7924_v55  ;;  %v932_v54 = vcombine.high %v9820_v47, %v9820_v47  ;;  %v8012_v55 = vld [vmem:[%s11177_s1 + $0xe20] ss:$16 sps:$4 sm:$0xff]   ;;  %v8020_v47 = vld [vmem:[%s11177_s1 + $0xe44] ss:$16 sps:$4 sm:$0xff]  }
 0x18c   :  { %5196 = vmatprep.subr.bf16.mxu0 %v7929_v56  ;;  %5729 = vmatprep.subr.bf16.mxu1 %v7932_v57  ;;  %v8015_v56 = vld [vmem:[%s11177_s1 + $0xe28] ss:$16 sps:$4 sm:$0xff]   ;;  %v8023_v57 = vld [vmem:[%s11177_s1 + $0xe4c] ss:$16 sps:$4 sm:$0xff]  }
 0x18f   :  { %5197 = vmatpush1.bf16.msra.mxu0 %v7927_v58  ;;  %5730 = vmatpush1.bf16.msra.mxu1 %v7930_v59  ;;  %v8018_v58 = vld [vmem:[%s11177_s1 + $0xe40] ss:$16 sps:$4 sm:$0xff]   ;;  %v8021_v59 = vld [vmem:[%s11177_s1 + $0xe48] ss:$16 sps:$4 sm:$0xff]  }
 0x190   :  { %5198 = vmatprep.subr.bf16.mxu0 %v7935_v60  ;;  %5731 = vmatprep.subr.bf16.mxu1 %v7938_v61  ;;  %v8026_v60 = vld [vmem:[%s11177_s1 + $0xe64] ss:$16 sps:$4 sm:$0xff]   ;;  %v8029_v61 = vld [vmem:[%s11177_s1 + $0xe6c] ss:$16 sps:$4 sm:$0xff]  }
 0x193   :  { %5199 = vmatpush1.bf16.msra.mxu0 %v7933_v62  ;;  %5732 = vmatpush1.bf16.msra.mxu1 %v7936_v63  ;;  %v8024_v62 = vld [vmem:[%s11177_s1 + $0xe60] ss:$16 sps:$4 sm:$0xff]   ;;  %v8027_v63 = vld [vmem:[%s11177_s1 + $0xe68] ss:$16 sps:$4 sm:$0xff]  }
 0x194   :  { %5200 = vmatprep.subr.bf16.mxu0 %v7941_v0  ;;  %5733 = vmatprep.subr.bf16.mxu1 %v7944_v1  ;;  %v8032_v0 = vld [vmem:[%s11177_s1 + $0xe84] ss:$16 sps:$4 sm:$0xff]   ;;  %v8035_v1 = vld [vmem:[%s11177_s1 + $0xe8c] ss:$16 sps:$4 sm:$0xff]  }
 0x197   :  { %5201 = vmatpush1.bf16.msra.mxu0 %v7939_v2  ;;  %5734 = vmatpush1.bf16.msra.mxu1 %v7942_v3  ;;  %v8030_v2 = vld [vmem:[%s11177_s1 + $0xe80] ss:$16 sps:$4 sm:$0xff]   ;;  %v8033_v3 = vld [vmem:[%s11177_s1 + $0xe88] ss:$16 sps:$4 sm:$0xff]  }
 0x198   :  { %5202 = vmatprep.subr.bf16.mxu0 %v7947_v4  ;;  %5735 = vmatprep.subr.bf16.mxu1 %v7950_v5  ;;  %v8038_v4 = vld [vmem:[%s11177_s1 + $0xea4] ss:$16 sps:$4 sm:$0xff]   ;;  %v8041_v5 = vld [vmem:[%s11177_s1 + $0xeac] ss:$16 sps:$4 sm:$0xff]  }
 0x19b   :  { %5203 = vmatpush1.bf16.msra.mxu0 %v7945_v6  ;;  %5736 = vmatpush1.bf16.msra.mxu1 %v7948_v7  ;;  %v8036_v6 = vld [vmem:[%s11177_s1 + $0xea0] ss:$16 sps:$4 sm:$0xff]   ;;  %v8039_v7 = vld [vmem:[%s11177_s1 + $0xea8] ss:$16 sps:$4 sm:$0xff]  }
 0x19c   :  { %5204 = vmatprep.subr.bf16.mxu0 %v7953_v8  ;;  %5737 = vmatprep.subr.bf16.mxu1 %v7956_v9  ;;  %v8044_v8 = vld [vmem:[%s11177_s1 + $0xec4] ss:$16 sps:$4 sm:$0xff]   ;;  %v8047_v9 = vld [vmem:[%s11177_s1 + $0xecc] ss:$16 sps:$4 sm:$0xff]  }
 0x19f   :  { %5205 = vmatpush1.bf16.msra.mxu0 %v7951_v10  ;;  %5738 = vmatpush1.bf16.msra.mxu1 %v7954_v11  ;;  %v8042_v10 = vld [vmem:[%s11177_s1 + $0xec0] ss:$16 sps:$4 sm:$0xff]   ;;  %v8045_v11 = vld [vmem:[%s11177_s1 + $0xec8] ss:$16 sps:$4 sm:$0xff]  }
 0x1a0   :  { %5206 = vmatprep.subr.bf16.mxu0 %v7959_v12  ;;  %5739 = vmatprep.subr.bf16.mxu1 %v7962_v52  ;;  %v8050_v12 = vld [vmem:[%s11177_s1 + $0xee4] ss:$16 sps:$4 sm:$0xff]   ;;  %v8053_v52 = vld [vmem:[%s11177_s1 + $0xeec] ss:$16 sps:$4 sm:$0xff]  }
 0x1a3   :  { %5207 = vmatpush1.bf16.msra.mxu0 %v7957_v15  ;;  %5740 = vmatpush1.bf16.msra.mxu1 %v7960_v16  ;;  %v8048_v15 = vld [vmem:[%s11177_s1 + $0xee0] ss:$16 sps:$4 sm:$0xff]   ;;  %v8051_v16 = vld [vmem:[%s11177_s1 + $0xee8] ss:$16 sps:$4 sm:$0xff]  }
 0x1a4   :  { %5208 = vmatprep.subr.bf16.mxu0 %v7965_v17  ;;  %5741 = vmatprep.subr.bf16.mxu1 %v7968_v18  ;;  %v8056_v17 = vld [vmem:[%s11177_s1 + $0xf04] ss:$16 sps:$4 sm:$0xff]   ;;  %v8059_v18 = vld [vmem:[%s11177_s1 + $0xf0c] ss:$16 sps:$4 sm:$0xff]  }
 0x1a7   :  { %5209 = vmatpush1.bf16.msra.mxu0 %v7963_v19  ;;  %5742 = vmatpush1.bf16.msra.mxu1 %v7966_v20  ;;  %v8054_v19 = vld [vmem:[%s11177_s1 + $0xf00] ss:$16 sps:$4 sm:$0xff]   ;;  %v8057_v20 = vld [vmem:[%s11177_s1 + $0xf08] ss:$16 sps:$4 sm:$0xff]  }
 0x1a8   :  { %5210 = vmatprep.subr.bf16.mxu0 %v7971_v22  ;;  %5743 = vmatprep.subr.bf16.mxu1 %v7974_v23  ;;  %v8062_v22 = vld [vmem:[%s11177_s1 + $0xf24] ss:$16 sps:$4 sm:$0xff]   ;;  %v8065_v23 = vld [vmem:[%s11177_s1 + $0xf2c] ss:$16 sps:$4 sm:$0xff]  }
 0x1ab   :  { %5211 = vmatpush1.bf16.msra.mxu0 %v7969_v24  ;;  %5744 = vmatpush1.bf16.msra.mxu1 %v7972_v13  ;;  %v8060_v24 = vld [vmem:[%s11177_s1 + $0xf20] ss:$16 sps:$4 sm:$0xff]   ;;  %v8063_v13 = vld [vmem:[%s11177_s1 + $0xf28] ss:$16 sps:$4 sm:$0xff]  }
 0x1ac   :  { %5212 = vmatprep.subr.bf16.mxu0 %v7977_v27  ;;  %5745 = vmatprep.subr.bf16.mxu1 %v7980_v28  ;;  %v8068_v27 = vld [vmem:[%s11177_s1 + $0xf44] ss:$16 sps:$4 sm:$0xff]   ;;  %v8071_v28 = vld [vmem:[%s11177_s1 + $0xf4c] ss:$16 sps:$4 sm:$0xff]  }
 0x1af   :  { %5213 = vmatpush1.bf16.msra.mxu0 %v7975_v29  ;;  %5746 = vmatpush1.bf16.msra.mxu1 %v7978_v14  ;;  %v8066_v29 = vld [vmem:[%s11177_s1 + $0xf40] ss:$16 sps:$4 sm:$0xff]   ;;  %v8069_v14 = vld [vmem:[%s11177_s1 + $0xf48] ss:$16 sps:$4 sm:$0xff]  }
 0x1b0   :  { %5214 = vmatprep.subr.bf16.mxu0 %v7983_v30  ;;  %5747 = vmatprep.subr.bf16.mxu1 %v7986_v31  ;;  %v8074_v30 = vld [vmem:[%s11177_s1 + $0xf64] ss:$16 sps:$4 sm:$0xff]   ;;  %v8077_v31 = vld [vmem:[%s11177_s1 + $0xf6c] ss:$16 sps:$4 sm:$0xff]  }
 0x1b3   :  { %5215 = vmatpush1.bf16.msra.mxu0 %v7981_v25  ;;  %5748 = vmatpush1.bf16.msra.mxu1 %v7984_v32  ;;  %v8072_v25 = vld [vmem:[%s11177_s1 + $0xf60] ss:$16 sps:$4 sm:$0xff]   ;;  %v8075_v32 = vld [vmem:[%s11177_s1 + $0xf68] ss:$16 sps:$4 sm:$0xff]  }
 0x1b4   :  { %5216 = vmatprep.subr.bf16.mxu0 %v7989_v33  ;;  %5749 = vmatprep.subr.bf16.mxu1 %v7992_v26  ;;  %v8080_v33 = vld [vmem:[%s11177_s1 + $0xf84] ss:$16 sps:$4 sm:$0xff]   ;;  %v8083_v26 = vld [vmem:[%s11177_s1 + $0xf8c] ss:$16 sps:$4 sm:$0xff]  }
 0x1b7   :  { %5217 = vmatpush1.bf16.msra.mxu0 %v7987_v36  ;;  %5750 = vmatpush1.bf16.msra.mxu1 %v7990_v37  ;;  %v8078_v36 = vld [vmem:[%s11177_s1 + $0xf80] ss:$16 sps:$4 sm:$0xff]   ;;  %v8081_v37 = vld [vmem:[%s11177_s1 + $0xf88] ss:$16 sps:$4 sm:$0xff]  }
 0x1b8   :  { %5218 = vmatprep.subr.bf16.mxu0 %v7995_v21  ;;  %5751 = vmatprep.subr.bf16.mxu1 %v7998_v39  ;;  %v8086_v21 = vld [vmem:[%s11177_s1 + $0xfa4] ss:$16 sps:$4 sm:$0xff]   ;;  %v8089_v39 = vld [vmem:[%s11177_s1 + $0xfac] ss:$16 sps:$4 sm:$0xff]  }
 0x1bb   :  { %5219 = vmatpush1.bf16.msra.mxu0 %v7993_v40  ;;  %5752 = vmatpush1.bf16.msra.mxu1 %v7996_v41  ;;  %v8084_v40 = vld [vmem:[%s11177_s1 + $0xfa0] ss:$16 sps:$4 sm:$0xff]   ;;  %v8087_v41 = vld [vmem:[%s11177_s1 + $0xfa8] ss:$16 sps:$4 sm:$0xff]  }
 0x1bc   :  { %5220 = vmatprep.subr.bf16.mxu0 %v8001_v34  ;;  %5753 = vmatprep.subr.bf16.mxu1 %v8004_v43  ;;  %v8092_v34 = vld [vmem:[%s11177_s1 + $0xfc4] ss:$16 sps:$4 sm:$0xff]   ;;  %v8095_v43 = vld [vmem:[%s11177_s1 + $0xfcc] ss:$16 sps:$4 sm:$0xff]  }
 0x1bf   :  { %5221 = vmatpush1.bf16.msra.mxu0 %v7999_v44  ;;  %5754 = vmatpush1.bf16.msra.mxu1 %v8002_v45  ;;  %v10183_v44 = vld [vmem:[%s11178_s0 + $0x10] sm:$0xff] }
 0x1c0   :  { %5231 = vmatprep.subr.bf16.mxu0 %v8008_v46  ;;  %5764 = vmatprep.subr.bf16.mxu1 %v8011_v35  ;;  %v8090_v45 = vld [vmem:[%s11177_s1 + $0xfc0] ss:$16 sps:$4 sm:$0xff]   ;;  %v8093_v46 = vld [vmem:[%s11177_s1 + $0xfc8] ss:$16 sps:$4 sm:$0xff]   ;;  %v8098_v35 = vld [vmem:[%s11177_s1 + $0xfe4] ss:$16 sps:$4 sm:$0xff]  }
 0x1c2   :  { %5223 = vmatmul.mubr.bf16.vlgmr.msra.gmra.mrb[0].mxu0 %v10006_v48  ;;  %5756 = vmatmul.mubr.bf16.vlgmr.msra.gmra.mrb[0].mxu1 %v10006_v48 }
 0x1c3   :  { %5232 = vmatpush1.bf16.msra.mxu0 %v8006_v50  ;;  %5765 = vmatpush1.bf16.msra.mxu1 %v8009_v51  ;;  %v8101_v50 = vld [vmem:[%s11177_s1 + $0xfec] ss:$16 sps:$4 sm:$0xff]   ;;  %v10199_v51 = vrot.slane %v10183_v44, %v8712_v49 }
 0x1c4   :  { %5233 = vmatprep.subr.bf16.mxu0 %v8014_v53  ;;  %5766 = vmatprep.subr.bf16.mxu1 %v8017_v38  ;;  %v8096_v53 = vld [vmem:[%s11177_s1 + $0xfe0] ss:$16 sps:$4 sm:$0xff]   ;;  %v8099_v38 = vld [vmem:[%s11177_s1 + $0xfe8] ss:$16 sps:$4 sm:$0xff]  }
 0x1c5   :  { %5263 = vmatprep.mubr.bf16.mxu0 %v932_v54  ;;  %5796 = vmatprep.mubr.bf16.mxu1 %v932_v54  ;;  %v8104_v54 = vld [vmem:[%s11177_s1 + $0x1004] ss:$16 sps:$4 sm:$0xff]  }
 0x1c7   :  { %5234 = vmatpush1.bf16.msra.mxu0 %v8012_v55  ;;  %5767 = vmatpush1.bf16.msra.mxu1 %v8015_v56  ;;  %v8107_v55 = vld [vmem:[%s11177_s1 + $0x100c] ss:$16 sps:$4 sm:$0xff]   ;;  %v948_v56 = vcombine.high %v10199_v51, %v10199_v51 }
 0x1c8   :  { %5235 = vmatprep.subr.bf16.mxu0 %v8020_v47  ;;  %5768 = vmatprep.subr.bf16.mxu1 %v8023_v57  ;;  %v930_v47 = vcombine.high %v10006_v48, %v10006_v48  ;;  %v8102_v57 = vld [vmem:[%s11177_s1 + $0x1000] ss:$16 sps:$4 sm:$0xff]   ;;  %v8113_v48 = vld [vmem:[%s11177_s1 + $0x102c] ss:$16 sps:$4 sm:$0xff]  }
 0x1cb   :  { %5236 = vmatpush1.bf16.msra.mxu0 %v8018_v58  ;;  %5769 = vmatpush1.bf16.msra.mxu1 %v8021_v59  ;;  %v8105_v58 = vld [vmem:[%s11177_s1 + $0x1008] ss:$16 sps:$4 sm:$0xff]   ;;  %v8110_v59 = vld [vmem:[%s11177_s1 + $0x1024] ss:$16 sps:$4 sm:$0xff]  }
 0x1cc   :  { %5237 = vmatprep.subr.bf16.mxu0 %v8026_v60  ;;  %5770 = vmatprep.subr.bf16.mxu1 %v8029_v61  ;;  %v10230_v60 = vrot.slane %v948_v56, %v8712_v49  ;;  %v8108_v61 = vld [vmem:[%s11177_s1 + $0x1020] ss:$16 sps:$4 sm:$0xff]   ;;  %v8189_v56 = vld [vmem:[%s11177_s1 + $0x11c8] ss:$16 sps:$4 sm:$0xff]  }
 0x1cf   :  { %5238 = vmatpush1.bf16.msra.mxu0 %v8024_v62  ;;  %5771 = vmatpush1.bf16.msra.mxu1 %v8027_v63  ;;  %v8111_v62 = vld [vmem:[%s11177_s1 + $0x1028] ss:$16 sps:$4 sm:$0xff]   ;;  %v8116_v63 = vld [vmem:[%s11177_s1 + $0x1044] ss:$16 sps:$4 sm:$0xff]  }
 0x1d0   :  { %5239 = vmatprep.subr.bf16.mxu0 %v8032_v0  ;;  %5772 = vmatprep.subr.bf16.mxu1 %v8035_v1  ;;  %v8119_v0 = vld [vmem:[%s11177_s1 + $0x104c] ss:$16 sps:$4 sm:$0xff]   ;;  %v8114_v1 = vld [vmem:[%s11177_s1 + $0x1040] ss:$16 sps:$4 sm:$0xff]  }
 0x1d3   :  { %5240 = vmatpush1.bf16.msra.mxu0 %v8030_v2  ;;  %5773 = vmatpush1.bf16.msra.mxu1 %v8033_v3  ;;  %v8117_v2 = vld [vmem:[%s11177_s1 + $0x1048] ss:$16 sps:$4 sm:$0xff]   ;;  %v8122_v3 = vld [vmem:[%s11177_s1 + $0x1064] ss:$16 sps:$4 sm:$0xff]  }
 0x1d4   :  { %5241 = vmatprep.subr.bf16.mxu0 %v8038_v4  ;;  %5774 = vmatprep.subr.bf16.mxu1 %v8041_v5  ;;  %v8125_v4 = vld [vmem:[%s11177_s1 + $0x106c] ss:$16 sps:$4 sm:$0xff]   ;;  %v8120_v5 = vld [vmem:[%s11177_s1 + $0x1060] ss:$16 sps:$4 sm:$0xff]  }
 0x1d7   :  { %5242 = vmatpush1.bf16.msra.mxu0 %v8036_v6  ;;  %5775 = vmatpush1.bf16.msra.mxu1 %v8039_v7  ;;  %v8123_v6 = vld [vmem:[%s11177_s1 + $0x1068] ss:$16 sps:$4 sm:$0xff]   ;;  %v8128_v7 = vld [vmem:[%s11177_s1 + $0x1084] ss:$16 sps:$4 sm:$0xff]  }
 0x1d8   :  { %5243 = vmatprep.subr.bf16.mxu0 %v8044_v8  ;;  %5776 = vmatprep.subr.bf16.mxu1 %v8047_v9  ;;  %v8131_v8 = vld [vmem:[%s11177_s1 + $0x108c] ss:$16 sps:$4 sm:$0xff]   ;;  %v8126_v9 = vld [vmem:[%s11177_s1 + $0x1080] ss:$16 sps:$4 sm:$0xff]  }
 0x1db   :  { %5244 = vmatpush1.bf16.msra.mxu0 %v8042_v10  ;;  %5777 = vmatpush1.bf16.msra.mxu1 %v8045_v11  ;;  %v8129_v10 = vld [vmem:[%s11177_s1 + $0x1088] ss:$16 sps:$4 sm:$0xff]   ;;  %v8134_v11 = vld [vmem:[%s11177_s1 + $0x10a4] ss:$16 sps:$4 sm:$0xff]  }
 0x1dc   :  { %5245 = vmatprep.subr.bf16.mxu0 %v8050_v12  ;;  %5778 = vmatprep.subr.bf16.mxu1 %v8053_v52  ;;  %v8137_v12 = vld [vmem:[%s11177_s1 + $0x10ac] ss:$16 sps:$4 sm:$0xff]   ;;  %v8132_v52 = vld [vmem:[%s11177_s1 + $0x10a0] ss:$16 sps:$4 sm:$0xff]  }
 0x1df   :  { %5246 = vmatpush1.bf16.msra.mxu0 %v8048_v15  ;;  %5779 = vmatpush1.bf16.msra.mxu1 %v8051_v16  ;;  %v8135_v15 = vld [vmem:[%s11177_s1 + $0x10a8] ss:$16 sps:$4 sm:$0xff]   ;;  %v8140_v16 = vld [vmem:[%s11177_s1 + $0x10c4] ss:$16 sps:$4 sm:$0xff]  }
 0x1e0   :  { %5247 = vmatprep.subr.bf16.mxu0 %v8056_v17  ;;  %5780 = vmatprep.subr.bf16.mxu1 %v8059_v18  ;;  %v8143_v17 = vld [vmem:[%s11177_s1 + $0x10cc] ss:$16 sps:$4 sm:$0xff]   ;;  %v8138_v18 = vld [vmem:[%s11177_s1 + $0x10c0] ss:$16 sps:$4 sm:$0xff]  }
 0x1e3   :  { %5248 = vmatpush1.bf16.msra.mxu0 %v8054_v19  ;;  %5781 = vmatpush1.bf16.msra.mxu1 %v8057_v20  ;;  %v8141_v19 = vld [vmem:[%s11177_s1 + $0x10c8] ss:$16 sps:$4 sm:$0xff]   ;;  %v8146_v20 = vld [vmem:[%s11177_s1 + $0x10e4] ss:$16 sps:$4 sm:$0xff]  }
 0x1e4   :  { %5249 = vmatprep.subr.bf16.mxu0 %v8062_v22  ;;  %5782 = vmatprep.subr.bf16.mxu1 %v8065_v23  ;;  %v8149_v22 = vld [vmem:[%s11177_s1 + $0x10ec] ss:$16 sps:$4 sm:$0xff]   ;;  %v8144_v23 = vld [vmem:[%s11177_s1 + $0x10e0] ss:$16 sps:$4 sm:$0xff]  }
 0x1e7   :  { %5250 = vmatpush1.bf16.msra.mxu0 %v8060_v24  ;;  %5783 = vmatpush1.bf16.msra.mxu1 %v8063_v13  ;;  %v8147_v24 = vld [vmem:[%s11177_s1 + $0x10e8] ss:$16 sps:$4 sm:$0xff]   ;;  %v8152_v13 = vld [vmem:[%s11177_s1 + $0x1104] ss:$16 sps:$4 sm:$0xff]  }
 0x1e8   :  { %5251 = vmatprep.subr.bf16.mxu0 %v8068_v27  ;;  %5784 = vmatprep.subr.bf16.mxu1 %v8071_v28  ;;  %v8155_v27 = vld [vmem:[%s11177_s1 + $0x110c] ss:$16 sps:$4 sm:$0xff]   ;;  %v8150_v28 = vld [vmem:[%s11177_s1 + $0x1100] ss:$16 sps:$4 sm:$0xff]  }
 0x1eb   :  { %5252 = vmatpush1.bf16.msra.mxu0 %v8066_v29  ;;  %5785 = vmatpush1.bf16.msra.mxu1 %v8069_v14  ;;  %v8153_v29 = vld [vmem:[%s11177_s1 + $0x1108] ss:$16 sps:$4 sm:$0xff]   ;;  %v8158_v14 = vld [vmem:[%s11177_s1 + $0x1124] ss:$16 sps:$4 sm:$0xff]  }
 0x1ec   :  { %5253 = vmatprep.subr.bf16.mxu0 %v8074_v30  ;;  %5786 = vmatprep.subr.bf16.mxu1 %v8077_v31  ;;  %v8161_v30 = vld [vmem:[%s11177_s1 + $0x112c] ss:$16 sps:$4 sm:$0xff]   ;;  %v8156_v31 = vld [vmem:[%s11177_s1 + $0x1120] ss:$16 sps:$4 sm:$0xff]  }
 0x1ef   :  { %5254 = vmatpush1.bf16.msra.mxu0 %v8072_v25  ;;  %5787 = vmatpush1.bf16.msra.mxu1 %v8075_v32  ;;  %v8159_v25 = vld [vmem:[%s11177_s1 + $0x1128] ss:$16 sps:$4 sm:$0xff]   ;;  %v8164_v32 = vld [vmem:[%s11177_s1 + $0x1144] ss:$16 sps:$4 sm:$0xff]  }
 0x1f0   :  { %5255 = vmatprep.subr.bf16.mxu0 %v8080_v33  ;;  %5788 = vmatprep.subr.bf16.mxu1 %v8083_v26  ;;  %v8167_v33 = vld [vmem:[%s11177_s1 + $0x114c] ss:$16 sps:$4 sm:$0xff]   ;;  %v8162_v26 = vld [vmem:[%s11177_s1 + $0x1140] ss:$16 sps:$4 sm:$0xff]  }
 0x1f3   :  { %5256 = vmatpush1.bf16.msra.mxu0 %v8078_v36  ;;  %5789 = vmatpush1.bf16.msra.mxu1 %v8081_v37  ;;  %v8165_v36 = vld [vmem:[%s11177_s1 + $0x1148] ss:$16 sps:$4 sm:$0xff]   ;;  %v8170_v37 = vld [vmem:[%s11177_s1 + $0x1164] ss:$16 sps:$4 sm:$0xff]  }
 0x1f4   :  { %5257 = vmatprep.subr.bf16.mxu0 %v8086_v21  ;;  %5790 = vmatprep.subr.bf16.mxu1 %v8089_v39  ;;  %v8173_v21 = vld [vmem:[%s11177_s1 + $0x116c] ss:$16 sps:$4 sm:$0xff]   ;;  %v8168_v39 = vld [vmem:[%s11177_s1 + $0x1160] ss:$16 sps:$4 sm:$0xff]  }
 0x1f7   :  { %5258 = vmatpush1.bf16.msra.mxu0 %v8084_v40  ;;  %5791 = vmatpush1.bf16.msra.mxu1 %v8087_v41  ;;  %v8171_v40 = vld [vmem:[%s11177_s1 + $0x1168] ss:$16 sps:$4 sm:$0xff]   ;;  %v8176_v41 = vld [vmem:[%s11177_s1 + $0x1184] ss:$16 sps:$4 sm:$0xff]  }
 0x1f8   :  { %5259 = vmatprep.subr.bf16.mxu0 %v8092_v34  ;;  %5792 = vmatprep.subr.bf16.mxu1 %v8095_v43  ;;  %v8179_v34 = vld [vmem:[%s11177_s1 + $0x118c] ss:$16 sps:$4 sm:$0xff]   ;;  %v8174_v43 = vld [vmem:[%s11177_s1 + $0x1180] ss:$16 sps:$4 sm:$0xff]  }
 0x1fb   :  { %5260 = vmatpush1.bf16.msra.mxu0 %v8090_v45  ;;  %5793 = vmatpush1.bf16.msra.mxu1 %v8093_v46  ;;  %v8177_v45 = vld [vmem:[%s11177_s1 + $0x1188] ss:$16 sps:$4 sm:$0xff]   ;;  %v8182_v46 = vld [vmem:[%s11177_s1 + $0x11a4] ss:$16 sps:$4 sm:$0xff]  }
 0x1fc   :  { %5261 = vmatprep.subr.bf16.mxu0 %v8098_v35  ;;  %5794 = vmatprep.subr.bf16.mxu1 %v8101_v50  ;;  %v8185_v35 = vld [vmem:[%s11177_s1 + $0x11ac] ss:$16 sps:$4 sm:$0xff]   ;;  %v8180_v50 = vld [vmem:[%s11177_s1 + $0x11a0] ss:$16 sps:$4 sm:$0xff]  }
 0x1ff   :  { %5262 = vmatpush1.bf16.msra.mxu0 %v8096_v53  ;;  %5795 = vmatpush1.bf16.msra.mxu1 %v8099_v38  ;;  %v8183_v53 = vld [vmem:[%s11177_s1 + $0x11a8] ss:$16 sps:$4 sm:$0xff]   ;;  %v8188_v38 = vld [vmem:[%s11177_s1 + $0x11c4] ss:$16 sps:$4 sm:$0xff]  }
 0x200   :  { %5272 = vmatprep.subr.bf16.mxu0 %v8104_v54  ;;  %5805 = vmatprep.subr.bf16.mxu1 %v8107_v55  ;;  %v8191_v54 = vld [vmem:[%s11177_s1 + $0x11cc] ss:$16 sps:$4 sm:$0xff]   ;;  %v8186_v55 = vld [vmem:[%s11177_s1 + $0x11c0] ss:$16 sps:$4 sm:$0xff]  }
 0x202   :  { %5264 = vmatmul.mubr.bf16.vlgmr.msra.gmra.mrb[0].mxu0 %v930_v47  ;;  %5797 = vmatmul.mubr.bf16.vlgmr.msra.gmra.mrb[0].mxu1 %v930_v47  ;;  %v8194_v47 = vld [vmem:[%s11177_s1 + $0x11e4] ss:$16 sps:$4 sm:$0xff]  }
 0x203   :  { %5273 = vmatpush1.bf16.msra.mxu0 %v8102_v57  ;;  %5806 = vmatpush1.bf16.msra.mxu1 %v8105_v58  ;;  %v8197_v57 = vld [vmem:[%s11177_s1 + $0x11ec] ss:$16 sps:$4 sm:$0xff]   ;;  %v8192_v58 = vld [vmem:[%s11177_s1 + $0x11e0] ss:$16 sps:$4 sm:$0xff]  }
 0x204   :  { %5274 = vmatprep.subr.bf16.mxu0 %v8110_v59  ;;  %5807 = vmatprep.subr.bf16.mxu1 %v8113_v48  ;;  %v8195_v59 = vld [vmem:[%s11177_s1 + $0x11e8] ss:$16 sps:$4 sm:$0xff]   ;;  %v8200_v48 = vld [vmem:[%s11177_s1 + $0x1204] ss:$16 sps:$4 sm:$0xff]  }
 0x205   :  { %5304 = vmatprep.mubr.bf16.mxu0 %v10230_v60  ;;  %5837 = vmatprep.mubr.bf16.mxu1 %v10230_v60 }
 0x207   :  { %5275 = vmatpush1.bf16.msra.mxu0 %v8108_v61  ;;  %5808 = vmatpush1.bf16.msra.mxu1 %v8111_v62  ;;  %v8203_v61 = vld [vmem:[%s11177_s1 + $0x120c] ss:$16 sps:$4 sm:$0xff]   ;;  %v10416_v62 = vrot.slane %v10199_v51, %v8712_v49 }
 0x208   :  { %5276 = vmatprep.subr.bf16.mxu0 %v8116_v63  ;;  %5809 = vmatprep.subr.bf16.mxu1 %v8119_v0  ;;  %v8198_v63 = vld [vmem:[%s11177_s1 + $0x1200] ss:$16 sps:$4 sm:$0xff]   ;;  %v8201_v0 = vld [vmem:[%s11177_s1 + $0x1208] ss:$16 sps:$4 sm:$0xff]   ;;  %v8209_v51 = vld [vmem:[%s11177_s1 + $0x122c] ss:$16 sps:$4 sm:$0xff]  }
 0x20b   :  { %5277 = vmatpush1.bf16.msra.mxu0 %v8114_v1  ;;  %5810 = vmatpush1.bf16.msra.mxu1 %v8117_v2  ;;  %v8206_v1 = vld [vmem:[%s11177_s1 + $0x1224] ss:$16 sps:$4 sm:$0xff]   ;;  %v980_v2 = vcombine.high %v10230_v60, %v10230_v60 }
 0x20c   :  { %5278 = vmatprep.subr.bf16.mxu0 %v8122_v3  ;;  %5811 = vmatprep.subr.bf16.mxu1 %v8125_v4  ;;  %v8204_v3 = vld [vmem:[%s11177_s1 + $0x1220] ss:$16 sps:$4 sm:$0xff]   ;;  %v8207_v4 = vld [vmem:[%s11177_s1 + $0x1228] ss:$16 sps:$4 sm:$0xff]   ;;  %v8212_v60 = vld [vmem:[%s11177_s1 + $0x1244] ss:$16 sps:$4 sm:$0xff]  }
 0x20f   :  { %5279 = vmatpush1.bf16.msra.mxu0 %v8120_v5  ;;  %5812 = vmatpush1.bf16.msra.mxu1 %v8123_v6  ;;  %v8215_v5 = vld [vmem:[%s11177_s1 + $0x124c] ss:$16 sps:$4 sm:$0xff]   ;;  %v8210_v6 = vld [vmem:[%s11177_s1 + $0x1240] ss:$16 sps:$4 sm:$0xff]  }
 0x210   :  { %5280 = vmatprep.subr.bf16.mxu0 %v8128_v7  ;;  %5813 = vmatprep.subr.bf16.mxu1 %v8131_v8  ;;  %v8213_v7 = vld [vmem:[%s11177_s1 + $0x1248] ss:$16 sps:$4 sm:$0xff]   ;;  %v8218_v8 = vld [vmem:[%s11177_s1 + $0x1264] ss:$16 sps:$4 sm:$0xff]  }
 0x213   :  { %5281 = vmatpush1.bf16.msra.mxu0 %v8126_v9  ;;  %5814 = vmatpush1.bf16.msra.mxu1 %v8129_v10  ;;  %v8221_v9 = vld [vmem:[%s11177_s1 + $0x126c] ss:$16 sps:$4 sm:$0xff]   ;;  %v8216_v10 = vld [vmem:[%s11177_s1 + $0x1260] ss:$16 sps:$4 sm:$0xff]  }
 0x214   :  { %5282 = vmatprep.subr.bf16.mxu0 %v8134_v11  ;;  %5815 = vmatprep.subr.bf16.mxu1 %v8137_v12  ;;  %v8219_v11 = vld [vmem:[%s11177_s1 + $0x1268] ss:$16 sps:$4 sm:$0xff]   ;;  %v8224_v12 = vld [vmem:[%s11177_s1 + $0x1284] ss:$16 sps:$4 sm:$0xff]  }
 0x217   :  { %5283 = vmatpush1.bf16.msra.mxu0 %v8132_v52  ;;  %5816 = vmatpush1.bf16.msra.mxu1 %v8135_v15  ;;  %v8227_v52 = vld [vmem:[%s11177_s1 + $0x128c] ss:$16 sps:$4 sm:$0xff]   ;;  %v8222_v15 = vld [vmem:[%s11177_s1 + $0x1280] ss:$16 sps:$4 sm:$0xff]  }
 0x218   :  { %5284 = vmatprep.subr.bf16.mxu0 %v8140_v16  ;;  %5817 = vmatprep.subr.bf16.mxu1 %v8143_v17  ;;  %v8225_v16 = vld [vmem:[%s11177_s1 + $0x1288] ss:$16 sps:$4 sm:$0xff]   ;;  %v8230_v17 = vld [vmem:[%s11177_s1 + $0x12a4] ss:$16 sps:$4 sm:$0xff]  }
 0x21b   :  { %5285 = vmatpush1.bf16.msra.mxu0 %v8138_v18  ;;  %5818 = vmatpush1.bf16.msra.mxu1 %v8141_v19  ;;  %v8233_v18 = vld [vmem:[%s11177_s1 + $0x12ac] ss:$16 sps:$4 sm:$0xff]   ;;  %v8228_v19 = vld [vmem:[%s11177_s1 + $0x12a0] ss:$16 sps:$4 sm:$0xff]  }
 0x21c   :  { %5286 = vmatprep.subr.bf16.mxu0 %v8146_v20  ;;  %5819 = vmatprep.subr.bf16.mxu1 %v8149_v22  ;;  %v8231_v20 = vld [vmem:[%s11177_s1 + $0x12a8] ss:$16 sps:$4 sm:$0xff]   ;;  %v8236_v22 = vld [vmem:[%s11177_s1 + $0x12c4] ss:$16 sps:$4 sm:$0xff]  }
 0x21f   :  { %5287 = vmatpush1.bf16.msra.mxu0 %v8144_v23  ;;  %5820 = vmatpush1.bf16.msra.mxu1 %v8147_v24  ;;  %v8239_v23 = vld [vmem:[%s11177_s1 + $0x12cc] ss:$16 sps:$4 sm:$0xff]   ;;  %v8234_v24 = vld [vmem:[%s11177_s1 + $0x12c0] ss:$16 sps:$4 sm:$0xff]  }
 0x220   :  { %5288 = vmatprep.subr.bf16.mxu0 %v8152_v13  ;;  %5821 = vmatprep.subr.bf16.mxu1 %v8155_v27  ;;  %v8237_v13 = vld [vmem:[%s11177_s1 + $0x12c8] ss:$16 sps:$4 sm:$0xff]   ;;  %v8242_v27 = vld [vmem:[%s11177_s1 + $0x12e4] ss:$16 sps:$4 sm:$0xff]  }
 0x223   :  { %5289 = vmatpush1.bf16.msra.mxu0 %v8150_v28  ;;  %5822 = vmatpush1.bf16.msra.mxu1 %v8153_v29  ;;  %v8245_v28 = vld [vmem:[%s11177_s1 + $0x12ec] ss:$16 sps:$4 sm:$0xff]   ;;  %v8240_v29 = vld [vmem:[%s11177_s1 + $0x12e0] ss:$16 sps:$4 sm:$0xff]  }
 0x224   :  { %5290 = vmatprep.subr.bf16.mxu0 %v8158_v14  ;;  %5823 = vmatprep.subr.bf16.mxu1 %v8161_v30  ;;  %v8243_v14 = vld [vmem:[%s11177_s1 + $0x12e8] ss:$16 sps:$4 sm:$0xff]   ;;  %v8248_v30 = vld [vmem:[%s11177_s1 + $0x1304] ss:$16 sps:$4 sm:$0xff]  }
 0x227   :  { %5291 = vmatpush1.bf16.msra.mxu0 %v8156_v31  ;;  %5824 = vmatpush1.bf16.msra.mxu1 %v8159_v25  ;;  %v8251_v31 = vld [vmem:[%s11177_s1 + $0x130c] ss:$16 sps:$4 sm:$0xff]   ;;  %v8246_v25 = vld [vmem:[%s11177_s1 + $0x1300] ss:$16 sps:$4 sm:$0xff]  }
 0x228   :  { %5292 = vmatprep.subr.bf16.mxu0 %v8164_v32  ;;  %5825 = vmatprep.subr.bf16.mxu1 %v8167_v33  ;;  %v8249_v32 = vld [vmem:[%s11177_s1 + $0x1308] ss:$16 sps:$4 sm:$0xff]   ;;  %v8254_v33 = vld [vmem:[%s11177_s1 + $0x1324] ss:$16 sps:$4 sm:$0xff]  }
 0x22b   :  { %5293 = vmatpush1.bf16.msra.mxu0 %v8162_v26  ;;  %5826 = vmatpush1.bf16.msra.mxu1 %v8165_v36  ;;  %v8257_v26 = vld [vmem:[%s11177_s1 + $0x132c] ss:$16 sps:$4 sm:$0xff]   ;;  %v8252_v36 = vld [vmem:[%s11177_s1 + $0x1320] ss:$16 sps:$4 sm:$0xff]  }
 0x22c   :  { %5294 = vmatprep.subr.bf16.mxu0 %v8170_v37  ;;  %5827 = vmatprep.subr.bf16.mxu1 %v8173_v21  ;;  %v8255_v37 = vld [vmem:[%s11177_s1 + $0x1328] ss:$16 sps:$4 sm:$0xff]   ;;  %v8260_v21 = vld [vmem:[%s11177_s1 + $0x1344] ss:$16 sps:$4 sm:$0xff]  }
 0x22f   :  { %5295 = vmatpush1.bf16.msra.mxu0 %v8168_v39  ;;  %5828 = vmatpush1.bf16.msra.mxu1 %v8171_v40  ;;  %v8263_v39 = vld [vmem:[%s11177_s1 + $0x134c] ss:$16 sps:$4 sm:$0xff]   ;;  %v8258_v40 = vld [vmem:[%s11177_s1 + $0x1340] ss:$16 sps:$4 sm:$0xff]  }
 0x230   :  { %5296 = vmatprep.subr.bf16.mxu0 %v8176_v41  ;;  %5829 = vmatprep.subr.bf16.mxu1 %v8179_v34  ;;  %v8261_v41 = vld [vmem:[%s11177_s1 + $0x1348] ss:$16 sps:$4 sm:$0xff]   ;;  %v8266_v34 = vld [vmem:[%s11177_s1 + $0x1364] ss:$16 sps:$4 sm:$0xff]  }
 0x233   :  { %5297 = vmatpush1.bf16.msra.mxu0 %v8174_v43  ;;  %5830 = vmatpush1.bf16.msra.mxu1 %v8177_v45  ;;  %v8269_v43 = vld [vmem:[%s11177_s1 + $0x136c] ss:$16 sps:$4 sm:$0xff]   ;;  %v8264_v45 = vld [vmem:[%s11177_s1 + $0x1360] ss:$16 sps:$4 sm:$0xff]  }
 0x234   :  { %5298 = vmatprep.subr.bf16.mxu0 %v8182_v46  ;;  %5831 = vmatprep.subr.bf16.mxu1 %v8185_v35  ;;  %v8267_v46 = vld [vmem:[%s11177_s1 + $0x1368] ss:$16 sps:$4 sm:$0xff]   ;;  %v8272_v35 = vld [vmem:[%s11177_s1 + $0x1384] ss:$16 sps:$4 sm:$0xff]  }
 0x237   :  { %5299 = vmatpush1.bf16.msra.mxu0 %v8180_v50  ;;  %5832 = vmatpush1.bf16.msra.mxu1 %v8183_v53  ;;  %v8275_v50 = vld [vmem:[%s11177_s1 + $0x138c] ss:$16 sps:$4 sm:$0xff]   ;;  %v8270_v53 = vld [vmem:[%s11177_s1 + $0x1380] ss:$16 sps:$4 sm:$0xff]  }
 0x238   :  { %5300 = vmatprep.subr.bf16.mxu0 %v8188_v38  ;;  %5833 = vmatprep.subr.bf16.mxu1 %v8191_v54  ;;  %v8273_v38 = vld [vmem:[%s11177_s1 + $0x1388] ss:$16 sps:$4 sm:$0xff]   ;;  %v8278_v54 = vld [vmem:[%s11177_s1 + $0x13a4] ss:$16 sps:$4 sm:$0xff]  }
 0x23b   :  { %5301 = vmatpush1.bf16.msra.mxu0 %v8186_v55  ;;  %5834 = vmatpush1.bf16.msra.mxu1 %v8189_v56  ;;  %v8281_v55 = vld [vmem:[%s11177_s1 + $0x13ac] ss:$16 sps:$4 sm:$0xff]   ;;  %v8276_v56 = vld [vmem:[%s11177_s1 + $0x13a0] ss:$16 sps:$4 sm:$0xff]  }
 0x23c   :  { %5302 = vmatprep.subr.bf16.mxu0 %v8194_v47  ;;  %5835 = vmatprep.subr.bf16.mxu1 %v8197_v57  ;;  %v8279_v47 = vld [vmem:[%s11177_s1 + $0x13a8] ss:$16 sps:$4 sm:$0xff]   ;;  %v8284_v57 = vld [vmem:[%s11177_s1 + $0x13c4] ss:$16 sps:$4 sm:$0xff]  }
 0x23f   :  { %5303 = vmatpush1.bf16.msra.mxu0 %v8192_v58  ;;  %5836 = vmatpush1.bf16.msra.mxu1 %v8195_v59  ;;  %v8287_v58 = vld [vmem:[%s11177_s1 + $0x13cc] ss:$16 sps:$4 sm:$0xff]   ;;  %v933_v59 = vcombine.high %v10183_v44, %v10183_v44 }
 0x240   :  { %5313 = vmatprep.subr.bf16.mxu0 %v8200_v48  ;;  %5846 = vmatprep.subr.bf16.mxu1 %v8203_v61  ;;  %v8282_v48 = vld [vmem:[%s11177_s1 + $0x13c0] ss:$16 sps:$4 sm:$0xff]   ;;  %v8285_v61 = vld [vmem:[%s11177_s1 + $0x13c8] ss:$16 sps:$4 sm:$0xff]   ;;  %v8293_v44 = vld [vmem:[%s11177_s1 + $0x13ec] ss:$16 sps:$4 sm:$0xff]  }
 0x242   :  { %5305 = vmatmul.mubr.bf16.vlgmr.msra.gmra.mrb[0].mxu0 %v10416_v62  ;;  %5838 = vmatmul.mubr.bf16.vlgmr.msra.gmra.mrb[0].mxu1 %v10416_v62 }
 0x243   :  { %5314 = vmatpush1.bf16.msra.mxu0 %v8198_v63  ;;  %5847 = vmatpush1.bf16.msra.mxu1 %v8201_v0  ;;  %v8290_v63 = vld [vmem:[%s11177_s1 + $0x13e4] ss:$16 sps:$4 sm:$0xff]   ;;  %v10605_v0 = vrot.slane %v933_v59, %v8712_v49  ;;  %v8369_v59 = vld [vmem:[%s11177_s1 + $0x1588] ss:$16 sps:$4 sm:$0xff]  }
 0x244   :  { %5315 = vmatprep.subr.bf16.mxu0 %v8206_v1  ;;  %5848 = vmatprep.subr.bf16.mxu1 %v8209_v51  ;;  %v8288_v1 = vld [vmem:[%s11177_s1 + $0x13e0] ss:$16 sps:$4 sm:$0xff]   ;;  %v8291_v51 = vld [vmem:[%s11177_s1 + $0x13e8] ss:$16 sps:$4 sm:$0xff]  }
 0x245   :  { %5345 = vmatprep.mubr.bf16.mxu0 %v980_v2  ;;  %5878 = vmatprep.mubr.bf16.mxu1 %v980_v2  ;;  %v8296_v2 = vld [vmem:[%s11177_s1 + $0x1404] ss:$16 sps:$4 sm:$0xff]  }
 0x247   :  { %5316 = vmatpush1.bf16.msra.mxu0 %v8204_v3  ;;  %5849 = vmatpush1.bf16.msra.mxu1 %v8207_v4  ;;  %v8299_v3 = vld [vmem:[%s11177_s1 + $0x140c] ss:$16 sps:$4 sm:$0xff]   ;;  %v949_v4 = vcombine.high %v10605_v0, %v10605_v0 }
 0x248   :  { %5317 = vmatprep.subr.bf16.mxu0 %v8212_v60  ;;  %5850 = vmatprep.subr.bf16.mxu1 %v8215_v5  ;;  %v978_v60 = vcombine.high %v10416_v62, %v10416_v62  ;;  %v8294_v5 = vld [vmem:[%s11177_s1 + $0x1400] ss:$16 sps:$4 sm:$0xff]   ;;  %v8305_v62 = vld [vmem:[%s11177_s1 + $0x142c] ss:$16 sps:$4 sm:$0xff]  }
 0x24b   :  { %5318 = vmatpush1.bf16.msra.mxu0 %v8210_v6  ;;  %5851 = vmatpush1.bf16.msra.mxu1 %v8213_v7  ;;  %v8297_v6 = vld [vmem:[%s11177_s1 + $0x1408] ss:$16 sps:$4 sm:$0xff]   ;;  %v8302_v7 = vld [vmem:[%s11177_s1 + $0x1424] ss:$16 sps:$4 sm:$0xff]  }
 0x24c   :  { %5319 = vmatprep.subr.bf16.mxu0 %v8218_v8  ;;  %5852 = vmatprep.subr.bf16.mxu1 %v8221_v9  ;;  %v10636_v8 = vrot.slane %v949_v4, %v8712_v49  ;;  %v8300_v9 = vld [vmem:[%s11177_s1 + $0x1420] ss:$16 sps:$4 sm:$0xff]   ;;  %v8386_v4 = vld [vmem:[%s11177_s1 + $0x15e4] ss:$16 sps:$4 sm:$0xff]  }
 0x24f   :  { %5320 = vmatpush1.bf16.msra.mxu0 %v8216_v10  ;;  %5853 = vmatpush1.bf16.msra.mxu1 %v8219_v11  ;;  %v8303_v10 = vld [vmem:[%s11177_s1 + $0x1428] ss:$16 sps:$4 sm:$0xff]   ;;  %v8308_v11 = vld [vmem:[%s11177_s1 + $0x1444] ss:$16 sps:$4 sm:$0xff]  }
 0x250   :  { %5321 = vmatprep.subr.bf16.mxu0 %v8224_v12  ;;  %5854 = vmatprep.subr.bf16.mxu1 %v8227_v52  ;;  %v8311_v12 = vld [vmem:[%s11177_s1 + $0x144c] ss:$16 sps:$4 sm:$0xff]   ;;  %v8306_v52 = vld [vmem:[%s11177_s1 + $0x1440] ss:$16 sps:$4 sm:$0xff]  }
 0x253   :  { %5322 = vmatpush1.bf16.msra.mxu0 %v8222_v15  ;;  %5855 = vmatpush1.bf16.msra.mxu1 %v8225_v16  ;;  %v8309_v15 = vld [vmem:[%s11177_s1 + $0x1448] ss:$16 sps:$4 sm:$0xff]   ;;  %v8314_v16 = vld [vmem:[%s11177_s1 + $0x1464] ss:$16 sps:$4 sm:$0xff]  }
 0x254   :  { %5323 = vmatprep.subr.bf16.mxu0 %v8230_v17  ;;  %5856 = vmatprep.subr.bf16.mxu1 %v8233_v18  ;;  %v8317_v17 = vld [vmem:[%s11177_s1 + $0x146c] ss:$16 sps:$4 sm:$0xff]   ;;  %v8312_v18 = vld [vmem:[%s11177_s1 + $0x1460] ss:$16 sps:$4 sm:$0xff]  }
 0x257   :  { %5324 = vmatpush1.bf16.msra.mxu0 %v8228_v19  ;;  %5857 = vmatpush1.bf16.msra.mxu1 %v8231_v20  ;;  %v8315_v19 = vld [vmem:[%s11177_s1 + $0x1468] ss:$16 sps:$4 sm:$0xff]   ;;  %v8320_v20 = vld [vmem:[%s11177_s1 + $0x1484] ss:$16 sps:$4 sm:$0xff]  }
 0x258   :  { %5325 = vmatprep.subr.bf16.mxu0 %v8236_v22  ;;  %5858 = vmatprep.subr.bf16.mxu1 %v8239_v23  ;;  %v8323_v22 = vld [vmem:[%s11177_s1 + $0x148c] ss:$16 sps:$4 sm:$0xff]   ;;  %v8318_v23 = vld [vmem:[%s11177_s1 + $0x1480] ss:$16 sps:$4 sm:$0xff]  }
 0x25b   :  { %5326 = vmatpush1.bf16.msra.mxu0 %v8234_v24  ;;  %5859 = vmatpush1.bf16.msra.mxu1 %v8237_v13  ;;  %v8321_v24 = vld [vmem:[%s11177_s1 + $0x1488] ss:$16 sps:$4 sm:$0xff]   ;;  %v8326_v13 = vld [vmem:[%s11177_s1 + $0x14a4] ss:$16 sps:$4 sm:$0xff]  }
 0x25c   :  { %5327 = vmatprep.subr.bf16.mxu0 %v8242_v27  ;;  %5860 = vmatprep.subr.bf16.mxu1 %v8245_v28  ;;  %v8329_v27 = vld [vmem:[%s11177_s1 + $0x14ac] ss:$16 sps:$4 sm:$0xff]   ;;  %v8324_v28 = vld [vmem:[%s11177_s1 + $0x14a0] ss:$16 sps:$4 sm:$0xff]  }
 0x25f   :  { %5328 = vmatpush1.bf16.msra.mxu0 %v8240_v29  ;;  %5861 = vmatpush1.bf16.msra.mxu1 %v8243_v14  ;;  %v8327_v29 = vld [vmem:[%s11177_s1 + $0x14a8] ss:$16 sps:$4 sm:$0xff]   ;;  %v8332_v14 = vld [vmem:[%s11177_s1 + $0x14c4] ss:$16 sps:$4 sm:$0xff]  }
 0x260   :  { %5329 = vmatprep.subr.bf16.mxu0 %v8248_v30  ;;  %5862 = vmatprep.subr.bf16.mxu1 %v8251_v31  ;;  %v8335_v30 = vld [vmem:[%s11177_s1 + $0x14cc] ss:$16 sps:$4 sm:$0xff]   ;;  %v8330_v31 = vld [vmem:[%s11177_s1 + $0x14c0] ss:$16 sps:$4 sm:$0xff]  }
 0x263   :  { %5330 = vmatpush1.bf16.msra.mxu0 %v8246_v25  ;;  %5863 = vmatpush1.bf16.msra.mxu1 %v8249_v32  ;;  %v8333_v25 = vld [vmem:[%s11177_s1 + $0x14c8] ss:$16 sps:$4 sm:$0xff]   ;;  %v8338_v32 = vld [vmem:[%s11177_s1 + $0x14e4] ss:$16 sps:$4 sm:$0xff]  }
 0x264   :  { %5331 = vmatprep.subr.bf16.mxu0 %v8254_v33  ;;  %5864 = vmatprep.subr.bf16.mxu1 %v8257_v26  ;;  %v8341_v33 = vld [vmem:[%s11177_s1 + $0x14ec] ss:$16 sps:$4 sm:$0xff]   ;;  %v8336_v26 = vld [vmem:[%s11177_s1 + $0x14e0] ss:$16 sps:$4 sm:$0xff]  }
 0x267   :  { %5332 = vmatpush1.bf16.msra.mxu0 %v8252_v36  ;;  %5865 = vmatpush1.bf16.msra.mxu1 %v8255_v37  ;;  %v8339_v36 = vld [vmem:[%s11177_s1 + $0x14e8] ss:$16 sps:$4 sm:$0xff]   ;;  %v8344_v37 = vld [vmem:[%s11177_s1 + $0x1504] ss:$16 sps:$4 sm:$0xff]  }
 0x268   :  { %5333 = vmatprep.subr.bf16.mxu0 %v8260_v21  ;;  %5866 = vmatprep.subr.bf16.mxu1 %v8263_v39  ;;  %v8347_v21 = vld [vmem:[%s11177_s1 + $0x150c] ss:$16 sps:$4 sm:$0xff]   ;;  %v8342_v39 = vld [vmem:[%s11177_s1 + $0x1500] ss:$16 sps:$4 sm:$0xff]  }
 0x26b   :  { %5334 = vmatpush1.bf16.msra.mxu0 %v8258_v40  ;;  %5867 = vmatpush1.bf16.msra.mxu1 %v8261_v41  ;;  %v8345_v40 = vld [vmem:[%s11177_s1 + $0x1508] ss:$16 sps:$4 sm:$0xff]   ;;  %v8350_v41 = vld [vmem:[%s11177_s1 + $0x1524] ss:$16 sps:$4 sm:$0xff]  }
 0x26c   :  { %5335 = vmatprep.subr.bf16.mxu0 %v8266_v34  ;;  %5868 = vmatprep.subr.bf16.mxu1 %v8269_v43  ;;  %v8353_v34 = vld [vmem:[%s11177_s1 + $0x152c] ss:$16 sps:$4 sm:$0xff]   ;;  %v8348_v43 = vld [vmem:[%s11177_s1 + $0x1520] ss:$16 sps:$4 sm:$0xff]  }
 0x26f   :  { %5336 = vmatpush1.bf16.msra.mxu0 %v8264_v45  ;;  %5869 = vmatpush1.bf16.msra.mxu1 %v8267_v46  ;;  %v8351_v45 = vld [vmem:[%s11177_s1 + $0x1528] ss:$16 sps:$4 sm:$0xff]   ;;  %v8356_v46 = vld [vmem:[%s11177_s1 + $0x1544] ss:$16 sps:$4 sm:$0xff]  }
 0x270   :  { %5337 = vmatprep.subr.bf16.mxu0 %v8272_v35  ;;  %5870 = vmatprep.subr.bf16.mxu1 %v8275_v50  ;;  %v8359_v35 = vld [vmem:[%s11177_s1 + $0x154c] ss:$16 sps:$4 sm:$0xff]   ;;  %v8354_v50 = vld [vmem:[%s11177_s1 + $0x1540] ss:$16 sps:$4 sm:$0xff]  }
 0x273   :  { %5338 = vmatpush1.bf16.msra.mxu0 %v8270_v53  ;;  %5871 = vmatpush1.bf16.msra.mxu1 %v8273_v38  ;;  %v8357_v53 = vld [vmem:[%s11177_s1 + $0x1548] ss:$16 sps:$4 sm:$0xff]   ;;  %v8362_v38 = vld [vmem:[%s11177_s1 + $0x1564] ss:$16 sps:$4 sm:$0xff]  }
 0x274   :  { %5339 = vmatprep.subr.bf16.mxu0 %v8278_v54  ;;  %5872 = vmatprep.subr.bf16.mxu1 %v8281_v55  ;;  %v8365_v54 = vld [vmem:[%s11177_s1 + $0x156c] ss:$16 sps:$4 sm:$0xff]   ;;  %v8360_v55 = vld [vmem:[%s11177_s1 + $0x1560] ss:$16 sps:$4 sm:$0xff]  }
 0x277   :  { %5340 = vmatpush1.bf16.msra.mxu0 %v8276_v56  ;;  %5873 = vmatpush1.bf16.msra.mxu1 %v8279_v47  ;;  %v8363_v56 = vld [vmem:[%s11177_s1 + $0x1568] ss:$16 sps:$4 sm:$0xff]   ;;  %v8368_v47 = vld [vmem:[%s11177_s1 + $0x1584] ss:$16 sps:$4 sm:$0xff]  }
 0x278   :  { %5341 = vmatprep.subr.bf16.mxu0 %v8284_v57  ;;  %5874 = vmatprep.subr.bf16.mxu1 %v8287_v58  ;;  %v8371_v57 = vld [vmem:[%s11177_s1 + $0x158c] ss:$16 sps:$4 sm:$0xff]   ;;  %v8366_v58 = vld [vmem:[%s11177_s1 + $0x1580] ss:$16 sps:$4 sm:$0xff]  }
 0x27b   :  { %5342 = vmatpush1.bf16.msra.mxu0 %v8282_v48  ;;  %5875 = vmatpush1.bf16.msra.mxu1 %v8285_v61  ;;  %v8374_v48 = vld [vmem:[%s11177_s1 + $0x15a4] ss:$16 sps:$4 sm:$0xff]   ;;  %v8377_v61 = vld [vmem:[%s11177_s1 + $0x15ac] ss:$16 sps:$4 sm:$0xff]  }
 0x27c   :  { %5343 = vmatprep.subr.bf16.mxu0 %v8290_v63  ;;  %5876 = vmatprep.subr.bf16.mxu1 %v8293_v44  ;;  %v8372_v63 = vld [vmem:[%s11177_s1 + $0x15a0] ss:$16 sps:$4 sm:$0xff]   ;;  %v8375_v44 = vld [vmem:[%s11177_s1 + $0x15a8] ss:$16 sps:$4 sm:$0xff]  }
 0x27f   :  { %5344 = vmatpush1.bf16.msra.mxu0 %v8288_v1  ;;  %5877 = vmatpush1.bf16.msra.mxu1 %v8291_v51  ;;  %v8380_v1 = vld [vmem:[%s11177_s1 + $0x15c4] ss:$16 sps:$4 sm:$0xff]   ;;  %v8383_v51 = vld [vmem:[%s11177_s1 + $0x15cc] ss:$16 sps:$4 sm:$0xff]  }
 0x280   :  { %5354 = vmatprep.subr.bf16.mxu0 %v8296_v2  ;;  %5887 = vmatprep.subr.bf16.mxu1 %v8299_v3  ;;  %v8378_v2 = vld [vmem:[%s11177_s1 + $0x15c0] ss:$16 sps:$4 sm:$0xff]   ;;  %v8381_v3 = vld [vmem:[%s11177_s1 + $0x15c8] ss:$16 sps:$4 sm:$0xff]  }
 0x282   :  { %5346 = vmatmul.mubr.bf16.vlgmr.msra.gmra.mrb[0].mxu0 %v978_v60  ;;  %5879 = vmatmul.mubr.bf16.vlgmr.msra.gmra.mrb[0].mxu1 %v978_v60  ;;  %v8389_v60 = vld [vmem:[%s11177_s1 + $0x15ec] ss:$16 sps:$4 sm:$0xff]  }
 0x283   :  { %5355 = vmatpush1.bf16.msra.mxu0 %v8294_v5  ;;  %5888 = vmatpush1.bf16.msra.mxu1 %v8297_v6  ;;  %v8384_v5 = vld [vmem:[%s11177_s1 + $0x15e0] ss:$16 sps:$4 sm:$0xff]   ;;  %v8387_v6 = vld [vmem:[%s11177_s1 + $0x15e8] ss:$16 sps:$4 sm:$0xff]  }
 0x284   :  { %5356 = vmatprep.subr.bf16.mxu0 %v8302_v7  ;;  %5889 = vmatprep.subr.bf16.mxu1 %v8305_v62  ;;  %v8393_v7 = vld [vmem:[%s11177_s1 + $0x1604] ss:$16 sps:$4 sm:$0xff]   ;;  %v8396_v62 = vld [vmem:[%s11177_s1 + $0x160c] ss:$16 sps:$4 sm:$0xff]  }
 0x285   :  { %5386 = vmatprep.mubr.bf16.mxu0 %v10636_v8  ;;  %5919 = vmatprep.mubr.bf16.mxu1 %v10636_v8 }
 0x287   :  { %5357 = vmatpush1.bf16.msra.mxu0 %v8300_v9  ;;  %5890 = vmatpush1.bf16.msra.mxu1 %v8303_v10  ;;  %v10822_v9 = vrot.slane %v10605_v0, %v8712_v49  ;;  %v8391_v10 = vld [vmem:[%s11177_s1 + $0x1600] ss:$16 sps:$4 sm:$0xff]   ;;  %v8402_v0 = vld [vmem:[%s11177_s1 + $0x162c] ss:$16 sps:$4 sm:$0xff]  }
 0x288   :  { %5358 = vmatprep.subr.bf16.mxu0 %v8308_v11  ;;  %5891 = vmatprep.subr.bf16.mxu1 %v8311_v12  ;;  %v8394_v11 = vld [vmem:[%s11177_s1 + $0x1608] ss:$16 sps:$4 sm:$0xff]   ;;  %v8399_v12 = vld [vmem:[%s11177_s1 + $0x1624] ss:$16 sps:$4 sm:$0xff]  }
 0x28b   :  { %5359 = vmatpush1.bf16.msra.mxu0 %v8306_v52  ;;  %5892 = vmatpush1.bf16.msra.mxu1 %v8309_v15  ;;  %v981_v52 = vcombine.high %v10636_v8, %v10636_v8  ;;  %v8397_v15 = vld [vmem:[%s11177_s1 + $0x1620] ss:$16 sps:$4 sm:$0xff]   ;;  %v8405_v8 = vld [vmem:[%s11177_s1 + $0x1644] ss:$16 sps:$4 sm:$0xff]  }
 0x28c   :  { %5360 = vmatprep.subr.bf16.mxu0 %v8314_v16  ;;  %5893 = vmatprep.subr.bf16.mxu1 %v8317_v17  ;;  %v8400_v16 = vld [vmem:[%s11177_s1 + $0x1628] ss:$16 sps:$4 sm:$0xff]   ;;  %v8408_v17 = vld [vmem:[%s11177_s1 + $0x164c] ss:$16 sps:$4 sm:$0xff]  }
 0x28f   :  { %5361 = vmatpush1.bf16.msra.mxu0 %v8312_v18  ;;  %5894 = vmatpush1.bf16.msra.mxu1 %v8315_v19  ;;  %v8403_v18 = vld [vmem:[%s11177_s1 + $0x1640] ss:$16 sps:$4 sm:$0xff]   ;;  %v8406_v19 = vld [vmem:[%s11177_s1 + $0x1648] ss:$16 sps:$4 sm:$0xff]  }
 0x290   :  { %5362 = vmatprep.subr.bf16.mxu0 %v8320_v20  ;;  %5895 = vmatprep.subr.bf16.mxu1 %v8323_v22  ;;  %v8411_v20 = vld [vmem:[%s11177_s1 + $0x1664] ss:$16 sps:$4 sm:$0xff]   ;;  %v8414_v22 = vld [vmem:[%s11177_s1 + $0x166c] ss:$16 sps:$4 sm:$0xff]  }
 0x293   :  { %5363 = vmatpush1.bf16.msra.mxu0 %v8318_v23  ;;  %5896 = vmatpush1.bf16.msra.mxu1 %v8321_v24  ;;  %v8409_v23 = vld [vmem:[%s11177_s1 + $0x1660] ss:$16 sps:$4 sm:$0xff]   ;;  %v8412_v24 = vld [vmem:[%s11177_s1 + $0x1668] ss:$16 sps:$4 sm:$0xff]  }
 0x294   :  { %5364 = vmatprep.subr.bf16.mxu0 %v8326_v13  ;;  %5897 = vmatprep.subr.bf16.mxu1 %v8329_v27  ;;  %v8417_v13 = vld [vmem:[%s11177_s1 + $0x1684] ss:$16 sps:$4 sm:$0xff]   ;;  %v8420_v27 = vld [vmem:[%s11177_s1 + $0x168c] ss:$16 sps:$4 sm:$0xff]  }
 0x297   :  { %5365 = vmatpush1.bf16.msra.mxu0 %v8324_v28  ;;  %5898 = vmatpush1.bf16.msra.mxu1 %v8327_v29  ;;  %v8415_v28 = vld [vmem:[%s11177_s1 + $0x1680] ss:$16 sps:$4 sm:$0xff]   ;;  %v8418_v29 = vld [vmem:[%s11177_s1 + $0x1688] ss:$16 sps:$4 sm:$0xff]  }
 0x298   :  { %5366 = vmatprep.subr.bf16.mxu0 %v8332_v14  ;;  %5899 = vmatprep.subr.bf16.mxu1 %v8335_v30  ;;  %v8423_v14 = vld [vmem:[%s11177_s1 + $0x16a4] ss:$16 sps:$4 sm:$0xff]   ;;  %v8426_v30 = vld [vmem:[%s11177_s1 + $0x16ac] ss:$16 sps:$4 sm:$0xff]  }
 0x29b   :  { %5367 = vmatpush1.bf16.msra.mxu0 %v8330_v31  ;;  %5900 = vmatpush1.bf16.msra.mxu1 %v8333_v25  ;;  %v8421_v31 = vld [vmem:[%s11177_s1 + $0x16a0] ss:$16 sps:$4 sm:$0xff]   ;;  %v8424_v25 = vld [vmem:[%s11177_s1 + $0x16a8] ss:$16 sps:$4 sm:$0xff]  }
 0x29c   :  { %5368 = vmatprep.subr.bf16.mxu0 %v8338_v32  ;;  %5901 = vmatprep.subr.bf16.mxu1 %v8341_v33  ;;  %v8429_v32 = vld [vmem:[%s11177_s1 + $0x16c4] ss:$16 sps:$4 sm:$0xff]   ;;  %v8432_v33 = vld [vmem:[%s11177_s1 + $0x16cc] ss:$16 sps:$4 sm:$0xff]  }
 0x29f   :  { %5369 = vmatpush1.bf16.msra.mxu0 %v8336_v26  ;;  %5902 = vmatpush1.bf16.msra.mxu1 %v8339_v36  ;;  %v8427_v26 = vld [vmem:[%s11177_s1 + $0x16c0] ss:$16 sps:$4 sm:$0xff]   ;;  %v8430_v36 = vld [vmem:[%s11177_s1 + $0x16c8] ss:$16 sps:$4 sm:$0xff]  }
 0x2a0   :  { %5370 = vmatprep.subr.bf16.mxu0 %v8344_v37  ;;  %5903 = vmatprep.subr.bf16.mxu1 %v8347_v21  ;;  %v8435_v37 = vld [vmem:[%s11177_s1 + $0x16e4] ss:$16 sps:$4 sm:$0xff]   ;;  %v8438_v21 = vld [vmem:[%s11177_s1 + $0x16ec] ss:$16 sps:$4 sm:$0xff]  }
 0x2a3   :  { %5371 = vmatpush1.bf16.msra.mxu0 %v8342_v39  ;;  %5904 = vmatpush1.bf16.msra.mxu1 %v8345_v40  ;;  %v8433_v39 = vld [vmem:[%s11177_s1 + $0x16e0] ss:$16 sps:$4 sm:$0xff]   ;;  %v8436_v40 = vld [vmem:[%s11177_s1 + $0x16e8] ss:$16 sps:$4 sm:$0xff]  }
 0x2a4   :  { %5372 = vmatprep.subr.bf16.mxu0 %v8350_v41  ;;  %5905 = vmatprep.subr.bf16.mxu1 %v8353_v34  ;;  %v8441_v41 = vld [vmem:[%s11177_s1 + $0x1704] ss:$16 sps:$4 sm:$0xff]   ;;  %v8444_v34 = vld [vmem:[%s11177_s1 + $0x170c] ss:$16 sps:$4 sm:$0xff]  }
 0x2a7   :  { %5373 = vmatpush1.bf16.msra.mxu0 %v8348_v43  ;;  %5906 = vmatpush1.bf16.msra.mxu1 %v8351_v45  ;;  %v8439_v43 = vld [vmem:[%s11177_s1 + $0x1700] ss:$16 sps:$4 sm:$0xff]   ;;  %v8442_v45 = vld [vmem:[%s11177_s1 + $0x1708] ss:$16 sps:$4 sm:$0xff]  }
 0x2a8   :  { %5374 = vmatprep.subr.bf16.mxu0 %v8356_v46  ;;  %5907 = vmatprep.subr.bf16.mxu1 %v8359_v35  ;;  %v8447_v46 = vld [vmem:[%s11177_s1 + $0x1724] ss:$16 sps:$4 sm:$0xff]   ;;  %v8450_v35 = vld [vmem:[%s11177_s1 + $0x172c] ss:$16 sps:$4 sm:$0xff]  }
 0x2ab   :  { %5375 = vmatpush1.bf16.msra.mxu0 %v8354_v50  ;;  %5908 = vmatpush1.bf16.msra.mxu1 %v8357_v53  ;;  %v8445_v50 = vld [vmem:[%s11177_s1 + $0x1720] ss:$16 sps:$4 sm:$0xff]   ;;  %v8448_v53 = vld [vmem:[%s11177_s1 + $0x1728] ss:$16 sps:$4 sm:$0xff]  }
 0x2ac   :  { %5376 = vmatprep.subr.bf16.mxu0 %v8362_v38  ;;  %5909 = vmatprep.subr.bf16.mxu1 %v8365_v54  ;;  %v8453_v38 = vld [vmem:[%s11177_s1 + $0x1744] ss:$16 sps:$4 sm:$0xff]   ;;  %v8456_v54 = vld [vmem:[%s11177_s1 + $0x174c] ss:$16 sps:$4 sm:$0xff]  }
 0x2af   :  { %5377 = vmatpush1.bf16.msra.mxu0 %v8360_v55  ;;  %5910 = vmatpush1.bf16.msra.mxu1 %v8363_v56  ;;  %v8451_v55 = vld [vmem:[%s11177_s1 + $0x1740] ss:$16 sps:$4 sm:$0xff]   ;;  %v8454_v56 = vld [vmem:[%s11177_s1 + $0x1748] ss:$16 sps:$4 sm:$0xff]  }
 0x2b0   :  { %5378 = vmatprep.subr.bf16.mxu0 %v8368_v47  ;;  %5911 = vmatprep.subr.bf16.mxu1 %v8371_v57  ;;  %v8459_v47 = vld [vmem:[%s11177_s1 + $0x1764] ss:$16 sps:$4 sm:$0xff]   ;;  %v8462_v57 = vld [vmem:[%s11177_s1 + $0x176c] ss:$16 sps:$4 sm:$0xff]  }
 0x2b3   :  { %5379 = vmatpush1.bf16.msra.mxu0 %v8366_v58  ;;  %5912 = vmatpush1.bf16.msra.mxu1 %v8369_v59  ;;  %v8457_v58 = vld [vmem:[%s11177_s1 + $0x1760] ss:$16 sps:$4 sm:$0xff]   ;;  %v8460_v59 = vld [vmem:[%s11177_s1 + $0x1768] ss:$16 sps:$4 sm:$0xff]  }
 0x2b4   :  { %5380 = vmatprep.subr.bf16.mxu0 %v8374_v48  ;;  %5913 = vmatprep.subr.bf16.mxu1 %v8377_v61  ;;  %v8465_v48 = vld [vmem:[%s11177_s1 + $0x1784] ss:$16 sps:$4 sm:$0xff]   ;;  %v8468_v61 = vld [vmem:[%s11177_s1 + $0x178c] ss:$16 sps:$4 sm:$0xff]  }
 0x2b7   :  { %5381 = vmatpush1.bf16.msra.mxu0 %v8372_v63  ;;  %5914 = vmatpush1.bf16.msra.mxu1 %v8375_v44  ;;  %v8463_v63 = vld [vmem:[%s11177_s1 + $0x1780] ss:$16 sps:$4 sm:$0xff]   ;;  %v8466_v44 = vld [vmem:[%s11177_s1 + $0x1788] ss:$16 sps:$4 sm:$0xff]  }
 0x2b8   :  { %5382 = vmatprep.subr.bf16.mxu0 %v8380_v1  ;;  %5915 = vmatprep.subr.bf16.mxu1 %v8383_v51  ;;  %v8471_v1 = vld [vmem:[%s11177_s1 + $0x17a4] ss:$16 sps:$4 sm:$0xff]   ;;  %v8474_v51 = vld [vmem:[%s11177_s1 + $0x17ac] ss:$16 sps:$4 sm:$0xff]  }
 0x2bb   :  { %5383 = vmatpush1.bf16.msra.mxu0 %v8378_v2  ;;  %5916 = vmatpush1.bf16.msra.mxu1 %v8381_v3  ;;  %v8469_v2 = vld [vmem:[%s11177_s1 + $0x17a0] ss:$16 sps:$4 sm:$0xff]   ;;  %v8472_v3 = vld [vmem:[%s11177_s1 + $0x17a8] ss:$16 sps:$4 sm:$0xff]  }
 0x2bc   :  { %5384 = vmatprep.subr.bf16.mxu0 %v8386_v4  ;;  %5917 = vmatprep.subr.bf16.mxu1 %v8389_v60  ;;  %v8477_v4 = vld [vmem:[%s11177_s1 + $0x17c4] ss:$16 sps:$4 sm:$0xff]   ;;  %v8480_v60 = vld [vmem:[%s11177_s1 + $0x17cc] ss:$16 sps:$4 sm:$0xff]  }
 0x2bf   :  { %5385 = vmatpush1.bf16.msra.mxu0 %v8384_v5  ;;  %5918 = vmatpush1.bf16.msra.mxu1 %v8387_v6  ;;  %v8475_v5 = vld [vmem:[%s11177_s1 + $0x17c0] ss:$16 sps:$4 sm:$0xff]   ;;  %v8478_v6 = vld [vmem:[%s11177_s1 + $0x17c8] ss:$16 sps:$4 sm:$0xff]  }
 0x2c0   :  { %5395 = vmatprep.subr.bf16.mxu0 %v8393_v7  ;;  %5928 = vmatprep.subr.bf16.mxu1 %v8396_v62  ;;  %v8483_v7 = vld [vmem:[%s11177_s1 + $0x17e4] ss:$16 sps:$4 sm:$0xff]   ;;  %v8486_v62 = vld [vmem:[%s11177_s1 + $0x17ec] ss:$16 sps:$4 sm:$0xff]  }
 0x2c2   :  { %5387 = vmatmul.mubr.bf16.vlgmr.msra.gmra.mrb[0].mxu0 %v10822_v9  ;;  %5920 = vmatmul.mubr.bf16.vlgmr.msra.gmra.mrb[0].mxu1 %v10822_v9 }
 0x2c3   :  { %5396 = vmatpush1.bf16.msra.mxu0 %v8391_v10  ;;  %5929 = vmatpush1.bf16.msra.mxu1 %v8394_v11  ;;  %v8481_v10 = vld [vmem:[%s11177_s1 + $0x17e0] ss:$16 sps:$4 sm:$0xff]   ;;  %v8484_v11 = vld [vmem:[%s11177_s1 + $0x17e8] ss:$16 sps:$4 sm:$0xff]  }
 0x2c4   :  { %5397 = vmatprep.subr.bf16.mxu0 %v8399_v12  ;;  %5930 = vmatprep.subr.bf16.mxu1 %v8402_v0  ;;  %v8489_v12 = vld [vmem:[%s11177_s1 + $0x1804] ss:$16 sps:$4 sm:$0xff]   ;;  %v8492_v0 = vld [vmem:[%s11177_s1 + $0x180c] ss:$16 sps:$4 sm:$0xff]  }
 0x2c5   :  { %5427 = vmatprep.mubr.bf16.mxu0 %v981_v52  ;;  %5960 = vmatprep.mubr.bf16.mxu1 %v981_v52  ;;  %v979_v52 = vcombine.high %v10822_v9, %v10822_v9  ;;  %v8498_v9 = vld [vmem:[%s11177_s1 + $0x182c] ss:$16 sps:$4 sm:$0xff]  }
 0x2c7   :  { %5398 = vmatpush1.bf16.msra.mxu0 %v8397_v15  ;;  %5931 = vmatpush1.bf16.msra.mxu1 %v8400_v16  ;;  %v8487_v15 = vld [vmem:[%s11177_s1 + $0x1800] ss:$16 sps:$4 sm:$0xff]   ;;  %v8490_v16 = vld [vmem:[%s11177_s1 + $0x1808] ss:$16 sps:$4 sm:$0xff]  }
 0x2c8   :  { %5399 = vmatprep.subr.bf16.mxu0 %v8405_v8  ;;  %5932 = vmatprep.subr.bf16.mxu1 %v8408_v17  ;;  %v8495_v8 = vld [vmem:[%s11177_s1 + $0x1824] ss:$16 sps:$4 sm:$0xff]   ;;  %v8493_v17 = vld [vmem:[%s11177_s1 + $0x1820] ss:$16 sps:$4 sm:$0xff]  }
 0x2cb   :  { %5400 = vmatpush1.bf16.msra.mxu0 %v8403_v18  ;;  %5933 = vmatpush1.bf16.msra.mxu1 %v8406_v19  ;;  %v8496_v18 = vld [vmem:[%s11177_s1 + $0x1828] ss:$16 sps:$4 sm:$0xff]   ;;  %v8501_v19 = vld [vmem:[%s11177_s1 + $0x1844] ss:$16 sps:$4 sm:$0xff]  }
 0x2cc   :  { %5401 = vmatprep.subr.bf16.mxu0 %v8411_v20  ;;  %5934 = vmatprep.subr.bf16.mxu1 %v8414_v22  ;;  %v8504_v20 = vld [vmem:[%s11177_s1 + $0x184c] ss:$16 sps:$4 sm:$0xff]   ;;  %v8546_v22 = vmov 0  }
 0x2cf   :  { %5402 = vmatpush1.bf16.msra.mxu0 %v8409_v23  ;;  %5935 = vmatpush1.bf16.msra.mxu1 %v8412_v24  ;;  %v8499_v23 = vld [vmem:[%s11177_s1 + $0x1840] ss:$16 sps:$4 sm:$0xff]   ;;  %v8502_v24 = vld [vmem:[%s11177_s1 + $0x1848] ss:$16 sps:$4 sm:$0xff]  }
 0x2d0   :  { %5403 = vmatprep.subr.bf16.mxu0 %v8417_v13  ;;  %5936 = vmatprep.subr.bf16.mxu1 %v8420_v27  ;;  %v8507_v13 = vld [vmem:[%s11177_s1 + $0x1864] ss:$16 sps:$4 sm:$0xff]   ;;  %v8510_v27 = vld [vmem:[%s11177_s1 + $0x186c] ss:$16 sps:$4 sm:$0xff]  }
 0x2d3   :  { %5404 = vmatpush1.bf16.msra.mxu0 %v8415_v28  ;;  %5937 = vmatpush1.bf16.msra.mxu1 %v8418_v29  ;;  %v8505_v28 = vld [vmem:[%s11177_s1 + $0x1860] ss:$16 sps:$4 sm:$0xff]   ;;  %v8508_v29 = vld [vmem:[%s11177_s1 + $0x1868] ss:$16 sps:$4 sm:$0xff]  }
 0x2d4   :  { %5405 = vmatprep.subr.bf16.mxu0 %v8423_v14  ;;  %5938 = vmatprep.subr.bf16.mxu1 %v8426_v30  ;;  %v6366_v14 = vld.sshfl [vmem:[%s11178_s0 + $0x18] sm:$0x1 pattern:$0x75316420]  ;;  %v8511_v30 = vld [vmem:[%s11179_s3 + $0x40] sm:$0xff]  }
 0x2d7   :  { %5406 = vmatpush1.bf16.msra.mxu0 %v8421_v31  ;;  %5939 = vmatpush1.bf16.msra.mxu1 %v8424_v25  ;;  %v8512_v31 = vld [vmem:[%s11179_s3 + $0xc0] sm:$0xff]   ;;  %v995_v25 = vrot.slane %v6366_v14, %v8712_v49  ;;  %v8516_v49 = vld [vmem:[%s11179_s3 + $0xc8] sm:$0xff]  }
 0x2d8   :  { %5407 = vmatprep.subr.bf16.mxu0 %v8429_v32  ;;  %5940 = vmatprep.subr.bf16.mxu1 %v8432_v33  ;;  %v8513_v32 = vld [vmem:[%s11179_s3] sm:$0xff]  }
 0x2d9   :  { %v8514_v33 = vld [vmem:[%s11179_s3 + $0x80] sm:$0xff]  }
 0x2db   :  { %5408 = vmatpush1.bf16.msra.mxu0 %v8427_v26  ;;  %5941 = vmatpush1.bf16.msra.mxu1 %v8430_v36  ;;  %v8515_v26 = vld [vmem:[%s11179_s3 + $0x48] sm:$0xff]  }
 0x2dc   :  { %5409 = vmatprep.subr.bf16.mxu0 %v8435_v37  ;;  %5942 = vmatprep.subr.bf16.mxu1 %v8438_v21  ;;  %v8517_v36 = vld [vmem:[%s11179_s3 + $0x8] sm:$0xff]   ;;  %v8519_v21 = vld [vmem:[%s11179_s3 + $0x50] sm:$0xff]  }
 0x2dd   :  { %v8518_v37 = vld [vmem:[%s11179_s3 + $0x88] sm:$0xff]  }
 0x2df   :  { %5410 = vmatpush1.bf16.msra.mxu0 %v8433_v39  ;;  %5943 = vmatpush1.bf16.msra.mxu1 %v8436_v40  ;;  %v8520_v39 = vld [vmem:[%s11179_s3 + $0xd0] sm:$0xff]  }
 0x2e0   :  { %5411 = vmatprep.subr.bf16.mxu0 %v8441_v41  ;;  %5944 = vmatprep.subr.bf16.mxu1 %v8444_v34  ;;  %v8521_v40 = vld [vmem:[%s11179_s3 + $0x10] sm:$0xff]   ;;  %v8523_v34 = vld [vmem:[%s11179_s3 + $0x58] sm:$0xff]  }
 0x2e1   :  { %v8522_v41 = vld [vmem:[%s11179_s3 + $0x90] sm:$0xff]  }
 0x2e3   :  { %5412 = vmatpush1.bf16.msra.mxu0 %v8439_v43  ;;  %5945 = vmatpush1.bf16.msra.mxu1 %v8442_v45  ;;  %v8524_v43 = vld [vmem:[%s11179_s3 + $0xd8] sm:$0xff]  }
 0x2e4   :  { %5413 = vmatprep.subr.bf16.mxu0 %v8447_v46  ;;  %5946 = vmatprep.subr.bf16.mxu1 %v8450_v35  ;;  %v8525_v45 = vld [vmem:[%s11179_s3 + $0x18] sm:$0xff]   ;;  %v8527_v35 = vld [vmem:[%s11179_s3 + $0x60] sm:$0xff]  }
 0x2e5   :  { %v8526_v46 = vld [vmem:[%s11179_s3 + $0x98] sm:$0xff]  }
 0x2e7   :  { %5414 = vmatpush1.bf16.msra.mxu0 %v8445_v50  ;;  %5947 = vmatpush1.bf16.msra.mxu1 %v8448_v53  ;;  %v8528_v50 = vld [vmem:[%s11179_s3 + $0xe0] sm:$0xff]  }
 0x2e8   :  { %5415 = vmatprep.subr.bf16.mxu0 %v8453_v38  ;;  %5948 = vmatprep.subr.bf16.mxu1 %v8456_v54  ;;  %v8529_v53 = vld [vmem:[%s11179_s3 + $0x20] sm:$0xff]   ;;  %v8531_v54 = vld [vmem:[%s11179_s3 + $0x68] sm:$0xff]  }
 0x2e9   :  { %v8530_v38 = vld [vmem:[%s11179_s3 + $0xa0] sm:$0xff]  }
 0x2eb   :  { %5416 = vmatpush1.bf16.msra.mxu0 %v8451_v55  ;;  %5949 = vmatpush1.bf16.msra.mxu1 %v8454_v56  ;;  %v8532_v55 = vld [vmem:[%s11179_s3 + $0xe8] sm:$0xff]  }
 0x2ec   :  { %5417 = vmatprep.subr.bf16.mxu0 %v8459_v47  ;;  %5950 = vmatprep.subr.bf16.mxu1 %v8462_v57  ;;  %v8533_v56 = vld [vmem:[%s11179_s3 + $0x28] sm:$0xff]   ;;  %v8535_v57 = vld [vmem:[%s11179_s3 + $0x70] sm:$0xff]  }
 0x2ed   :  { %v8534_v47 = vld [vmem:[%s11179_s3 + $0xa8] sm:$0xff]  }
 0x2ef   :  { %5418 = vmatpush1.bf16.msra.mxu0 %v8457_v58  ;;  %5951 = vmatpush1.bf16.msra.mxu1 %v8460_v59  ;;  %v8536_v58 = vld [vmem:[%s11179_s3 + $0xf0] sm:$0xff]  }
 0x2f0   :  { %5419 = vmatprep.subr.bf16.mxu0 %v8465_v48  ;;  %5952 = vmatprep.subr.bf16.mxu1 %v8468_v61  ;;  %v8537_v59 = vld [vmem:[%s11179_s3 + $0x30] sm:$0xff]   ;;  %v8539_v61 = vld [vmem:[%s11179_s3 + $0x78] sm:$0xff]  }
 0x2f1   :  { %v8538_v48 = vld [vmem:[%s11179_s3 + $0xb0] sm:$0xff]  }
 0x2f3   :  { %5420 = vmatpush1.bf16.msra.mxu0 %v8463_v63  ;;  %5953 = vmatpush1.bf16.msra.mxu1 %v8466_v44  ;;  %v8540_v63 = vld [vmem:[%s11179_s3 + $0xf8] sm:$0xff]  }
 0x2f4   :  { %5421 = vmatprep.subr.bf16.mxu0 %v8471_v1  ;;  %5954 = vmatprep.subr.bf16.mxu1 %v8474_v51  ;;  %v8541_v44 = vld [vmem:[%s11179_s3 + $0x38] sm:$0xff]   ;;  %v813_v51 = vsub.s32 0, %v8694_v42 }
 0x2f5   :  { %v8542_v1 = vld [vmem:[%s11179_s3 + $0xb8] sm:$0xff]  }
 0x2f7   :  { %5422 = vmatpush1.bf16.msra.mxu0 %v8469_v2  ;;  %5955 = vmatpush1.bf16.msra.mxu1 %v8472_v3  ;;  %v821_v2 = vsub.s32 2, %v8694_v42  ;;  %v809_v3 = vld [vmem:[%s11180_s2] sm:$0xf] }
 0x2f8   :  { %5423 = vmatprep.subr.bf16.mxu0 %v8477_v4  ;;  %5956 = vmatprep.subr.bf16.mxu1 %v8480_v60  ;;  %v817_v4 = vsub.s32 1, %v8694_v42  ;;  %v825_v60 = vsub.s32 3, %v8694_v42 }
 0x2fb   :  { %5424 = vmatpush1.bf16.msra.mxu0 %v8475_v5  ;;  %5957 = vmatpush1.bf16.msra.mxu1 %v8478_v6  ;;  %v814_v5 = vrot.slane %v809_v3, %v813_v51  ;;  %v822_v6 = vrot.slane %v809_v3, %v821_v2 }
 0x2fc   :  { %5425 = vmatprep.subr.bf16.mxu0 %v8483_v7  ;;  %5958 = vmatprep.subr.bf16.mxu1 %v8486_v62  ;;  %v818_v7 = vrot.slane %v809_v3, %v817_v4  ;;  %v826_v62 = vrot.slane %v809_v3, %v825_v60 }
 0x2ff   :  { %5426 = vmatpush1.bf16.msra.mxu0 %v8481_v10  ;;  %5959 = vmatpush1.bf16.msra.mxu1 %v8484_v11 }
 0x300   :  { %5436 = vmatprep.subr.bf16.mxu0 %v8489_v12  ;;  %5969 = vmatprep.subr.bf16.mxu1 %v8492_v0 }
 0x302   :  { %5428 = vmatmul.mubr.bf16.vlgmr.msra.gmra.mrb[0].mxu0 %v979_v52  ;;  %5961 = vmatmul.mubr.bf16.vlgmr.msra.gmra.mrb[0].mxu1 %v979_v52 }
 0x303   :  { %5437 = vmatpush1.bf16.msra.mxu0 %v8487_v15  ;;  %5970 = vmatpush1.bf16.msra.mxu1 %v8490_v16 }
 0x304   :  { %5438 = vmatprep.subr.bf16.mxu0 %v8495_v8  ;;  %5971 = vmatprep.subr.bf16.mxu1 %v8498_v9 }
 0x305   :  { %5468 = vmatprep.mubr.bf16.mxu0 %v8546_v22  ;;  %6001 = vmatprep.mubr.bf16.mxu1 %v8546_v22 }
 0x307   :  { %5439 = vmatpush1.bf16.msra.mxu0 %v8493_v17  ;;  %5972 = vmatpush1.bf16.msra.mxu1 %v8496_v18 }
 0x308   :  { %5440 = vmatprep.subr.bf16.mxu0 %v8501_v19  ;;  %5973 = vmatprep.subr.bf16.mxu1 %v8504_v20 }
 0x30b   :  { %5441 = vmatpush1.bf16.msra.mxu0 %v8499_v23  ;;  %5974 = vmatpush1.bf16.msra.mxu1 %v8502_v24 }
 0x30c   :  { %5442 = vmatprep.subr.bf16.mxu0 %v8507_v13  ;;  %5975 = vmatprep.subr.bf16.mxu1 %v8510_v27 }
 0x30f   :  { %5443 = vmatpush1.bf16.msra.mxu0 %v8505_v28  ;;  %5976 = vmatpush1.bf16.msra.mxu1 %v8508_v29 }
 0x310   :  { %7186 = vmatprep.subr.bf16.mxu0 %v8511_v30  ;;  %7208 = vmatprep.subr.bf16.mxu1 %v8512_v31  ;;  %v7153_v30 = vld [vmem:[%s11181_s4] ss:$0 sm:$0xff] }
 0x312   :  { %7151 = vmatmul.mubr.msk.bf16.vlgmr.msra.gmra.mrb[0].mxu0 %vm4940_vm0, %v995_v25  ;;  %7152 = vmatmul.mubr.msk.bf16.vlgmr.msra.gmra.mrb[0].mxu1 %vm4940_vm0, %v995_v25 }
 0x313   :  { %7187 = vmatpush3.bf16.msra.mxu0 %v8513_v32  ;;  %7209 = vmatpush3.bf16.msra.mxu1 %v8514_v33 }
 0x314   :  { %7188 = vmatprep.subr.bf16.mxu0 %v8515_v26  ;;  %7210 = vmatprep.subr.bf16.mxu1 %v8516_v49 }
 0x317   :  { %7189 = vmatpush3.bf16.msra.mxu0 %v8517_v36  ;;  %7211 = vmatpush3.bf16.msra.mxu1 %v8518_v37 }
 0x318   :  { %7190 = vmatprep.subr.bf16.mxu0 %v8519_v21  ;;  %7212 = vmatprep.subr.bf16.mxu1 %v8520_v39 }
 0x31b   :  { %7191 = vmatpush3.bf16.msra.mxu0 %v8521_v40  ;;  %7213 = vmatpush3.bf16.msra.mxu1 %v8522_v41 }
 0x31c   :  { %7192 = vmatprep.subr.bf16.mxu0 %v8523_v34  ;;  %7214 = vmatprep.subr.bf16.mxu1 %v8524_v43 }
 0x31f   :  { %7193 = vmatpush3.bf16.msra.mxu0 %v8525_v45  ;;  %7215 = vmatpush3.bf16.msra.mxu1 %v8526_v46 }
 0x320   :  { %7194 = vmatprep.subr.bf16.mxu0 %v8527_v35  ;;  %7216 = vmatprep.subr.bf16.mxu1 %v8528_v50 }
 0x323   :  { %7195 = vmatpush3.bf16.msra.mxu0 %v8529_v53  ;;  %7217 = vmatpush3.bf16.msra.mxu1 %v8530_v38 }
 0x324   :  { %7196 = vmatprep.subr.bf16.mxu0 %v8531_v54  ;;  %7218 = vmatprep.subr.bf16.mxu1 %v8532_v55 }
 0x327   :  { %7197 = vmatpush3.bf16.msra.mxu0 %v8533_v56  ;;  %7219 = vmatpush3.bf16.msra.mxu1 %v8534_v47 }
 0x328   :  { %7198 = vmatprep.subr.bf16.mxu0 %v8535_v57  ;;  %7220 = vmatprep.subr.bf16.mxu1 %v8536_v58 }
 0x32b   :  { %7199 = vmatpush3.bf16.msra.mxu0 %v8537_v59  ;;  %7221 = vmatpush3.bf16.msra.mxu1 %v8538_v48 }
 0x32c   :  { %7200 = vmatprep.subr.bf16.mxu0 %v8539_v61  ;;  %7222 = vmatprep.subr.bf16.mxu1 %v8540_v63 }
 0x32f   :  { %7201 = vmatpush3.bf16.msra.mxu0 %v8541_v44  ;;  %7223 = vmatpush3.bf16.msra.mxu1 %v8542_v1 }
 0x3e5   :  { %v5470_v10 = vpop.f32.mrb[0].mxu0  ;;  %v6003_v11 = vpop.f32.mrb[0].mxu1 }
 0x3e6   :  { %v7230_v12 = vadd.f32 %v5470_v10, %v814_v5  ;;  %v7232_v0 = vadd.f32 %v6003_v11, %v822_v6  ;;  %v5472_v52 = vpop.f32.mrb[1].mxu0  ;;  %v6005_v15 = vpop.f32.mrb[1].mxu1 }
 0x3e7   :  { %v7231_v16 = vadd.f32 %v5472_v52, %v818_v7  ;;  %v7233_v8 = vadd.f32 %v6005_v15, %v826_v62  ;;  %v5474_v9 = vpop.f32.mrb[2].mxu0  ;;  %v6007_v17 = vpop.f32.mrb[2].mxu1 }
 0x3e8   :  { %v6010_v18 = vmax.f32 %v7230_v12, 0.0  ;;  %v6012_v19 = vmax.f32 %v7232_v0, 0.0  ;;  %v5475_v20 = vpop.f32.mrb[3].mxu0  ;;  %v6008_v22 = vpop.f32.mrb[3].mxu1 }
 0x3e9   :  { %v6011_v23 = vmax.f32 %v7231_v16, 0.0  ;;  %v6013_v42 = vmax.f32 %v7233_v8, 0.0 }
 0x3ea   :  { %v6014_v27 = vpack.c.bf16 %v6010_v18, %v6010_v18  ;;  %v6016_v28 = vpack.c.bf16 %v6012_v19, %v6012_v19 }
 0x3eb   :  { %v6015_v24 = vpack.c.bf16 %v6011_v23, %v6011_v23  ;;  %v6017_v13 = vpack.c.bf16 %v6013_v42, %v6013_v42 }
 0x3ed   :  { %6313 = vmatprep.mubr.bf16.mxu0 %v6015_v24  ;;  %6353 = vmatprep.mubr.bf16.mxu1 %v6017_v13 }
 0x3ee   :  { %6314 = vmatmul.mubr.bf16.vlgmr.msra.gmra.mrb[4].mxu0 %v6014_v27  ;;  %6354 = vmatmul.mubr.bf16.vlgmr.msra.gmra.mrb[4].mxu1 %v6016_v28 }
 0x4c1   :  { %v7202_v29 = vpop.f32.mrb[4].mxu0  ;;  %v7224_v14 = vpop.f32.mrb[4].mxu1 }
 0x4c2   :  { %v7203_v31 = vpop.f32.mrb[5].mxu0  ;;  %v7225_v25 = vpop.f32.mrb[5].mxu1 }
 0x4c3   :  { %v7204_v32 = vadd.f32 %v7203_v31, %v7202_v29  ;;  %v7226_v33 = vadd.f32 %v7225_v25, %v7224_v14  ;;  %v7205_v26 = vpop.f32.mrb[6].mxu0  ;;  %v7227_v49 = vpop.f32.mrb[6].mxu1 }
 0x4c4   :  { %v7206_v36 = vpop.f32.mrb[7].mxu0  ;;  %v7228_v37 = vpop.f32.mrb[7].mxu1 }
 0x4c5   :  { %v6316_v21 = vadd.f32 %v7204_v32, %v7153_v30 }
 0x4c7   :  { %v6356_v39 = vadd.f32 %v7226_v33, %v6316_v21 }
 0x4c9   :  { %6361 = vst [vmem:[%s11182_s5] sm:$0x3] %v6356_v39 }

</bundles_post_ra>
